<compile_context>
chip_gen: v6e
topology: v6e:2x2x1
jax: 0.10.0
libtpu: 0.0.40
codegen_flags: <defaults>
</compile_context>

<pallas_src>
import functools
import math

import jax
import jax.numpy as jnp
from jax.experimental import pallas as pl
from jax.experimental.pallas import tpu as pltpu


# ----------------------------- config ---------------------------------------
class Config:
    selected_features = list(range(4))      # input_size = 4
    hidden_size = (32, 32)                  # LSTM1 / LSTM2 hidden dims
    seq_len = 16
    conv_kernel = 3
    conv_stride = 1
    max_pooling_kernel = 2
    max_pooling_stride = 2
    pred_len = 8
    dropout = 0.0                           # eval-mode dropout == identity


def compute_shape(x, conv_kernel, conv_stride, mp_kernel, mp_stride):
    x = (x - (conv_kernel - 1) - 1) / conv_stride + 1
    x = (x - (mp_kernel - 1) - 1) / mp_stride + 1
    return int(x)


# ----------------------------- fused kernel ----------------------------------
def _fused_kernel(x_ref, wx_ref, wr_ref, ba_ref,
                  cb1_ref, cb2_ref, lb1_ref, lb2_ref,
                  cw1_hbm, cw2_hbm, w1_hbm, w2_hbm,
                  o_ref,
                  seq2_ref, p1_ref, p2_ref,
                  cw1_v, cw2_v, w1_v, w2_v, dma_sem,
                  *, N, L, H1, H2, K, mp_k, mp_s,
                  Lc1, Lp1, Lc2, Lp2, pred_len):
    f32 = jnp.float32
    S1, S2 = 3 * H1, 3 * H2          # sigmoid-gate widths of LSTM1 / LSTM2

    # ---- kick off conv/head weight DMAs; they land while the LSTM wavefront runs
    cp_cw1 = pltpu.make_async_copy(cw1_hbm, cw1_v, dma_sem.at[0])
    cp_cw2 = pltpu.make_async_copy(cw2_hbm, cw2_v, dma_sem.at[1])
    cp_w1 = pltpu.make_async_copy(w1_hbm, w1_v, dma_sem.at[2])
    cp_w2 = pltpu.make_async_copy(w2_hbm, w2_v, dma_sem.at[3])
    cp_cw1.start()
    cp_cw2.start()
    cp_w1.start()
    cp_w2.start()

    # ---- hoisted LSTM1 input projection + fused biases: one (L+1)*N x 256 matmul
    #      column layout: [sig1(3H1) | sig2(3H2) | tanh1(H1) | tanh2(H2)]
    xp = jnp.dot(x_ref[...], wx_ref[...], preferred_element_type=f32) + ba_ref[...]
    wr = wr_ref[...]                                                  # (2H1+H2, 4H1+4H2)

    h1 = jnp.zeros((N, H1), f32)
    c1 = jnp.zeros((N, H1), f32)
    x2 = jnp.zeros((N, H1), f32)      # relu(h1), LSTM2's per-step input
    h2 = jnp.zeros((N, H2), f32)
    c2 = jnp.zeros((N, H2), f32)

    # ---- wavefront recurrence: combined step s = LSTM1 time s and LSTM2 time s-1
    for s in range(L + 1):                                            # static unroll
        stacked = jnp.concatenate([h1, x2, h2], axis=1)               # (N, 2H1+H2)
        g = xp[s * N:(s + 1) * N, :] + jnp.dot(stacked, wr,
                                               preferred_element_type=f32)
        sig = jax.nn.sigmoid(g[:, 0:S1 + S2])                         # all 6 sigmoid gates
        tnh = jnp.tanh(g[:, S1 + S2:])                                # both cell gates
        if s < L:                                                     # LSTM1 step t = s
            c1 = sig[:, H1:2 * H1] * c1 + sig[:, 0:H1] * tnh[:, 0:H1]
            h1 = sig[:, 2 * H1:3 * H1] * jnp.tanh(c1)
            x2 = jnp.maximum(h1, 0.0)                                 # ReLU feeding LSTM2
        if s >= 1:                                                    # LSTM2 step t = s-1
            c2 = (sig[:, S1 + H2:S1 + 2 * H2] * c2
                  + sig[:, S1:S1 + H2] * tnh[:, H1:H1 + H2])
            h2 = sig[:, S1 + 2 * H2:S1 + 3 * H2] * jnp.tanh(c2)
            seq2_ref[pl.ds((s - 1) * N, N), :] = h2                   # position-major rows

    # ---- conv1: per-tap accumulation (no im2col lane concat) + maxpool into scratch
    cp_cw1.wait()
    y1 = jnp.dot(seq2_ref[pl.ds(0, Lc1 * N), :], cw1_v[pl.ds(0, H2), :],
                 preferred_element_type=f32)
    for k in range(1, K):
        y1 = y1 + jnp.dot(seq2_ref[pl.ds(k * N, Lc1 * N), :],
                          cw1_v[pl.ds(k * H2, H2), :],
                          preferred_element_type=f32)
    y1 = y1 + cb1_ref[...]                                            # (Lc1*N, 64)
    for q in range(Lp1):
        base = q * mp_s * N
        m = y1[base:base + N, :]
        for j in range(1, mp_k):
            m = jnp.maximum(m, y1[base + j * N: base + (j + 1) * N, :])
        p1_ref[pl.ds(q * N, N), :] = m                                # (Lp1*N, 64)

    # ---- conv2 + maxpool
    cp_cw2.wait()
    C1 = cw1_v.shape[1]                                               # 64 channels
    y2 = jnp.dot(p1_ref[pl.ds(0, Lc2 * N), :], cw2_v[pl.ds(0, C1), :],
                 preferred_element_type=f32)
    for k in range(1, K):
        y2 = y2 + jnp.dot(p1_ref[pl.ds(k * N, Lc2 * N), :],
                          cw2_v[pl.ds(k * C1, C1), :],
                          preferred_element_type=f32)
    y2 = y2 + cb2_ref[...]                                            # (Lc2*N, 32)
    for q in range(Lp2):
        base = q * mp_s * N
        m = y2[base:base + N, :]
        for j in range(1, mp_k):
            m = jnp.maximum(m, y2[base + j * N: base + (j + 1) * N, :])
        p2_ref[pl.ds(q * N, N), :] = m                                # (Lp2*N, 32)

    # ---- head: linear1 -> relu -> linear2 (lane-dense w2, diagonal block extract)
    cp_w1.wait()
    z = jnp.dot(p2_ref[...], w1_v[...], preferred_element_type=f32) + lb1_ref[...]
    z = jnp.maximum(z, 0.0)                                           # (Lp2*N, 1024)
    cp_w2.wait()
    zz = jnp.dot(z, w2_v[...], preferred_element_type=f32)            # (Lp2*N, Lp2*pred)
    acc = jnp.zeros((N, pred_len), f32) + lb2_ref[...]
    for l in range(Lp2):
        acc = acc + zz[l * N:(l + 1) * N, l * pred_len:(l + 1) * pred_len]
    o_ref[...] = acc


# ----------------------------- params / packing -------------------------------
def init_params(cfg, key):
    F = len(cfg.selected_features)
    H1, H2 = cfg.hidden_size
    K = cfg.conv_kernel
    l_out1 = compute_shape(cfg.seq_len, K, cfg.conv_stride,
                           cfg.max_pooling_kernel, cfg.max_pooling_stride)
    l_out2 = compute_shape(l_out1, K, cfg.conv_stride,
                           cfg.max_pooling_kernel, cfg.max_pooling_stride)
    keys = jax.random.split(key, 16)

    def u(k, shape, fan_in):
        bound = 1.0 / math.sqrt(fan_in)
        return jax.random.uniform(k, shape, jnp.float32, -bound, bound)

    p = {
        "lstm1_w_ih": u(keys[0], (4 * H1, F), H1),
        "lstm1_w_hh": u(keys[1], (4 * H1, H1), H1),
        "lstm1_b_ih": u(keys[2], (4 * H1,), H1),
        "lstm1_b_hh": u(keys[3], (4 * H1,), H1),
        "lstm2_w_ih": u(keys[4], (4 * H2, H1), H2),
        "lstm2_w_hh": u(keys[5], (4 * H2, H2), H2),
        "lstm2_b_ih": u(keys[6], (4 * H2,), H2),
        "lstm2_b_hh": u(keys[7], (4 * H2,), H2),
        "conv1_w": u(keys[8], (64, H2, K), H2 * K),
        "conv1_b": u(keys[9], (64,), H2 * K),
        "conv2_w": u(keys[10], (32, 64, K), 64 * K),
        "conv2_b": u(keys[11], (32,), 64 * K),
        "lin1_w": u(keys[12], (1024, 32), 32),
        "lin1_b": u(keys[13], (1024,), 32),
        "lin2_w": u(keys[14], (cfg.pred_len, 1024 * l_out2), 1024 * l_out2),
        "lin2_b": u(keys[15], (cfg.pred_len,), 1024 * l_out2),
    }
    return p, (l_out1, l_out2)


def pack_params(p, cfg):
    """Repack PyTorch-layout parameters ONCE into fused kernel layouts."""
    if cfg.conv_stride != 1:
        raise NotImplementedError("fused conv path assumes conv_stride == 1")
    H1, H2 = cfg.hidden_size
    K = cfg.conv_kernel
    F = len(cfg.selected_features)
    l_out1 = compute_shape(cfg.seq_len, K, cfg.conv_stride,
                           cfg.max_pooling_kernel, cfg.max_pooling_stride)
    l_out2 = compute_shape(l_out1, K, cfg.conv_stride,
                           cfg.max_pooling_kernel, cfg.max_pooling_stride)
    S1, S2 = 3 * H1, 3 * H2
    G = 4 * H1 + 4 * H2
    f32 = jnp.float32

    def reorder(w, H):
        # PyTorch gate blocks (i, f, g, o) -> (i, f, o, g) along axis 0
        return jnp.concatenate([w[0:2 * H], w[3 * H:4 * H], w[2 * H:3 * H]], axis=0)

    wih1 = reorder(p["lstm1_w_ih"], H1).T          # (F,  4H1) cols = i,f,o,g
    whh1 = reorder(p["lstm1_w_hh"], H1).T          # (H1, 4H1)
    wih2 = reorder(p["lstm2_w_ih"], H2).T          # (H1, 4H2)
    whh2 = reorder(p["lstm2_w_hh"], H2).T          # (H2, 4H2)
    b1 = reorder(p["lstm1_b_ih"] + p["lstm1_b_hh"], H1)   # (4H1,)
    b2 = reorder(p["lstm2_b_ih"] + p["lstm2_b_hh"], H2)   # (4H2,)

    # fused column layout: [sig1(3H1) | sig2(3H2) | tanh1(H1) | tanh2(H2)]
    wx = jnp.zeros((F, G), f32)
    wx = wx.at[:, 0:S1].set(wih1[:, 0:S1])
    wx = wx.at[:, S1 + S2:S1 + S2 + H1].set(wih1[:, S1:])

    bias = jnp.zeros((1, G), f32)
    bias = bias.at[0, 0:S1].set(b1[0:S1])
    bias = bias.at[0, S1 + S2:S1 + S2 + H1].set(b1[S1:])
    bias = bias.at[0, S1:S1 + S2].set(b2[0:S2])
    bias = bias.at[0, S1 + S2 + H1:].set(b2[S2:])

    # block recurrent weight: rows = [h1 | relu(h1) | h2]
    wr = jnp.zeros((2 * H1 + H2, G), f32)
    wr = wr.at[0:H1, 0:S1].set(whh1[:, 0:S1])                       # LSTM1 recurrence
    wr = wr.at[0:H1, S1 + S2:S1 + S2 + H1].set(whh1[:, S1:])
    wr = wr.at[H1:2 * H1, S1:S1 + S2].set(wih2[:, 0:S2])            # LSTM2 input proj
    wr = wr.at[H1:2 * H1, S1 + S2 + H1:].set(wih2[:, S2:])
    wr = wr.at[2 * H1:, S1:S1 + S2].set(whh2[:, 0:S2])              # LSTM2 recurrence
    wr = wr.at[2 * H1:, S1 + S2 + H1:].set(whh2[:, S2:])

    packed = {
        "wx": wx, "wr": wr, "bias": bias,
        # conv weights as im2col tap blocks: row = k*C_in + c_in, cols = C_out
        "cw1": jnp.transpose(p["conv1_w"], (2, 1, 0)).reshape(K * H2, 64),
        "cb1": p["conv1_b"].reshape(1, 64),
        "cw2": jnp.transpose(p["conv2_w"], (2, 1, 0)).reshape(K * 64, 32),
        "cb2": p["conv2_b"].reshape(1, 32),
        # head: linear1 as (32, 1024); linear2 lane-dense (1024, l_out2*pred_len),
        # column = l*pred_len + p (PyTorch flatten: feature index = l*1024 + h)
        "w1": p["lin1_w"].T,
        "lb1": p["lin1_b"].reshape(1, 1024),
        "w2": jnp.transpose(p["lin2_w"].reshape(cfg.pred_len, l_out2, 1024),
                            (2, 1, 0)).reshape(1024, l_out2 * cfg.pred_len),
        "lb2": p["lin2_b"].reshape(1, cfg.pred_len),
    }
    packed = {k: jnp.asarray(v, f32) for k, v in packed.items()}
    return packed, (l_out1, l_out2)


# ----------------------------- forward ----------------------------------------
def forward(x, packed, cfg):
    # x: (N, seq_len, input_size) — PyTorch batch-first module input
    N, L, F = x.shape
    H1, H2 = cfg.hidden_size
    K = cfg.conv_kernel
    mp_k, mp_s = cfg.max_pooling_kernel, cfg.max_pooling_stride
    Lc1 = (L - K) // cfg.conv_stride + 1
    Lp1 = (Lc1 - mp_k) // mp_s + 1
    Lc2 = (Lp1 - K) // cfg.conv_stride + 1
    Lp2 = (Lc2 - mp_k) // mp_s + 1

    # x.permute(1,0,2), flatten (seq, batch) -> position-major rows t*N + n;
    # one extra zero time step so the wavefront's final step (LSTM2 t=L-1) is uniform.
    x_t = jnp.transpose(x, (1, 0, 2)).astype(jnp.float32)            # (L, N, F)
    x_pad = jnp.concatenate([x_t, jnp.zeros((1, N, F), jnp.float32)], axis=0)
    x_flat = x_pad.reshape((L + 1) * N, F)

    kernel = functools.partial(
        _fused_kernel, N=N, L=L, H1=H1, H2=H2, K=K, mp_k=mp_k, mp_s=mp_s,
        Lc1=Lc1, Lp1=Lp1, Lc2=Lc2, Lp2=Lp2, pred_len=cfg.pred_len)

    vmem = pl.BlockSpec(memory_space=pltpu.MemorySpace.VMEM)
    anyspace = pl.BlockSpec(memory_space=pl.ANY)

    out = pl.pallas_call(
        kernel,
        out_shape=jax.ShapeDtypeStruct((N, cfg.pred_len), jnp.float32),
        in_specs=[vmem] * 8 + [anyspace] * 4,
        out_specs=vmem,
        scratch_shapes=[
            pltpu.VMEM((L * N, H2), jnp.float32),                 # seq2 (LSTM2 outputs)
            pltpu.VMEM((Lp1 * N, packed["cb1"].shape[1]), jnp.float32),   # pool1
            pltpu.VMEM((Lp2 * N, packed["cb2"].shape[1]), jnp.float32),   # pool2
            pltpu.VMEM(packed["cw1"].shape, jnp.float32),         # conv1 weight landing buf
            pltpu.VMEM(packed["cw2"].shape, jnp.float32),         # conv2 weight landing buf
            pltpu.VMEM(packed["w1"].shape, jnp.float32),          # linear1 weight
            pltpu.VMEM(packed["w2"].shape, jnp.float32),          # linear2 weight
            pltpu.SemaphoreType.DMA((4,)),
        ],
    )(x_flat,
      packed["wx"], packed["wr"], packed["bias"],
      packed["cb1"], packed["cb2"], packed["lb1"], packed["lb2"],
      packed["cw1"], packed["cw2"], packed["w1"], packed["w2"])
    return out[..., None]                                         # x.unsqueeze(-1)


# ----------------------------------- main --------------------------------------
if __name__ == "__main__":
    cfg = Config()
    key = jax.random.PRNGKey(0)
    pkey, xkey = jax.random.split(key)

    raw_params, _ = init_params(cfg, pkey)
    packed_params, (l_out1, l_out2) = pack_params(raw_params, cfg)

    N = 2
    x = jax.random.normal(xkey, (N, cfg.seq_len, len(cfg.selected_features)),
                          jnp.float32)

    fwd = jax.jit(functools.partial(forward, cfg=cfg))
    y = jax.block_until_ready(fwd(x, packed_params))

    assert y.shape == (N, cfg.pred_len, 1), y.shape
    assert bool(jnp.all(jnp.isfinite(y)))
    print("KERNEL_OK")
</pallas_src>

<mosaic_0001>
module attributes {stable_mosaic.version = 11 : i64} {
  func.func @_fused_kernel(%arg0: memref<34x4xf32, #tpu.memory_space<vmem>>, %arg1: memref<4x256xf32, #tpu.memory_space<vmem>>, %arg2: memref<96x256xf32, #tpu.memory_space<vmem>>, %arg3: memref<1x256xf32, #tpu.memory_space<vmem>>, %arg4: memref<1x64xf32, #tpu.memory_space<vmem>>, %arg5: memref<1x32xf32, #tpu.memory_space<vmem>>, %arg6: memref<1x1024xf32, #tpu.memory_space<vmem>>, %arg7: memref<1x8xf32, #tpu.memory_space<vmem>>, %arg8: memref<96x64xf32, #tpu.memory_space<any>>, %arg9: memref<192x32xf32, #tpu.memory_space<any>>, %arg10: memref<32x1024xf32, #tpu.memory_space<any>>, %arg11: memref<1024x16xf32, #tpu.memory_space<any>>, %arg12: memref<2x8xf32, #tpu.memory_space<vmem>>, %arg13: memref<32x32xf32, #tpu.memory_space<vmem>>, %arg14: memref<14x64xf32, #tpu.memory_space<vmem>>, %arg15: memref<4x32xf32, #tpu.memory_space<vmem>>, %arg16: memref<96x64xf32, #tpu.memory_space<vmem>>, %arg17: memref<192x32xf32, #tpu.memory_space<vmem>>, %arg18: memref<32x1024xf32, #tpu.memory_space<vmem>>, %arg19: memref<1024x16xf32, #tpu.memory_space<vmem>>, %arg20: memref<4x!tpu.dma_semaphore, #tpu.memory_space<semaphore_mem>>) attributes {dimension_semantics = [], scalar_prefetch = 0 : i64, scratch_operands = 8 : i64, tpu.core_type = #tpu.core_type<tc>} {
    %c0_i32 = arith.constant 0 : i32
    %0 = tpu.memref_slice %arg20[%c0_i32] : memref<4x!tpu.dma_semaphore, #tpu.memory_space<semaphore_mem>> -> memref<1x!tpu.dma_semaphore, #tpu.memory_space<semaphore_mem>>
    %1 = tpu.memref_squeeze %0 : memref<1x!tpu.dma_semaphore, #tpu.memory_space<semaphore_mem>> -> memref<!tpu.dma_semaphore, #tpu.memory_space<semaphore_mem>>
    tpu.enqueue_dma source(%arg8 : memref<96x64xf32, #tpu.memory_space<any>>) target(%arg16 : memref<96x64xf32, #tpu.memory_space<vmem>>) target_semaphore(%1 : memref<!tpu.dma_semaphore, #tpu.memory_space<semaphore_mem>>)
    %c1_i32 = arith.constant 1 : i32
    %2 = tpu.memref_slice %arg20[%c1_i32] : memref<4x!tpu.dma_semaphore, #tpu.memory_space<semaphore_mem>> -> memref<1x!tpu.dma_semaphore, #tpu.memory_space<semaphore_mem>>
    %3 = tpu.memref_squeeze %2 : memref<1x!tpu.dma_semaphore, #tpu.memory_space<semaphore_mem>> -> memref<!tpu.dma_semaphore, #tpu.memory_space<semaphore_mem>>
    tpu.enqueue_dma source(%arg9 : memref<192x32xf32, #tpu.memory_space<any>>) target(%arg17 : memref<192x32xf32, #tpu.memory_space<vmem>>) target_semaphore(%3 : memref<!tpu.dma_semaphore, #tpu.memory_space<semaphore_mem>>)
    %c2_i32 = arith.constant 2 : i32
    %4 = tpu.memref_slice %arg20[%c2_i32] : memref<4x!tpu.dma_semaphore, #tpu.memory_space<semaphore_mem>> -> memref<1x!tpu.dma_semaphore, #tpu.memory_space<semaphore_mem>>
    %5 = tpu.memref_squeeze %4 : memref<1x!tpu.dma_semaphore, #tpu.memory_space<semaphore_mem>> -> memref<!tpu.dma_semaphore, #tpu.memory_space<semaphore_mem>>
    tpu.enqueue_dma source(%arg10 : memref<32x1024xf32, #tpu.memory_space<any>>) target(%arg18 : memref<32x1024xf32, #tpu.memory_space<vmem>>) target_semaphore(%5 : memref<!tpu.dma_semaphore, #tpu.memory_space<semaphore_mem>>)
    %c3_i32 = arith.constant 3 : i32
    %6 = tpu.memref_slice %arg20[%c3_i32] : memref<4x!tpu.dma_semaphore, #tpu.memory_space<semaphore_mem>> -> memref<1x!tpu.dma_semaphore, #tpu.memory_space<semaphore_mem>>
    %7 = tpu.memref_squeeze %6 : memref<1x!tpu.dma_semaphore, #tpu.memory_space<semaphore_mem>> -> memref<!tpu.dma_semaphore, #tpu.memory_space<semaphore_mem>>
    tpu.enqueue_dma source(%arg11 : memref<1024x16xf32, #tpu.memory_space<any>>) target(%arg19 : memref<1024x16xf32, #tpu.memory_space<vmem>>) target_semaphore(%7 : memref<!tpu.dma_semaphore, #tpu.memory_space<semaphore_mem>>)
    %c0 = arith.constant 0 : index
    %c0_0 = arith.constant 0 : index
    %8 = vector.load %arg0[%c0, %c0_0] : memref<34x4xf32, #tpu.memory_space<vmem>>, vector<34x4xf32>
    %c0_1 = arith.constant 0 : index
    %c0_2 = arith.constant 0 : index
    %9 = vector.load %arg1[%c0_1, %c0_2] : memref<4x256xf32, #tpu.memory_space<vmem>>, vector<4x256xf32>
    %cst = arith.constant dense<0.000000e+00> : vector<34x256xf32>
    %10 = tpu.matmul %8, %9, %cst {dimension_numbers = #tpu.dot_dimension_numbers<[1], [0], [0], [1], [0, 0, 1, 1], [], []>} : vector<34x4xf32>, vector<4x256xf32>, vector<34x256xf32> -> vector<34x256xf32>
    %c0_3 = arith.constant 0 : index
    %c0_4 = arith.constant 0 : index
    %11 = vector.load %arg3[%c0_3, %c0_4] : memref<1x256xf32, #tpu.memory_space<vmem>>, vector<1x256xf32>
    %12 = vector.broadcast %11 : vector<1x256xf32> to vector<34x256xf32>
    %13 = arith.addf %10, %12 : vector<34x256xf32>
    %c0_5 = arith.constant 0 : index
    %c0_6 = arith.constant 0 : index
    %14 = vector.load %arg2[%c0_5, %c0_6] : memref<96x256xf32, #tpu.memory_space<vmem>>, vector<96x256xf32>
    %cst_7 = arith.constant 0.000000e+00 : f32
    %15 = vector.broadcast %cst_7 : f32 to vector<2x32xf32>
    %cst_8 = arith.constant 0.000000e+00 : f32
    %16 = vector.broadcast %cst_8 : f32 to vector<2x32xf32>
    %cst_9 = arith.constant 0.000000e+00 : f32
    %17 = vector.broadcast %cst_9 : f32 to vector<2x32xf32>
    %cst_10 = arith.constant 0.000000e+00 : f32
    %18 = vector.broadcast %cst_10 : f32 to vector<2x32xf32>
    %cst_11 = arith.constant 0.000000e+00 : f32
    %19 = vector.broadcast %cst_11 : f32 to vector<2x32xf32>
    %20 = tpu.concatenate %15, %17, %18 in 1 : vector<2x32xf32>, vector<2x32xf32>, vector<2x32xf32> -> vector<2x96xf32>
    %21 = vector.extract_strided_slice %13 {offsets = [0, 0], sizes = [2, 256], strides = [1, 1]} : vector<34x256xf32> to vector<2x256xf32>
    %cst_12 = arith.constant dense<0.000000e+00> : vector<2x256xf32>
    %22 = tpu.matmul %20, %14, %cst_12 {dimension_numbers = #tpu.dot_dimension_numbers<[1], [0], [0], [1], [0, 0, 1, 1], [], []>} : vector<2x96xf32>, vector<96x256xf32>, vector<2x256xf32> -> vector<2x256xf32>
    %23 = arith.addf %21, %22 : vector<2x256xf32>
    %24 = vector.extract_strided_slice %23 {offsets = [0, 0], sizes = [2, 192], strides = [1, 1]} : vector<2x256xf32> to vector<2x192xf32>
    %25 = arith.negf %24 : vector<2x192xf32>
    %26 = math.exp %25 : vector<2x192xf32>
    %cst_13 = arith.constant 1.000000e+00 : f32
    %27 = vector.broadcast %cst_13 : f32 to vector<2x192xf32>
    %28 = arith.addf %27, %26 : vector<2x192xf32>
    %29 = arith.divf %27, %28 : vector<2x192xf32>
    %30 = vector.extract_strided_slice %23 {offsets = [0, 192], sizes = [2, 64], strides = [1, 1]} : vector<2x256xf32> to vector<2x64xf32>
    %31 = math.tanh %30 : vector<2x64xf32>
    %32 = vector.extract_strided_slice %29 {offsets = [0, 32], sizes = [2, 32], strides = [1, 1]} : vector<2x192xf32> to vector<2x32xf32>
    %33 = arith.mulf %32, %16 : vector<2x32xf32>
    %34 = vector.extract_strided_slice %29 {offsets = [0, 0], sizes = [2, 32], strides = [1, 1]} : vector<2x192xf32> to vector<2x32xf32>
    %35 = vector.extract_strided_slice %31 {offsets = [0, 0], sizes = [2, 32], strides = [1, 1]} : vector<2x64xf32> to vector<2x32xf32>
    %36 = arith.mulf %34, %35 : vector<2x32xf32>
    %37 = arith.addf %33, %36 : vector<2x32xf32>
    %38 = vector.extract_strided_slice %29 {offsets = [0, 64], sizes = [2, 32], strides = [1, 1]} : vector<2x192xf32> to vector<2x32xf32>
    %39 = math.tanh %37 : vector<2x32xf32>
    %40 = arith.mulf %38, %39 : vector<2x32xf32>
    %cst_14 = arith.constant 0.000000e+00 : f32
    %41 = vector.broadcast %cst_14 : f32 to vector<2x32xf32>
    %42 = arith.maximumf %40, %41 : vector<2x32xf32>
    %43 = tpu.concatenate %40, %42, %18 in 1 : vector<2x32xf32>, vector<2x32xf32>, vector<2x32xf32> -> vector<2x96xf32>
    %44 = vector.extract_strided_slice %13 {offsets = [2, 0], sizes = [2, 256], strides = [1, 1]} : vector<34x256xf32> to vector<2x256xf32>
    %cst_15 = arith.constant dense<0.000000e+00> : vector<2x256xf32>
    %45 = tpu.matmul %43, %14, %cst_15 {dimension_numbers = #tpu.dot_dimension_numbers<[1], [0], [0], [1], [0, 0, 1, 1], [], []>} : vector<2x96xf32>, vector<96x256xf32>, vector<2x256xf32> -> vector<2x256xf32>
    %46 = arith.addf %44, %45 : vector<2x256xf32>
    %47 = vector.extract_strided_slice %46 {offsets = [0, 0], sizes = [2, 192], strides = [1, 1]} : vector<2x256xf32> to vector<2x192xf32>
    %48 = arith.negf %47 : vector<2x192xf32>
    %49 = math.exp %48 : vector<2x192xf32>
    %cst_16 = arith.constant 1.000000e+00 : f32
    %50 = vector.broadcast %cst_16 : f32 to vector<2x192xf32>
    %51 = arith.addf %50, %49 : vector<2x192xf32>
    %52 = arith.divf %50, %51 : vector<2x192xf32>
    %53 = vector.extract_strided_slice %46 {offsets = [0, 192], sizes = [2, 64], strides = [1, 1]} : vector<2x256xf32> to vector<2x64xf32>
    %54 = math.tanh %53 : vector<2x64xf32>
    %55 = vector.extract_strided_slice %52 {offsets = [0, 32], sizes = [2, 32], strides = [1, 1]} : vector<2x192xf32> to vector<2x32xf32>
    %56 = arith.mulf %55, %37 : vector<2x32xf32>
    %57 = vector.extract_strided_slice %52 {offsets = [0, 0], sizes = [2, 32], strides = [1, 1]} : vector<2x192xf32> to vector<2x32xf32>
    %58 = vector.extract_strided_slice %54 {offsets = [0, 0], sizes = [2, 32], strides = [1, 1]} : vector<2x64xf32> to vector<2x32xf32>
    %59 = arith.mulf %57, %58 : vector<2x32xf32>
    %60 = arith.addf %56, %59 : vector<2x32xf32>
    %61 = vector.extract_strided_slice %52 {offsets = [0, 64], sizes = [2, 32], strides = [1, 1]} : vector<2x192xf32> to vector<2x32xf32>
    %62 = math.tanh %60 : vector<2x32xf32>
    %63 = arith.mulf %61, %62 : vector<2x32xf32>
    %cst_17 = arith.constant 0.000000e+00 : f32
    %64 = vector.broadcast %cst_17 : f32 to vector<2x32xf32>
    %65 = arith.maximumf %63, %64 : vector<2x32xf32>
    %66 = vector.extract_strided_slice %52 {offsets = [0, 128], sizes = [2, 32], strides = [1, 1]} : vector<2x192xf32> to vector<2x32xf32>
    %67 = arith.mulf %66, %19 : vector<2x32xf32>
    %68 = vector.extract_strided_slice %52 {offsets = [0, 96], sizes = [2, 32], strides = [1, 1]} : vector<2x192xf32> to vector<2x32xf32>
    %69 = vector.extract_strided_slice %54 {offsets = [0, 32], sizes = [2, 32], strides = [1, 1]} : vector<2x64xf32> to vector<2x32xf32>
    %70 = arith.mulf %68, %69 : vector<2x32xf32>
    %71 = arith.addf %67, %70 : vector<2x32xf32>
    %72 = vector.extract_strided_slice %52 {offsets = [0, 160], sizes = [2, 32], strides = [1, 1]} : vector<2x192xf32> to vector<2x32xf32>
    %73 = math.tanh %71 : vector<2x32xf32>
    %74 = arith.mulf %72, %73 : vector<2x32xf32>
    %c0_18 = arith.constant 0 : index
    %c0_19 = arith.constant 0 : index
    %75 = vector.load %arg13[%c0_18, %c0_19] : memref<32x32xf32, #tpu.memory_space<vmem>>, vector<2x32xf32>
    tpu.vector_store %arg13[%c0_18, %c0_19], %74 {strides = array<i32>} : memref<32x32xf32, #tpu.memory_space<vmem>>, vector<2x32xf32>,
    %76 = tpu.concatenate %63, %65, %74 in 1 : vector<2x32xf32>, vector<2x32xf32>, vector<2x32xf32> -> vector<2x96xf32>
    %77 = vector.extract_strided_slice %13 {offsets = [4, 0], sizes = [2, 256], strides = [1, 1]} : vector<34x256xf32> to vector<2x256xf32>
    %cst_20 = arith.constant dense<0.000000e+00> : vector<2x256xf32>
    %78 = tpu.matmul %76, %14, %cst_20 {dimension_numbers = #tpu.dot_dimension_numbers<[1], [0], [0], [1], [0, 0, 1, 1], [], []>} : vector<2x96xf32>, vector<96x256xf32>, vector<2x256xf32> -> vector<2x256xf32>
    %79 = arith.addf %77, %78 : vector<2x256xf32>
    %80 = vector.extract_strided_slice %79 {offsets = [0, 0], sizes = [2, 192], strides = [1, 1]} : vector<2x256xf32> to vector<2x192xf32>
    %81 = arith.negf %80 : vector<2x192xf32>
    %82 = math.exp %81 : vector<2x192xf32>
    %cst_21 = arith.constant 1.000000e+00 : f32
    %83 = vector.broadcast %cst_21 : f32 to vector<2x192xf32>
    %84 = arith.addf %83, %82 : vector<2x192xf32>
    %85 = arith.divf %83, %84 : vector<2x192xf32>
    %86 = vector.extract_strided_slice %79 {offsets = [0, 192], sizes = [2, 64], strides = [1, 1]} : vector<2x256xf32> to vector<2x64xf32>
    %87 = math.tanh %86 : vector<2x64xf32>
    %88 = vector.extract_strided_slice %85 {offsets = [0, 32], sizes = [2, 32], strides = [1, 1]} : vector<2x192xf32> to vector<2x32xf32>
    %89 = arith.mulf %88, %60 : vector<2x32xf32>
    %90 = vector.extract_strided_slice %85 {offsets = [0, 0], sizes = [2, 32], strides = [1, 1]} : vector<2x192xf32> to vector<2x32xf32>
    %91 = vector.extract_strided_slice %87 {offsets = [0, 0], sizes = [2, 32], strides = [1, 1]} : vector<2x64xf32> to vector<2x32xf32>
    %92 = arith.mulf %90, %91 : vector<2x32xf32>
    %93 = arith.addf %89, %92 : vector<2x32xf32>
    %94 = vector.extract_strided_slice %85 {offsets = [0, 64], sizes = [2, 32], strides = [1, 1]} : vector<2x192xf32> to vector<2x32xf32>
    %95 = math.tanh %93 : vector<2x32xf32>
    %96 = arith.mulf %94, %95 : vector<2x32xf32>
    %cst_22 = arith.constant 0.000000e+00 : f32
    %97 = vector.broadcast %cst_22 : f32 to vector<2x32xf32>
    %98 = arith.maximumf %96, %97 : vector<2x32xf32>
    %99 = vector.extract_strided_slice %85 {offsets = [0, 128], sizes = [2, 32], strides = [1, 1]} : vector<2x192xf32> to vector<2x32xf32>
    %100 = arith.mulf %99, %71 : vector<2x32xf32>
    %101 = vector.extract_strided_slice %85 {offsets = [0, 96], sizes = [2, 32], strides = [1, 1]} : vector<2x192xf32> to vector<2x32xf32>
    %102 = vector.extract_strided_slice %87 {offsets = [0, 32], sizes = [2, 32], strides = [1, 1]} : vector<2x64xf32> to vector<2x32xf32>
    %103 = arith.mulf %101, %102 : vector<2x32xf32>
    %104 = arith.addf %100, %103 : vector<2x32xf32>
    %105 = vector.extract_strided_slice %85 {offsets = [0, 160], sizes = [2, 32], strides = [1, 1]} : vector<2x192xf32> to vector<2x32xf32>
    %106 = math.tanh %104 : vector<2x32xf32>
    %107 = arith.mulf %105, %106 : vector<2x32xf32>
    %c2 = arith.constant 2 : index
    %c0_23 = arith.constant 0 : index
    %108 = vector.load %arg13[%c2, %c0_23] : memref<32x32xf32, #tpu.memory_space<vmem>>, vector<2x32xf32>
    tpu.vector_store %arg13[%c2, %c0_23], %107 {strides = array<i32>} : memref<32x32xf32, #tpu.memory_space<vmem>>, vector<2x32xf32>,
    %109 = tpu.concatenate %96, %98, %107 in 1 : vector<2x32xf32>, vector<2x32xf32>, vector<2x32xf32> -> vector<2x96xf32>
    %110 = vector.extract_strided_slice %13 {offsets = [6, 0], sizes = [2, 256], strides = [1, 1]} : vector<34x256xf32> to vector<2x256xf32>
    %cst_24 = arith.constant dense<0.000000e+00> : vector<2x256xf32>
    %111 = tpu.matmul %109, %14, %cst_24 {dimension_numbers = #tpu.dot_dimension_numbers<[1], [0], [0], [1], [0, 0, 1, 1], [], []>} : vector<2x96xf32>, vector<96x256xf32>, vector<2x256xf32> -> vector<2x256xf32>
    %112 = arith.addf %110, %111 : vector<2x256xf32>
    %113 = vector.extract_strided_slice %112 {offsets = [0, 0], sizes = [2, 192], strides = [1, 1]} : vector<2x256xf32> to vector<2x192xf32>
    %114 = arith.negf %113 : vector<2x192xf32>
    %115 = math.exp %114 : vector<2x192xf32>
    %cst_25 = arith.constant 1.000000e+00 : f32
    %116 = vector.broadcast %cst_25 : f32 to vector<2x192xf32>
    %117 = arith.addf %116, %115 : vector<2x192xf32>
    %118 = arith.divf %116, %117 : vector<2x192xf32>
    %119 = vector.extract_strided_slice %112 {offsets = [0, 192], sizes = [2, 64], strides = [1, 1]} : vector<2x256xf32> to vector<2x64xf32>
    %120 = math.tanh %119 : vector<2x64xf32>
    %121 = vector.extract_strided_slice %118 {offsets = [0, 32], sizes = [2, 32], strides = [1, 1]} : vector<2x192xf32> to vector<2x32xf32>
    %122 = arith.mulf %121, %93 : vector<2x32xf32>
    %123 = vector.extract_strided_slice %118 {offsets = [0, 0], sizes = [2, 32], strides = [1, 1]} : vector<2x192xf32> to vector<2x32xf32>
    %124 = vector.extract_strided_slice %120 {offsets = [0, 0], sizes = [2, 32], strides = [1, 1]} : vector<2x64xf32> to vector<2x32xf32>
    %125 = arith.mulf %123, %124 : vector<2x32xf32>
    %126 = arith.addf %122, %125 : vector<2x32xf32>
    %127 = vector.extract_strided_slice %118 {offsets = [0, 64], sizes = [2, 32], strides = [1, 1]} : vector<2x192xf32> to vector<2x32xf32>
    %128 = math.tanh %126 : vector<2x32xf32>
    %129 = arith.mulf %127, %128 : vector<2x32xf32>
    %cst_26 = arith.constant 0.000000e+00 : f32
    %130 = vector.broadcast %cst_26 : f32 to vector<2x32xf32>
    %131 = arith.maximumf %129, %130 : vector<2x32xf32>
    %132 = vector.extract_strided_slice %118 {offsets = [0, 128], sizes = [2, 32], strides = [1, 1]} : vector<2x192xf32> to vector<2x32xf32>
    %133 = arith.mulf %132, %104 : vector<2x32xf32>
    %134 = vector.extract_strided_slice %118 {offsets = [0, 96], sizes = [2, 32], strides = [1, 1]} : vector<2x192xf32> to vector<2x32xf32>
    %135 = vector.extract_strided_slice %120 {offsets = [0, 32], sizes = [2, 32], strides = [1, 1]} : vector<2x64xf32> to vector<2x32xf32>
    %136 = arith.mulf %134, %135 : vector<2x32xf32>
    %137 = arith.addf %133, %136 : vector<2x32xf32>
    %138 = vector.extract_strided_slice %118 {offsets = [0, 160], sizes = [2, 32], strides = [1, 1]} : vector<2x192xf32> to vector<2x32xf32>
    %139 = math.tanh %137 : vector<2x32xf32>
    %140 = arith.mulf %138, %139 : vector<2x32xf32>
    %c4 = arith.constant 4 : index
    %c0_27 = arith.constant 0 : index
    %141 = vector.load %arg13[%c4, %c0_27] : memref<32x32xf32, #tpu.memory_space<vmem>>, vector<2x32xf32>
    tpu.vector_store %arg13[%c4, %c0_27], %140 {strides = array<i32>} : memref<32x32xf32, #tpu.memory_space<vmem>>, vector<2x32xf32>,
    %142 = tpu.concatenate %129, %131, %140 in 1 : vector<2x32xf32>, vector<2x32xf32>, vector<2x32xf32> -> vector<2x96xf32>
    %143 = vector.extract_strided_slice %13 {offsets = [8, 0], sizes = [2, 256], strides = [1, 1]} : vector<34x256xf32> to vector<2x256xf32>
    %cst_28 = arith.constant dense<0.000000e+00> : vector<2x256xf32>
    %144 = tpu.matmul %142, %14, %cst_28 {dimension_numbers = #tpu.dot_dimension_numbers<[1], [0], [0], [1], [0, 0, 1, 1], [], []>} : vector<2x96xf32>, vector<96x256xf32>, vector<2x256xf32> -> vector<2x256xf32>
    %145 = arith.addf %143, %144 : vector<2x256xf32>
    %146 = vector.extract_strided_slice %145 {offsets = [0, 0], sizes = [2, 192], strides = [1, 1]} : vector<2x256xf32> to vector<2x192xf32>
    %147 = arith.negf %146 : vector<2x192xf32>
    %148 = math.exp %147 : vector<2x192xf32>
    %cst_29 = arith.constant 1.000000e+00 : f32
    %149 = vector.broadcast %cst_29 : f32 to vector<2x192xf32>
    %150 = arith.addf %149, %148 : vector<2x192xf32>
    %151 = arith.divf %149, %150 : vector<2x192xf32>
    %152 = vector.extract_strided_slice %145 {offsets = [0, 192], sizes = [2, 64], strides = [1, 1]} : vector<2x256xf32> to vector<2x64xf32>
    %153 = math.tanh %152 : vector<2x64xf32>
    %154 = vector.extract_strided_slice %151 {offsets = [0, 32], sizes = [2, 32], strides = [1, 1]} : vector<2x192xf32> to vector<2x32xf32>
    %155 = arith.mulf %154, %126 : vector<2x32xf32>
    %156 = vector.extract_strided_slice %151 {offsets = [0, 0], sizes = [2, 32], strides = [1, 1]} : vector<2x192xf32> to vector<2x32xf32>
    %157 = vector.extract_strided_slice %153 {offsets = [0, 0], sizes = [2, 32], strides = [1, 1]} : vector<2x64xf32> to vector<2x32xf32>
    %158 = arith.mulf %156, %157 : vector<2x32xf32>
    %159 = arith.addf %155, %158 : vector<2x32xf32>
    %160 = vector.extract_strided_slice %151 {offsets = [0, 64], sizes = [2, 32], strides = [1, 1]} : vector<2x192xf32> to vector<2x32xf32>
    %161 = math.tanh %159 : vector<2x32xf32>
    %162 = arith.mulf %160, %161 : vector<2x32xf32>
    %cst_30 = arith.constant 0.000000e+00 : f32
    %163 = vector.broadcast %cst_30 : f32 to vector<2x32xf32>
    %164 = arith.maximumf %162, %163 : vector<2x32xf32>
    %165 = vector.extract_strided_slice %151 {offsets = [0, 128], sizes = [2, 32], strides = [1, 1]} : vector<2x192xf32> to vector<2x32xf32>
    %166 = arith.mulf %165, %137 : vector<2x32xf32>
    %167 = vector.extract_strided_slice %151 {offsets = [0, 96], sizes = [2, 32], strides = [1, 1]} : vector<2x192xf32> to vector<2x32xf32>
    %168 = vector.extract_strided_slice %153 {offsets = [0, 32], sizes = [2, 32], strides = [1, 1]} : vector<2x64xf32> to vector<2x32xf32>
    %169 = arith.mulf %167, %168 : vector<2x32xf32>
    %170 = arith.addf %166, %169 : vector<2x32xf32>
    %171 = vector.extract_strided_slice %151 {offsets = [0, 160], sizes = [2, 32], strides = [1, 1]} : vector<2x192xf32> to vector<2x32xf32>
    %172 = math.tanh %170 : vector<2x32xf32>
    %173 = arith.mulf %171, %172 : vector<2x32xf32>
    %c6 = arith.constant 6 : index
    %c0_31 = arith.constant 0 : index
    %174 = vector.load %arg13[%c6, %c0_31] : memref<32x32xf32, #tpu.memory_space<vmem>>, vector<2x32xf32>
    tpu.vector_store %arg13[%c6, %c0_31], %173 {strides = array<i32>} : memref<32x32xf32, #tpu.memory_space<vmem>>, vector<2x32xf32>,
    %175 = tpu.concatenate %162, %164, %173 in 1 : vector<2x32xf32>, vector<2x32xf32>, vector<2x32xf32> -> vector<2x96xf32>
    %176 = vector.extract_strided_slice %13 {offsets = [10, 0], sizes = [2, 256], strides = [1, 1]} : vector<34x256xf32> to vector<2x256xf32>
    %cst_32 = arith.constant dense<0.000000e+00> : vector<2x256xf32>
    %177 = tpu.matmul %175, %14, %cst_32 {dimension_numbers = #tpu.dot_dimension_numbers<[1], [0], [0], [1], [0, 0, 1, 1], [], []>} : vector<2x96xf32>, vector<96x256xf32>, vector<2x256xf32> -> vector<2x256xf32>
    %178 = arith.addf %176, %177 : vector<2x256xf32>
    %179 = vector.extract_strided_slice %178 {offsets = [0, 0], sizes = [2, 192], strides = [1, 1]} : vector<2x256xf32> to vector<2x192xf32>
    %180 = arith.negf %179 : vector<2x192xf32>
    %181 = math.exp %180 : vector<2x192xf32>
    %cst_33 = arith.constant 1.000000e+00 : f32
    %182 = vector.broadcast %cst_33 : f32 to vector<2x192xf32>
    %183 = arith.addf %182, %181 : vector<2x192xf32>
    %184 = arith.divf %182, %183 : vector<2x192xf32>
    %185 = vector.extract_strided_slice %178 {offsets = [0, 192], sizes = [2, 64], strides = [1, 1]} : vector<2x256xf32> to vector<2x64xf32>
    %186 = math.tanh %185 : vector<2x64xf32>
    %187 = vector.extract_strided_slice %184 {offsets = [0, 32], sizes = [2, 32], strides = [1, 1]} : vector<2x192xf32> to vector<2x32xf32>
    %188 = arith.mulf %187, %159 : vector<2x32xf32>
    %189 = vector.extract_strided_slice %184 {offsets = [0, 0], sizes = [2, 32], strides = [1, 1]} : vector<2x192xf32> to vector<2x32xf32>
    %190 = vector.extract_strided_slice %186 {offsets = [0, 0], sizes = [2, 32], strides = [1, 1]} : vector<2x64xf32> to vector<2x32xf32>
    %191 = arith.mulf %189, %190 : vector<2x32xf32>
    %192 = arith.addf %188, %191 : vector<2x32xf32>
    %193 = vector.extract_strided_slice %184 {offsets = [0, 64], sizes = [2, 32], strides = [1, 1]} : vector<2x192xf32> to vector<2x32xf32>
    %194 = math.tanh %192 : vector<2x32xf32>
    %195 = arith.mulf %193, %194 : vector<2x32xf32>
    %cst_34 = arith.constant 0.000000e+00 : f32
    %196 = vector.broadcast %cst_34 : f32 to vector<2x32xf32>
    %197 = arith.maximumf %195, %196 : vector<2x32xf32>
    %198 = vector.extract_strided_slice %184 {offsets = [0, 128], sizes = [2, 32], strides = [1, 1]} : vector<2x192xf32> to vector<2x32xf32>
    %199 = arith.mulf %198, %170 : vector<2x32xf32>
    %200 = vector.extract_strided_slice %184 {offsets = [0, 96], sizes = [2, 32], strides = [1, 1]} : vector<2x192xf32> to vector<2x32xf32>
    %201 = vector.extract_strided_slice %186 {offsets = [0, 32], sizes = [2, 32], strides = [1, 1]} : vector<2x64xf32> to vector<2x32xf32>
    %202 = arith.mulf %200, %201 : vector<2x32xf32>
    %203 = arith.addf %199, %202 : vector<2x32xf32>
    %204 = vector.extract_strided_slice %184 {offsets = [0, 160], sizes = [2, 32], strides = [1, 1]} : vector<2x192xf32> to vector<2x32xf32>
    %205 = math.tanh %203 : vector<2x32xf32>
    %206 = arith.mulf %204, %205 : vector<2x32xf32>
    %c8 = arith.constant 8 : index
    %c0_35 = arith.constant 0 : index
    %207 = vector.load %arg13[%c8, %c0_35] : memref<32x32xf32, #tpu.memory_space<vmem>>, vector<2x32xf32>
    tpu.vector_store %arg13[%c8, %c0_35], %206 {strides = array<i32>} : memref<32x32xf32, #tpu.memory_space<vmem>>, vector<2x32xf32>,
    %208 = tpu.concatenate %195, %197, %206 in 1 : vector<2x32xf32>, vector<2x32xf32>, vector<2x32xf32> -> vector<2x96xf32>
    %209 = vector.extract_strided_slice %13 {offsets = [12, 0], sizes = [2, 256], strides = [1, 1]} : vector<34x256xf32> to vector<2x256xf32>
    %cst_36 = arith.constant dense<0.000000e+00> : vector<2x256xf32>
    %210 = tpu.matmul %208, %14, %cst_36 {dimension_numbers = #tpu.dot_dimension_numbers<[1], [0], [0], [1], [0, 0, 1, 1], [], []>} : vector<2x96xf32>, vector<96x256xf32>, vector<2x256xf32> -> vector<2x256xf32>
    %211 = arith.addf %209, %210 : vector<2x256xf32>
    %212 = vector.extract_strided_slice %211 {offsets = [0, 0], sizes = [2, 192], strides = [1, 1]} : vector<2x256xf32> to vector<2x192xf32>
    %213 = arith.negf %212 : vector<2x192xf32>
    %214 = math.exp %213 : vector<2x192xf32>
    %cst_37 = arith.constant 1.000000e+00 : f32
    %215 = vector.broadcast %cst_37 : f32 to vector<2x192xf32>
    %216 = arith.addf %215, %214 : vector<2x192xf32>
    %217 = arith.divf %215, %216 : vector<2x192xf32>
    %218 = vector.extract_strided_slice %211 {offsets = [0, 192], sizes = [2, 64], strides = [1, 1]} : vector<2x256xf32> to vector<2x64xf32>
    %219 = math.tanh %218 : vector<2x64xf32>
    %220 = vector.extract_strided_slice %217 {offsets = [0, 32], sizes = [2, 32], strides = [1, 1]} : vector<2x192xf32> to vector<2x32xf32>
    %221 = arith.mulf %220, %192 : vector<2x32xf32>
    %222 = vector.extract_strided_slice %217 {offsets = [0, 0], sizes = [2, 32], strides = [1, 1]} : vector<2x192xf32> to vector<2x32xf32>
    %223 = vector.extract_strided_slice %219 {offsets = [0, 0], sizes = [2, 32], strides = [1, 1]} : vector<2x64xf32> to vector<2x32xf32>
    %224 = arith.mulf %222, %223 : vector<2x32xf32>
    %225 = arith.addf %221, %224 : vector<2x32xf32>
    %226 = vector.extract_strided_slice %217 {offsets = [0, 64], sizes = [2, 32], strides = [1, 1]} : vector<2x192xf32> to vector<2x32xf32>
    %227 = math.tanh %225 : vector<2x32xf32>
    %228 = arith.mulf %226, %227 : vector<2x32xf32>
    %cst_38 = arith.constant 0.000000e+00 : f32
    %229 = vector.broadcast %cst_38 : f32 to vector<2x32xf32>
    %230 = arith.maximumf %228, %229 : vector<2x32xf32>
    %231 = vector.extract_strided_slice %217 {offsets = [0, 128], sizes = [2, 32], strides = [1, 1]} : vector<2x192xf32> to vector<2x32xf32>
    %232 = arith.mulf %231, %203 : vector<2x32xf32>
    %233 = vector.extract_strided_slice %217 {offsets = [0, 96], sizes = [2, 32], strides = [1, 1]} : vector<2x192xf32> to vector<2x32xf32>
    %234 = vector.extract_strided_slice %219 {offsets = [0, 32], sizes = [2, 32], strides = [1, 1]} : vector<2x64xf32> to vector<2x32xf32>
    %235 = arith.mulf %233, %234 : vector<2x32xf32>
    %236 = arith.addf %232, %235 : vector<2x32xf32>
    %237 = vector.extract_strided_slice %217 {offsets = [0, 160], sizes = [2, 32], strides = [1, 1]} : vector<2x192xf32> to vector<2x32xf32>
    %238 = math.tanh %236 : vector<2x32xf32>
    %239 = arith.mulf %237, %238 : vector<2x32xf32>
    %c10 = arith.constant 10 : index
    %c0_39 = arith.constant 0 : index
    %240 = vector.load %arg13[%c10, %c0_39] : memref<32x32xf32, #tpu.memory_space<vmem>>, vector<2x32xf32>
    tpu.vector_store %arg13[%c10, %c0_39], %239 {strides = array<i32>} : memref<32x32xf32, #tpu.memory_space<vmem>>, vector<2x32xf32>,
    %241 = tpu.concatenate %228, %230, %239 in 1 : vector<2x32xf32>, vector<2x32xf32>, vector<2x32xf32> -> vector<2x96xf32>
    %242 = vector.extract_strided_slice %13 {offsets = [14, 0], sizes = [2, 256], strides = [1, 1]} : vector<34x256xf32> to vector<2x256xf32>
    %cst_40 = arith.constant dense<0.000000e+00> : vector<2x256xf32>
    %243 = tpu.matmul %241, %14, %cst_40 {dimension_numbers = #tpu.dot_dimension_numbers<[1], [0], [0], [1], [0, 0, 1, 1], [], []>} : vector<2x96xf32>, vector<96x256xf32>, vector<2x256xf32> -> vector<2x256xf32>
    %244 = arith.addf %242, %243 : vector<2x256xf32>
    %245 = vector.extract_strided_slice %244 {offsets = [0, 0], sizes = [2, 192], strides = [1, 1]} : vector<2x256xf32> to vector<2x192xf32>
    %246 = arith.negf %245 : vector<2x192xf32>
    %247 = math.exp %246 : vector<2x192xf32>
    %cst_41 = arith.constant 1.000000e+00 : f32
    %248 = vector.broadcast %cst_41 : f32 to vector<2x192xf32>
    %249 = arith.addf %248, %247 : vector<2x192xf32>
    %250 = arith.divf %248, %249 : vector<2x192xf32>
    %251 = vector.extract_strided_slice %244 {offsets = [0, 192], sizes = [2, 64], strides = [1, 1]} : vector<2x256xf32> to vector<2x64xf32>
    %252 = math.tanh %251 : vector<2x64xf32>
    %253 = vector.extract_strided_slice %250 {offsets = [0, 32], sizes = [2, 32], strides = [1, 1]} : vector<2x192xf32> to vector<2x32xf32>
    %254 = arith.mulf %253, %225 : vector<2x32xf32>
    %255 = vector.extract_strided_slice %250 {offsets = [0, 0], sizes = [2, 32], strides = [1, 1]} : vector<2x192xf32> to vector<2x32xf32>
    %256 = vector.extract_strided_slice %252 {offsets = [0, 0], sizes = [2, 32], strides = [1, 1]} : vector<2x64xf32> to vector<2x32xf32>
    %257 = arith.mulf %255, %256 : vector<2x32xf32>
    %258 = arith.addf %254, %257 : vector<2x32xf32>
    %259 = vector.extract_strided_slice %250 {offsets = [0, 64], sizes = [2, 32], strides = [1, 1]} : vector<2x192xf32> to vector<2x32xf32>
    %260 = math.tanh %258 : vector<2x32xf32>
    %261 = arith.mulf %259, %260 : vector<2x32xf32>
    %cst_42 = arith.constant 0.000000e+00 : f32
    %262 = vector.broadcast %cst_42 : f32 to vector<2x32xf32>
    %263 = arith.maximumf %261, %262 : vector<2x32xf32>
    %264 = vector.extract_strided_slice %250 {offsets = [0, 128], sizes = [2, 32], strides = [1, 1]} : vector<2x192xf32> to vector<2x32xf32>
    %265 = arith.mulf %264, %236 : vector<2x32xf32>
    %266 = vector.extract_strided_slice %250 {offsets = [0, 96], sizes = [2, 32], strides = [1, 1]} : vector<2x192xf32> to vector<2x32xf32>
    %267 = vector.extract_strided_slice %252 {offsets = [0, 32], sizes = [2, 32], strides = [1, 1]} : vector<2x64xf32> to vector<2x32xf32>
    %268 = arith.mulf %266, %267 : vector<2x32xf32>
    %269 = arith.addf %265, %268 : vector<2x32xf32>
    %270 = vector.extract_strided_slice %250 {offsets = [0, 160], sizes = [2, 32], strides = [1, 1]} : vector<2x192xf32> to vector<2x32xf32>
    %271 = math.tanh %269 : vector<2x32xf32>
    %272 = arith.mulf %270, %271 : vector<2x32xf32>
    %c12 = arith.constant 12 : index
    %c0_43 = arith.constant 0 : index
    %273 = vector.load %arg13[%c12, %c0_43] : memref<32x32xf32, #tpu.memory_space<vmem>>, vector<2x32xf32>
    tpu.vector_store %arg13[%c12, %c0_43], %272 {strides = array<i32>} : memref<32x32xf32, #tpu.memory_space<vmem>>, vector<2x32xf32>,
    %274 = tpu.concatenate %261, %263, %272 in 1 : vector<2x32xf32>, vector<2x32xf32>, vector<2x32xf32> -> vector<2x96xf32>
    %275 = vector.extract_strided_slice %13 {offsets = [16, 0], sizes = [2, 256], strides = [1, 1]} : vector<34x256xf32> to vector<2x256xf32>
    %cst_44 = arith.constant dense<0.000000e+00> : vector<2x256xf32>
    %276 = tpu.matmul %274, %14, %cst_44 {dimension_numbers = #tpu.dot_dimension_numbers<[1], [0], [0], [1], [0, 0, 1, 1], [], []>} : vector<2x96xf32>, vector<96x256xf32>, vector<2x256xf32> -> vector<2x256xf32>
    %277 = arith.addf %275, %276 : vector<2x256xf32>
    %278 = vector.extract_strided_slice %277 {offsets = [0, 0], sizes = [2, 192], strides = [1, 1]} : vector<2x256xf32> to vector<2x192xf32>
    %279 = arith.negf %278 : vector<2x192xf32>
    %280 = math.exp %279 : vector<2x192xf32>
    %cst_45 = arith.constant 1.000000e+00 : f32
    %281 = vector.broadcast %cst_45 : f32 to vector<2x192xf32>
    %282 = arith.addf %281, %280 : vector<2x192xf32>
    %283 = arith.divf %281, %282 : vector<2x192xf32>
    %284 = vector.extract_strided_slice %277 {offsets = [0, 192], sizes = [2, 64], strides = [1, 1]} : vector<2x256xf32> to vector<2x64xf32>
    %285 = math.tanh %284 : vector<2x64xf32>
    %286 = vector.extract_strided_slice %283 {offsets = [0, 32], sizes = [2, 32], strides = [1, 1]} : vector<2x192xf32> to vector<2x32xf32>
    %287 = arith.mulf %286, %258 : vector<2x32xf32>
    %288 = vector.extract_strided_slice %283 {offsets = [0, 0], sizes = [2, 32], strides = [1, 1]} : vector<2x192xf32> to vector<2x32xf32>
    %289 = vector.extract_strided_slice %285 {offsets = [0, 0], sizes = [2, 32], strides = [1, 1]} : vector<2x64xf32> to vector<2x32xf32>
    %290 = arith.mulf %288, %289 : vector<2x32xf32>
    %291 = arith.addf %287, %290 : vector<2x32xf32>
    %292 = vector.extract_strided_slice %283 {offsets = [0, 64], sizes = [2, 32], strides = [1, 1]} : vector<2x192xf32> to vector<2x32xf32>
    %293 = math.tanh %291 : vector<2x32xf32>
    %294 = arith.mulf %292, %293 : vector<2x32xf32>
    %cst_46 = arith.constant 0.000000e+00 : f32
    %295 = vector.broadcast %cst_46 : f32 to vector<2x32xf32>
    %296 = arith.maximumf %294, %295 : vector<2x32xf32>
    %297 = vector.extract_strided_slice %283 {offsets = [0, 128], sizes = [2, 32], strides = [1, 1]} : vector<2x192xf32> to vector<2x32xf32>
    %298 = arith.mulf %297, %269 : vector<2x32xf32>
    %299 = vector.extract_strided_slice %283 {offsets = [0, 96], sizes = [2, 32], strides = [1, 1]} : vector<2x192xf32> to vector<2x32xf32>
    %300 = vector.extract_strided_slice %285 {offsets = [0, 32], sizes = [2, 32], strides = [1, 1]} : vector<2x64xf32> to vector<2x32xf32>
    %301 = arith.mulf %299, %300 : vector<2x32xf32>
    %302 = arith.addf %298, %301 : vector<2x32xf32>
    %303 = vector.extract_strided_slice %283 {offsets = [0, 160], sizes = [2, 32], strides = [1, 1]} : vector<2x192xf32> to vector<2x32xf32>
    %304 = math.tanh %302 : vector<2x32xf32>
    %305 = arith.mulf %303, %304 : vector<2x32xf32>
    %c14 = arith.constant 14 : index
    %c0_47 = arith.constant 0 : index
    %306 = vector.load %arg13[%c14, %c0_47] : memref<32x32xf32, #tpu.memory_space<vmem>>, vector<2x32xf32>
    tpu.vector_store %arg13[%c14, %c0_47], %305 {strides = array<i32>} : memref<32x32xf32, #tpu.memory_space<vmem>>, vector<2x32xf32>,
    %307 = tpu.concatenate %294, %296, %305 in 1 : vector<2x32xf32>, vector<2x32xf32>, vector<2x32xf32> -> vector<2x96xf32>
    %308 = vector.extract_strided_slice %13 {offsets = [18, 0], sizes = [2, 256], strides = [1, 1]} : vector<34x256xf32> to vector<2x256xf32>
    %cst_48 = arith.constant dense<0.000000e+00> : vector<2x256xf32>
    %309 = tpu.matmul %307, %14, %cst_48 {dimension_numbers = #tpu.dot_dimension_numbers<[1], [0], [0], [1], [0, 0, 1, 1], [], []>} : vector<2x96xf32>, vector<96x256xf32>, vector<2x256xf32> -> vector<2x256xf32>
    %310 = arith.addf %308, %309 : vector<2x256xf32>
    %311 = vector.extract_strided_slice %310 {offsets = [0, 0], sizes = [2, 192], strides = [1, 1]} : vector<2x256xf32> to vector<2x192xf32>
    %312 = arith.negf %311 : vector<2x192xf32>
    %313 = math.exp %312 : vector<2x192xf32>
    %cst_49 = arith.constant 1.000000e+00 : f32
    %314 = vector.broadcast %cst_49 : f32 to vector<2x192xf32>
    %315 = arith.addf %314, %313 : vector<2x192xf32>
    %316 = arith.divf %314, %315 : vector<2x192xf32>
    %317 = vector.extract_strided_slice %310 {offsets = [0, 192], sizes = [2, 64], strides = [1, 1]} : vector<2x256xf32> to vector<2x64xf32>
    %318 = math.tanh %317 : vector<2x64xf32>
    %319 = vector.extract_strided_slice %316 {offsets = [0, 32], sizes = [2, 32], strides = [1, 1]} : vector<2x192xf32> to vector<2x32xf32>
    %320 = arith.mulf %319, %291 : vector<2x32xf32>
    %321 = vector.extract_strided_slice %316 {offsets = [0, 0], sizes = [2, 32], strides = [1, 1]} : vector<2x192xf32> to vector<2x32xf32>
    %322 = vector.extract_strided_slice %318 {offsets = [0, 0], sizes = [2, 32], strides = [1, 1]} : vector<2x64xf32> to vector<2x32xf32>
    %323 = arith.mulf %321, %322 : vector<2x32xf32>
    %324 = arith.addf %320, %323 : vector<2x32xf32>
    %325 = vector.extract_strided_slice %316 {offsets = [0, 64], sizes = [2, 32], strides = [1, 1]} : vector<2x192xf32> to vector<2x32xf32>
    %326 = math.tanh %324 : vector<2x32xf32>
    %327 = arith.mulf %325, %326 : vector<2x32xf32>
    %cst_50 = arith.constant 0.000000e+00 : f32
    %328 = vector.broadcast %cst_50 : f32 to vector<2x32xf32>
    %329 = arith.maximumf %327, %328 : vector<2x32xf32>
    %330 = vector.extract_strided_slice %316 {offsets = [0, 128], sizes = [2, 32], strides = [1, 1]} : vector<2x192xf32> to vector<2x32xf32>
    %331 = arith.mulf %330, %302 : vector<2x32xf32>
    %332 = vector.extract_strided_slice %316 {offsets = [0, 96], sizes = [2, 32], strides = [1, 1]} : vector<2x192xf32> to vector<2x32xf32>
    %333 = vector.extract_strided_slice %318 {offsets = [0, 32], sizes = [2, 32], strides = [1, 1]} : vector<2x64xf32> to vector<2x32xf32>
    %334 = arith.mulf %332, %333 : vector<2x32xf32>
    %335 = arith.addf %331, %334 : vector<2x32xf32>
    %336 = vector.extract_strided_slice %316 {offsets = [0, 160], sizes = [2, 32], strides = [1, 1]} : vector<2x192xf32> to vector<2x32xf32>
    %337 = math.tanh %335 : vector<2x32xf32>
    %338 = arith.mulf %336, %337 : vector<2x32xf32>
    %c16 = arith.constant 16 : index
    %c0_51 = arith.constant 0 : index
    %339 = vector.load %arg13[%c16, %c0_51] : memref<32x32xf32, #tpu.memory_space<vmem>>, vector<2x32xf32>
    tpu.vector_store %arg13[%c16, %c0_51], %338 {strides = array<i32>} : memref<32x32xf32, #tpu.memory_space<vmem>>, vector<2x32xf32>,
    %340 = tpu.concatenate %327, %329, %338 in 1 : vector<2x32xf32>, vector<2x32xf32>, vector<2x32xf32> -> vector<2x96xf32>
    %341 = vector.extract_strided_slice %13 {offsets = [20, 0], sizes = [2, 256], strides = [1, 1]} : vector<34x256xf32> to vector<2x256xf32>
    %cst_52 = arith.constant dense<0.000000e+00> : vector<2x256xf32>
    %342 = tpu.matmul %340, %14, %cst_52 {dimension_numbers = #tpu.dot_dimension_numbers<[1], [0], [0], [1], [0, 0, 1, 1], [], []>} : vector<2x96xf32>, vector<96x256xf32>, vector<2x256xf32> -> vector<2x256xf32>
    %343 = arith.addf %341, %342 : vector<2x256xf32>
    %344 = vector.extract_strided_slice %343 {offsets = [0, 0], sizes = [2, 192], strides = [1, 1]} : vector<2x256xf32> to vector<2x192xf32>
    %345 = arith.negf %344 : vector<2x192xf32>
    %346 = math.exp %345 : vector<2x192xf32>
    %cst_53 = arith.constant 1.000000e+00 : f32
    %347 = vector.broadcast %cst_53 : f32 to vector<2x192xf32>
    %348 = arith.addf %347, %346 : vector<2x192xf32>
    %349 = arith.divf %347, %348 : vector<2x192xf32>
    %350 = vector.extract_strided_slice %343 {offsets = [0, 192], sizes = [2, 64], strides = [1, 1]} : vector<2x256xf32> to vector<2x64xf32>
    %351 = math.tanh %350 : vector<2x64xf32>
    %352 = vector.extract_strided_slice %349 {offsets = [0, 32], sizes = [2, 32], strides = [1, 1]} : vector<2x192xf32> to vector<2x32xf32>
    %353 = arith.mulf %352, %324 : vector<2x32xf32>
    %354 = vector.extract_strided_slice %349 {offsets = [0, 0], sizes = [2, 32], strides = [1, 1]} : vector<2x192xf32> to vector<2x32xf32>
    %355 = vector.extract_strided_slice %351 {offsets = [0, 0], sizes = [2, 32], strides = [1, 1]} : vector<2x64xf32> to vector<2x32xf32>
    %356 = arith.mulf %354, %355 : vector<2x32xf32>
    %357 = arith.addf %353, %356 : vector<2x32xf32>
    %358 = vector.extract_strided_slice %349 {offsets = [0, 64], sizes = [2, 32], strides = [1, 1]} : vector<2x192xf32> to vector<2x32xf32>
    %359 = math.tanh %357 : vector<2x32xf32>
    %360 = arith.mulf %358, %359 : vector<2x32xf32>
    %cst_54 = arith.constant 0.000000e+00 : f32
    %361 = vector.broadcast %cst_54 : f32 to vector<2x32xf32>
    %362 = arith.maximumf %360, %361 : vector<2x32xf32>
    %363 = vector.extract_strided_slice %349 {offsets = [0, 128], sizes = [2, 32], strides = [1, 1]} : vector<2x192xf32> to vector<2x32xf32>
    %364 = arith.mulf %363, %335 : vector<2x32xf32>
    %365 = vector.extract_strided_slice %349 {offsets = [0, 96], sizes = [2, 32], strides = [1, 1]} : vector<2x192xf32> to vector<2x32xf32>
    %366 = vector.extract_strided_slice %351 {offsets = [0, 32], sizes = [2, 32], strides = [1, 1]} : vector<2x64xf32> to vector<2x32xf32>
    %367 = arith.mulf %365, %366 : vector<2x32xf32>
    %368 = arith.addf %364, %367 : vector<2x32xf32>
    %369 = vector.extract_strided_slice %349 {offsets = [0, 160], sizes = [2, 32], strides = [1, 1]} : vector<2x192xf32> to vector<2x32xf32>
    %370 = math.tanh %368 : vector<2x32xf32>
    %371 = arith.mulf %369, %370 : vector<2x32xf32>
    %c18 = arith.constant 18 : index
    %c0_55 = arith.constant 0 : index
    %372 = vector.load %arg13[%c18, %c0_55] : memref<32x32xf32, #tpu.memory_space<vmem>>, vector<2x32xf32>
    tpu.vector_store %arg13[%c18, %c0_55], %371 {strides = array<i32>} : memref<32x32xf32, #tpu.memory_space<vmem>>, vector<2x32xf32>,
    %373 = tpu.concatenate %360, %362, %371 in 1 : vector<2x32xf32>, vector<2x32xf32>, vector<2x32xf32> -> vector<2x96xf32>
    %374 = vector.extract_strided_slice %13 {offsets = [22, 0], sizes = [2, 256], strides = [1, 1]} : vector<34x256xf32> to vector<2x256xf32>
    %cst_56 = arith.constant dense<0.000000e+00> : vector<2x256xf32>
    %375 = tpu.matmul %373, %14, %cst_56 {dimension_numbers = #tpu.dot_dimension_numbers<[1], [0], [0], [1], [0, 0, 1, 1], [], []>} : vector<2x96xf32>, vector<96x256xf32>, vector<2x256xf32> -> vector<2x256xf32>
    %376 = arith.addf %374, %375 : vector<2x256xf32>
    %377 = vector.extract_strided_slice %376 {offsets = [0, 0], sizes = [2, 192], strides = [1, 1]} : vector<2x256xf32> to vector<2x192xf32>
    %378 = arith.negf %377 : vector<2x192xf32>
    %379 = math.exp %378 : vector<2x192xf32>
    %cst_57 = arith.constant 1.000000e+00 : f32
    %380 = vector.broadcast %cst_57 : f32 to vector<2x192xf32>
    %381 = arith.addf %380, %379 : vector<2x192xf32>
    %382 = arith.divf %380, %381 : vector<2x192xf32>
    %383 = vector.extract_strided_slice %376 {offsets = [0, 192], sizes = [2, 64], strides = [1, 1]} : vector<2x256xf32> to vector<2x64xf32>
    %384 = math.tanh %383 : vector<2x64xf32>
    %385 = vector.extract_strided_slice %382 {offsets = [0, 32], sizes = [2, 32], strides = [1, 1]} : vector<2x192xf32> to vector<2x32xf32>
    %386 = arith.mulf %385, %357 : vector<2x32xf32>
    %387 = vector.extract_strided_slice %382 {offsets = [0, 0], sizes = [2, 32], strides = [1, 1]} : vector<2x192xf32> to vector<2x32xf32>
    %388 = vector.extract_strided_slice %384 {offsets = [0, 0], sizes = [2, 32], strides = [1, 1]} : vector<2x64xf32> to vector<2x32xf32>
    %389 = arith.mulf %387, %388 : vector<2x32xf32>
    %390 = arith.addf %386, %389 : vector<2x32xf32>
    %391 = vector.extract_strided_slice %382 {offsets = [0, 64], sizes = [2, 32], strides = [1, 1]} : vector<2x192xf32> to vector<2x32xf32>
    %392 = math.tanh %390 : vector<2x32xf32>
    %393 = arith.mulf %391, %392 : vector<2x32xf32>
    %cst_58 = arith.constant 0.000000e+00 : f32
    %394 = vector.broadcast %cst_58 : f32 to vector<2x32xf32>
    %395 = arith.maximumf %393, %394 : vector<2x32xf32>
    %396 = vector.extract_strided_slice %382 {offsets = [0, 128], sizes = [2, 32], strides = [1, 1]} : vector<2x192xf32> to vector<2x32xf32>
    %397 = arith.mulf %396, %368 : vector<2x32xf32>
    %398 = vector.extract_strided_slice %382 {offsets = [0, 96], sizes = [2, 32], strides = [1, 1]} : vector<2x192xf32> to vector<2x32xf32>
    %399 = vector.extract_strided_slice %384 {offsets = [0, 32], sizes = [2, 32], strides = [1, 1]} : vector<2x64xf32> to vector<2x32xf32>
    %400 = arith.mulf %398, %399 : vector<2x32xf32>
    %401 = arith.addf %397, %400 : vector<2x32xf32>
    %402 = vector.extract_strided_slice %382 {offsets = [0, 160], sizes = [2, 32], strides = [1, 1]} : vector<2x192xf32> to vector<2x32xf32>
    %403 = math.tanh %401 : vector<2x32xf32>
    %404 = arith.mulf %402, %403 : vector<2x32xf32>
    %c20 = arith.constant 20 : index
    %c0_59 = arith.constant 0 : index
    %405 = vector.load %arg13[%c20, %c0_59] : memref<32x32xf32, #tpu.memory_space<vmem>>, vector<2x32xf32>
    tpu.vector_store %arg13[%c20, %c0_59], %404 {strides = array<i32>} : memref<32x32xf32, #tpu.memory_space<vmem>>, vector<2x32xf32>,
    %406 = tpu.concatenate %393, %395, %404 in 1 : vector<2x32xf32>, vector<2x32xf32>, vector<2x32xf32> -> vector<2x96xf32>
    %407 = vector.extract_strided_slice %13 {offsets = [24, 0], sizes = [2, 256], strides = [1, 1]} : vector<34x256xf32> to vector<2x256xf32>
    %cst_60 = arith.constant dense<0.000000e+00> : vector<2x256xf32>
    %408 = tpu.matmul %406, %14, %cst_60 {dimension_numbers = #tpu.dot_dimension_numbers<[1], [0], [0], [1], [0, 0, 1, 1], [], []>} : vector<2x96xf32>, vector<96x256xf32>, vector<2x256xf32> -> vector<2x256xf32>
    %409 = arith.addf %407, %408 : vector<2x256xf32>
    %410 = vector.extract_strided_slice %409 {offsets = [0, 0], sizes = [2, 192], strides = [1, 1]} : vector<2x256xf32> to vector<2x192xf32>
    %411 = arith.negf %410 : vector<2x192xf32>
    %412 = math.exp %411 : vector<2x192xf32>
    %cst_61 = arith.constant 1.000000e+00 : f32
    %413 = vector.broadcast %cst_61 : f32 to vector<2x192xf32>
    %414 = arith.addf %413, %412 : vector<2x192xf32>
    %415 = arith.divf %413, %414 : vector<2x192xf32>
    %416 = vector.extract_strided_slice %409 {offsets = [0, 192], sizes = [2, 64], strides = [1, 1]} : vector<2x256xf32> to vector<2x64xf32>
    %417 = math.tanh %416 : vector<2x64xf32>
    %418 = vector.extract_strided_slice %415 {offsets = [0, 32], sizes = [2, 32], strides = [1, 1]} : vector<2x192xf32> to vector<2x32xf32>
    %419 = arith.mulf %418, %390 : vector<2x32xf32>
    %420 = vector.extract_strided_slice %415 {offsets = [0, 0], sizes = [2, 32], strides = [1, 1]} : vector<2x192xf32> to vector<2x32xf32>
    %421 = vector.extract_strided_slice %417 {offsets = [0, 0], sizes = [2, 32], strides = [1, 1]} : vector<2x64xf32> to vector<2x32xf32>
    %422 = arith.mulf %420, %421 : vector<2x32xf32>
    %423 = arith.addf %419, %422 : vector<2x32xf32>
    %424 = vector.extract_strided_slice %415 {offsets = [0, 64], sizes = [2, 32], strides = [1, 1]} : vector<2x192xf32> to vector<2x32xf32>
    %425 = math.tanh %423 : vector<2x32xf32>
    %426 = arith.mulf %424, %425 : vector<2x32xf32>
    %cst_62 = arith.constant 0.000000e+00 : f32
    %427 = vector.broadcast %cst_62 : f32 to vector<2x32xf32>
    %428 = arith.maximumf %426, %427 : vector<2x32xf32>
    %429 = vector.extract_strided_slice %415 {offsets = [0, 128], sizes = [2, 32], strides = [1, 1]} : vector<2x192xf32> to vector<2x32xf32>
    %430 = arith.mulf %429, %401 : vector<2x32xf32>
    %431 = vector.extract_strided_slice %415 {offsets = [0, 96], sizes = [2, 32], strides = [1, 1]} : vector<2x192xf32> to vector<2x32xf32>
    %432 = vector.extract_strided_slice %417 {offsets = [0, 32], sizes = [2, 32], strides = [1, 1]} : vector<2x64xf32> to vector<2x32xf32>
    %433 = arith.mulf %431, %432 : vector<2x32xf32>
    %434 = arith.addf %430, %433 : vector<2x32xf32>
    %435 = vector.extract_strided_slice %415 {offsets = [0, 160], sizes = [2, 32], strides = [1, 1]} : vector<2x192xf32> to vector<2x32xf32>
    %436 = math.tanh %434 : vector<2x32xf32>
    %437 = arith.mulf %435, %436 : vector<2x32xf32>
    %c22 = arith.constant 22 : index
    %c0_63 = arith.constant 0 : index
    %438 = vector.load %arg13[%c22, %c0_63] : memref<32x32xf32, #tpu.memory_space<vmem>>, vector<2x32xf32>
    tpu.vector_store %arg13[%c22, %c0_63], %437 {strides = array<i32>} : memref<32x32xf32, #tpu.memory_space<vmem>>, vector<2x32xf32>,
    %439 = tpu.concatenate %426, %428, %437 in 1 : vector<2x32xf32>, vector<2x32xf32>, vector<2x32xf32> -> vector<2x96xf32>
    %440 = vector.extract_strided_slice %13 {offsets = [26, 0], sizes = [2, 256], strides = [1, 1]} : vector<34x256xf32> to vector<2x256xf32>
    %cst_64 = arith.constant dense<0.000000e+00> : vector<2x256xf32>
    %441 = tpu.matmul %439, %14, %cst_64 {dimension_numbers = #tpu.dot_dimension_numbers<[1], [0], [0], [1], [0, 0, 1, 1], [], []>} : vector<2x96xf32>, vector<96x256xf32>, vector<2x256xf32> -> vector<2x256xf32>
    %442 = arith.addf %440, %441 : vector<2x256xf32>
    %443 = vector.extract_strided_slice %442 {offsets = [0, 0], sizes = [2, 192], strides = [1, 1]} : vector<2x256xf32> to vector<2x192xf32>
    %444 = arith.negf %443 : vector<2x192xf32>
    %445 = math.exp %444 : vector<2x192xf32>
    %cst_65 = arith.constant 1.000000e+00 : f32
    %446 = vector.broadcast %cst_65 : f32 to vector<2x192xf32>
    %447 = arith.addf %446, %445 : vector<2x192xf32>
    %448 = arith.divf %446, %447 : vector<2x192xf32>
    %449 = vector.extract_strided_slice %442 {offsets = [0, 192], sizes = [2, 64], strides = [1, 1]} : vector<2x256xf32> to vector<2x64xf32>
    %450 = math.tanh %449 : vector<2x64xf32>
    %451 = vector.extract_strided_slice %448 {offsets = [0, 32], sizes = [2, 32], strides = [1, 1]} : vector<2x192xf32> to vector<2x32xf32>
    %452 = arith.mulf %451, %423 : vector<2x32xf32>
    %453 = vector.extract_strided_slice %448 {offsets = [0, 0], sizes = [2, 32], strides = [1, 1]} : vector<2x192xf32> to vector<2x32xf32>
    %454 = vector.extract_strided_slice %450 {offsets = [0, 0], sizes = [2, 32], strides = [1, 1]} : vector<2x64xf32> to vector<2x32xf32>
    %455 = arith.mulf %453, %454 : vector<2x32xf32>
    %456 = arith.addf %452, %455 : vector<2x32xf32>
    %457 = vector.extract_strided_slice %448 {offsets = [0, 64], sizes = [2, 32], strides = [1, 1]} : vector<2x192xf32> to vector<2x32xf32>
    %458 = math.tanh %456 : vector<2x32xf32>
    %459 = arith.mulf %457, %458 : vector<2x32xf32>
    %cst_66 = arith.constant 0.000000e+00 : f32
    %460 = vector.broadcast %cst_66 : f32 to vector<2x32xf32>
    %461 = arith.maximumf %459, %460 : vector<2x32xf32>
    %462 = vector.extract_strided_slice %448 {offsets = [0, 128], sizes = [2, 32], strides = [1, 1]} : vector<2x192xf32> to vector<2x32xf32>
    %463 = arith.mulf %462, %434 : vector<2x32xf32>
    %464 = vector.extract_strided_slice %448 {offsets = [0, 96], sizes = [2, 32], strides = [1, 1]} : vector<2x192xf32> to vector<2x32xf32>
    %465 = vector.extract_strided_slice %450 {offsets = [0, 32], sizes = [2, 32], strides = [1, 1]} : vector<2x64xf32> to vector<2x32xf32>
    %466 = arith.mulf %464, %465 : vector<2x32xf32>
    %467 = arith.addf %463, %466 : vector<2x32xf32>
    %468 = vector.extract_strided_slice %448 {offsets = [0, 160], sizes = [2, 32], strides = [1, 1]} : vector<2x192xf32> to vector<2x32xf32>
    %469 = math.tanh %467 : vector<2x32xf32>
    %470 = arith.mulf %468, %469 : vector<2x32xf32>
    %c24 = arith.constant 24 : index
    %c0_67 = arith.constant 0 : index
    %471 = vector.load %arg13[%c24, %c0_67] : memref<32x32xf32, #tpu.memory_space<vmem>>, vector<2x32xf32>
    tpu.vector_store %arg13[%c24, %c0_67], %470 {strides = array<i32>} : memref<32x32xf32, #tpu.memory_space<vmem>>, vector<2x32xf32>,
    %472 = tpu.concatenate %459, %461, %470 in 1 : vector<2x32xf32>, vector<2x32xf32>, vector<2x32xf32> -> vector<2x96xf32>
    %473 = vector.extract_strided_slice %13 {offsets = [28, 0], sizes = [2, 256], strides = [1, 1]} : vector<34x256xf32> to vector<2x256xf32>
    %cst_68 = arith.constant dense<0.000000e+00> : vector<2x256xf32>
    %474 = tpu.matmul %472, %14, %cst_68 {dimension_numbers = #tpu.dot_dimension_numbers<[1], [0], [0], [1], [0, 0, 1, 1], [], []>} : vector<2x96xf32>, vector<96x256xf32>, vector<2x256xf32> -> vector<2x256xf32>
    %475 = arith.addf %473, %474 : vector<2x256xf32>
    %476 = vector.extract_strided_slice %475 {offsets = [0, 0], sizes = [2, 192], strides = [1, 1]} : vector<2x256xf32> to vector<2x192xf32>
    %477 = arith.negf %476 : vector<2x192xf32>
    %478 = math.exp %477 : vector<2x192xf32>
    %cst_69 = arith.constant 1.000000e+00 : f32
    %479 = vector.broadcast %cst_69 : f32 to vector<2x192xf32>
    %480 = arith.addf %479, %478 : vector<2x192xf32>
    %481 = arith.divf %479, %480 : vector<2x192xf32>
    %482 = vector.extract_strided_slice %475 {offsets = [0, 192], sizes = [2, 64], strides = [1, 1]} : vector<2x256xf32> to vector<2x64xf32>
    %483 = math.tanh %482 : vector<2x64xf32>
    %484 = vector.extract_strided_slice %481 {offsets = [0, 32], sizes = [2, 32], strides = [1, 1]} : vector<2x192xf32> to vector<2x32xf32>
    %485 = arith.mulf %484, %456 : vector<2x32xf32>
    %486 = vector.extract_strided_slice %481 {offsets = [0, 0], sizes = [2, 32], strides = [1, 1]} : vector<2x192xf32> to vector<2x32xf32>
    %487 = vector.extract_strided_slice %483 {offsets = [0, 0], sizes = [2, 32], strides = [1, 1]} : vector<2x64xf32> to vector<2x32xf32>
    %488 = arith.mulf %486, %487 : vector<2x32xf32>
    %489 = arith.addf %485, %488 : vector<2x32xf32>
    %490 = vector.extract_strided_slice %481 {offsets = [0, 64], sizes = [2, 32], strides = [1, 1]} : vector<2x192xf32> to vector<2x32xf32>
    %491 = math.tanh %489 : vector<2x32xf32>
    %492 = arith.mulf %490, %491 : vector<2x32xf32>
    %cst_70 = arith.constant 0.000000e+00 : f32
    %493 = vector.broadcast %cst_70 : f32 to vector<2x32xf32>
    %494 = arith.maximumf %492, %493 : vector<2x32xf32>
    %495 = vector.extract_strided_slice %481 {offsets = [0, 128], sizes = [2, 32], strides = [1, 1]} : vector<2x192xf32> to vector<2x32xf32>
    %496 = arith.mulf %495, %467 : vector<2x32xf32>
    %497 = vector.extract_strided_slice %481 {offsets = [0, 96], sizes = [2, 32], strides = [1, 1]} : vector<2x192xf32> to vector<2x32xf32>
    %498 = vector.extract_strided_slice %483 {offsets = [0, 32], sizes = [2, 32], strides = [1, 1]} : vector<2x64xf32> to vector<2x32xf32>
    %499 = arith.mulf %497, %498 : vector<2x32xf32>
    %500 = arith.addf %496, %499 : vector<2x32xf32>
    %501 = vector.extract_strided_slice %481 {offsets = [0, 160], sizes = [2, 32], strides = [1, 1]} : vector<2x192xf32> to vector<2x32xf32>
    %502 = math.tanh %500 : vector<2x32xf32>
    %503 = arith.mulf %501, %502 : vector<2x32xf32>
    %c26 = arith.constant 26 : index
    %c0_71 = arith.constant 0 : index
    %504 = vector.load %arg13[%c26, %c0_71] : memref<32x32xf32, #tpu.memory_space<vmem>>, vector<2x32xf32>
    tpu.vector_store %arg13[%c26, %c0_71], %503 {strides = array<i32>} : memref<32x32xf32, #tpu.memory_space<vmem>>, vector<2x32xf32>,
    %505 = tpu.concatenate %492, %494, %503 in 1 : vector<2x32xf32>, vector<2x32xf32>, vector<2x32xf32> -> vector<2x96xf32>
    %506 = vector.extract_strided_slice %13 {offsets = [30, 0], sizes = [2, 256], strides = [1, 1]} : vector<34x256xf32> to vector<2x256xf32>
    %cst_72 = arith.constant dense<0.000000e+00> : vector<2x256xf32>
    %507 = tpu.matmul %505, %14, %cst_72 {dimension_numbers = #tpu.dot_dimension_numbers<[1], [0], [0], [1], [0, 0, 1, 1], [], []>} : vector<2x96xf32>, vector<96x256xf32>, vector<2x256xf32> -> vector<2x256xf32>
    %508 = arith.addf %506, %507 : vector<2x256xf32>
    %509 = vector.extract_strided_slice %508 {offsets = [0, 0], sizes = [2, 192], strides = [1, 1]} : vector<2x256xf32> to vector<2x192xf32>
    %510 = arith.negf %509 : vector<2x192xf32>
    %511 = math.exp %510 : vector<2x192xf32>
    %cst_73 = arith.constant 1.000000e+00 : f32
    %512 = vector.broadcast %cst_73 : f32 to vector<2x192xf32>
    %513 = arith.addf %512, %511 : vector<2x192xf32>
    %514 = arith.divf %512, %513 : vector<2x192xf32>
    %515 = vector.extract_strided_slice %508 {offsets = [0, 192], sizes = [2, 64], strides = [1, 1]} : vector<2x256xf32> to vector<2x64xf32>
    %516 = math.tanh %515 : vector<2x64xf32>
    %517 = vector.extract_strided_slice %514 {offsets = [0, 32], sizes = [2, 32], strides = [1, 1]} : vector<2x192xf32> to vector<2x32xf32>
    %518 = arith.mulf %517, %489 : vector<2x32xf32>
    %519 = vector.extract_strided_slice %514 {offsets = [0, 0], sizes = [2, 32], strides = [1, 1]} : vector<2x192xf32> to vector<2x32xf32>
    %520 = vector.extract_strided_slice %516 {offsets = [0, 0], sizes = [2, 32], strides = [1, 1]} : vector<2x64xf32> to vector<2x32xf32>
    %521 = arith.mulf %519, %520 : vector<2x32xf32>
    %522 = arith.addf %518, %521 : vector<2x32xf32>
    %523 = vector.extract_strided_slice %514 {offsets = [0, 64], sizes = [2, 32], strides = [1, 1]} : vector<2x192xf32> to vector<2x32xf32>
    %524 = math.tanh %522 : vector<2x32xf32>
    %525 = arith.mulf %523, %524 : vector<2x32xf32>
    %cst_74 = arith.constant 0.000000e+00 : f32
    %526 = vector.broadcast %cst_74 : f32 to vector<2x32xf32>
    %527 = arith.maximumf %525, %526 : vector<2x32xf32>
    %528 = vector.extract_strided_slice %514 {offsets = [0, 128], sizes = [2, 32], strides = [1, 1]} : vector<2x192xf32> to vector<2x32xf32>
    %529 = arith.mulf %528, %500 : vector<2x32xf32>
    %530 = vector.extract_strided_slice %514 {offsets = [0, 96], sizes = [2, 32], strides = [1, 1]} : vector<2x192xf32> to vector<2x32xf32>
    %531 = vector.extract_strided_slice %516 {offsets = [0, 32], sizes = [2, 32], strides = [1, 1]} : vector<2x64xf32> to vector<2x32xf32>
    %532 = arith.mulf %530, %531 : vector<2x32xf32>
    %533 = arith.addf %529, %532 : vector<2x32xf32>
    %534 = vector.extract_strided_slice %514 {offsets = [0, 160], sizes = [2, 32], strides = [1, 1]} : vector<2x192xf32> to vector<2x32xf32>
    %535 = math.tanh %533 : vector<2x32xf32>
    %536 = arith.mulf %534, %535 : vector<2x32xf32>
    %c28 = arith.constant 28 : index
    %c0_75 = arith.constant 0 : index
    %537 = vector.load %arg13[%c28, %c0_75] : memref<32x32xf32, #tpu.memory_space<vmem>>, vector<2x32xf32>
    tpu.vector_store %arg13[%c28, %c0_75], %536 {strides = array<i32>} : memref<32x32xf32, #tpu.memory_space<vmem>>, vector<2x32xf32>,
    %538 = tpu.concatenate %525, %527, %536 in 1 : vector<2x32xf32>, vector<2x32xf32>, vector<2x32xf32> -> vector<2x96xf32>
    %539 = vector.extract_strided_slice %13 {offsets = [32, 0], sizes = [2, 256], strides = [1, 1]} : vector<34x256xf32> to vector<2x256xf32>
    %cst_76 = arith.constant dense<0.000000e+00> : vector<2x256xf32>
    %540 = tpu.matmul %538, %14, %cst_76 {dimension_numbers = #tpu.dot_dimension_numbers<[1], [0], [0], [1], [0, 0, 1, 1], [], []>} : vector<2x96xf32>, vector<96x256xf32>, vector<2x256xf32> -> vector<2x256xf32>
    %541 = arith.addf %539, %540 : vector<2x256xf32>
    %542 = vector.extract_strided_slice %541 {offsets = [0, 0], sizes = [2, 192], strides = [1, 1]} : vector<2x256xf32> to vector<2x192xf32>
    %543 = arith.negf %542 : vector<2x192xf32>
    %544 = math.exp %543 : vector<2x192xf32>
    %cst_77 = arith.constant 1.000000e+00 : f32
    %545 = vector.broadcast %cst_77 : f32 to vector<2x192xf32>
    %546 = arith.addf %545, %544 : vector<2x192xf32>
    %547 = arith.divf %545, %546 : vector<2x192xf32>
    %548 = vector.extract_strided_slice %541 {offsets = [0, 192], sizes = [2, 64], strides = [1, 1]} : vector<2x256xf32> to vector<2x64xf32>
    %549 = math.tanh %548 : vector<2x64xf32>
    %550 = vector.extract_strided_slice %547 {offsets = [0, 128], sizes = [2, 32], strides = [1, 1]} : vector<2x192xf32> to vector<2x32xf32>
    %551 = arith.mulf %550, %533 : vector<2x32xf32>
    %552 = vector.extract_strided_slice %547 {offsets = [0, 96], sizes = [2, 32], strides = [1, 1]} : vector<2x192xf32> to vector<2x32xf32>
    %553 = vector.extract_strided_slice %549 {offsets = [0, 32], sizes = [2, 32], strides = [1, 1]} : vector<2x64xf32> to vector<2x32xf32>
    %554 = arith.mulf %552, %553 : vector<2x32xf32>
    %555 = arith.addf %551, %554 : vector<2x32xf32>
    %556 = vector.extract_strided_slice %547 {offsets = [0, 160], sizes = [2, 32], strides = [1, 1]} : vector<2x192xf32> to vector<2x32xf32>
    %557 = math.tanh %555 : vector<2x32xf32>
    %558 = arith.mulf %556, %557 : vector<2x32xf32>
    %c30 = arith.constant 30 : index
    %c0_78 = arith.constant 0 : index
    %559 = vector.load %arg13[%c30, %c0_78] : memref<32x32xf32, #tpu.memory_space<vmem>>, vector<2x32xf32>
    tpu.vector_store %arg13[%c30, %c0_78], %558 {strides = array<i32>} : memref<32x32xf32, #tpu.memory_space<vmem>>, vector<2x32xf32>,
    %c0_i32_79 = arith.constant 0 : i32
    %560 = tpu.memref_slice %arg20[%c0_i32_79] : memref<4x!tpu.dma_semaphore, #tpu.memory_space<semaphore_mem>> -> memref<1x!tpu.dma_semaphore, #tpu.memory_space<semaphore_mem>>
    %561 = tpu.memref_squeeze %560 : memref<1x!tpu.dma_semaphore, #tpu.memory_space<semaphore_mem>> -> memref<!tpu.dma_semaphore, #tpu.memory_space<semaphore_mem>>
    tpu.wait_dma2 semaphore(%561 : memref<!tpu.dma_semaphore, #tpu.memory_space<semaphore_mem>>) src(%arg8 : memref<96x64xf32, #tpu.memory_space<any>>) dst(%arg16 : memref<96x64xf32, #tpu.memory_space<vmem>>)
    %c0_80 = arith.constant 0 : index
    %c0_81 = arith.constant 0 : index
    %562 = vector.load %arg13[%c0_80, %c0_81] : memref<32x32xf32, #tpu.memory_space<vmem>>, vector<28x32xf32>
    %c0_82 = arith.constant 0 : index
    %c0_83 = arith.constant 0 : index
    %563 = vector.load %arg16[%c0_82, %c0_83] : memref<96x64xf32, #tpu.memory_space<vmem>>, vector<32x64xf32>
    %cst_84 = arith.constant dense<0.000000e+00> : vector<28x64xf32>
    %564 = tpu.matmul %562, %563, %cst_84 {dimension_numbers = #tpu.dot_dimension_numbers<[1], [0], [0], [1], [0, 0, 1, 1], [], []>} : vector<28x32xf32>, vector<32x64xf32>, vector<28x64xf32> -> vector<28x64xf32>
    %c2_85 = arith.constant 2 : index
    %c0_86 = arith.constant 0 : index
    %565 = vector.load %arg13[%c2_85, %c0_86] : memref<32x32xf32, #tpu.memory_space<vmem>>, vector<28x32xf32>
    %c32 = arith.constant 32 : index
    %c0_87 = arith.constant 0 : index
    %566 = vector.load %arg16[%c32, %c0_87] : memref<96x64xf32, #tpu.memory_space<vmem>>, vector<32x64xf32>
    %cst_88 = arith.constant dense<0.000000e+00> : vector<28x64xf32>
    %567 = tpu.matmul %565, %566, %cst_88 {dimension_numbers = #tpu.dot_dimension_numbers<[1], [0], [0], [1], [0, 0, 1, 1], [], []>} : vector<28x32xf32>, vector<32x64xf32>, vector<28x64xf32> -> vector<28x64xf32>
    %568 = arith.addf %564, %567 : vector<28x64xf32>
    %c4_89 = arith.constant 4 : index
    %c0_90 = arith.constant 0 : index
    %569 = vector.load %arg13[%c4_89, %c0_90] : memref<32x32xf32, #tpu.memory_space<vmem>>, vector<28x32xf32>
    %c64 = arith.constant 64 : index
    %c0_91 = arith.constant 0 : index
    %570 = vector.load %arg16[%c64, %c0_91] : memref<96x64xf32, #tpu.memory_space<vmem>>, vector<32x64xf32>
    %cst_92 = arith.constant dense<0.000000e+00> : vector<28x64xf32>
    %571 = tpu.matmul %569, %570, %cst_92 {dimension_numbers = #tpu.dot_dimension_numbers<[1], [0], [0], [1], [0, 0, 1, 1], [], []>} : vector<28x32xf32>, vector<32x64xf32>, vector<28x64xf32> -> vector<28x64xf32>
    %572 = arith.addf %568, %571 : vector<28x64xf32>
    %c0_93 = arith.constant 0 : index
    %c0_94 = arith.constant 0 : index
    %573 = vector.load %arg4[%c0_93, %c0_94] : memref<1x64xf32, #tpu.memory_space<vmem>>, vector<1x64xf32>
    %574 = vector.broadcast %573 : vector<1x64xf32> to vector<28x64xf32>
    %575 = arith.addf %572, %574 : vector<28x64xf32>
    %576 = vector.extract_strided_slice %575 {offsets = [0, 0], sizes = [2, 64], strides = [1, 1]} : vector<28x64xf32> to vector<2x64xf32>
    %577 = vector.extract_strided_slice %575 {offsets = [2, 0], sizes = [2, 64], strides = [1, 1]} : vector<28x64xf32> to vector<2x64xf32>
    %578 = arith.maximumf %576, %577 : vector<2x64xf32>
    %c0_95 = arith.constant 0 : index
    %c0_96 = arith.constant 0 : index
    %579 = vector.load %arg14[%c0_95, %c0_96] : memref<14x64xf32, #tpu.memory_space<vmem>>, vector<2x64xf32>
    tpu.vector_store %arg14[%c0_95, %c0_96], %578 {strides = array<i32>} : memref<14x64xf32, #tpu.memory_space<vmem>>, vector<2x64xf32>,
    %580 = vector.extract_strided_slice %575 {offsets = [4, 0], sizes = [2, 64], strides = [1, 1]} : vector<28x64xf32> to vector<2x64xf32>
    %581 = vector.extract_strided_slice %575 {offsets = [6, 0], sizes = [2, 64], strides = [1, 1]} : vector<28x64xf32> to vector<2x64xf32>
    %582 = arith.maximumf %580, %581 : vector<2x64xf32>
    %c2_97 = arith.constant 2 : index
    %c0_98 = arith.constant 0 : index
    %583 = vector.load %arg14[%c2_97, %c0_98] : memref<14x64xf32, #tpu.memory_space<vmem>>, vector<2x64xf32>
    tpu.vector_store %arg14[%c2_97, %c0_98], %582 {strides = array<i32>} : memref<14x64xf32, #tpu.memory_space<vmem>>, vector<2x64xf32>,
    %584 = vector.extract_strided_slice %575 {offsets = [8, 0], sizes = [2, 64], strides = [1, 1]} : vector<28x64xf32> to vector<2x64xf32>
    %585 = vector.extract_strided_slice %575 {offsets = [10, 0], sizes = [2, 64], strides = [1, 1]} : vector<28x64xf32> to vector<2x64xf32>
    %586 = arith.maximumf %584, %585 : vector<2x64xf32>
    %c4_99 = arith.constant 4 : index
    %c0_100 = arith.constant 0 : index
    %587 = vector.load %arg14[%c4_99, %c0_100] : memref<14x64xf32, #tpu.memory_space<vmem>>, vector<2x64xf32>
    tpu.vector_store %arg14[%c4_99, %c0_100], %586 {strides = array<i32>} : memref<14x64xf32, #tpu.memory_space<vmem>>, vector<2x64xf32>,
    %588 = vector.extract_strided_slice %575 {offsets = [12, 0], sizes = [2, 64], strides = [1, 1]} : vector<28x64xf32> to vector<2x64xf32>
    %589 = vector.extract_strided_slice %575 {offsets = [14, 0], sizes = [2, 64], strides = [1, 1]} : vector<28x64xf32> to vector<2x64xf32>
    %590 = arith.maximumf %588, %589 : vector<2x64xf32>
    %c6_101 = arith.constant 6 : index
    %c0_102 = arith.constant 0 : index
    %591 = vector.load %arg14[%c6_101, %c0_102] : memref<14x64xf32, #tpu.memory_space<vmem>>, vector<2x64xf32>
    tpu.vector_store %arg14[%c6_101, %c0_102], %590 {strides = array<i32>} : memref<14x64xf32, #tpu.memory_space<vmem>>, vector<2x64xf32>,
    %592 = vector.extract_strided_slice %575 {offsets = [16, 0], sizes = [2, 64], strides = [1, 1]} : vector<28x64xf32> to vector<2x64xf32>
    %593 = vector.extract_strided_slice %575 {offsets = [18, 0], sizes = [2, 64], strides = [1, 1]} : vector<28x64xf32> to vector<2x64xf32>
    %594 = arith.maximumf %592, %593 : vector<2x64xf32>
    %c8_103 = arith.constant 8 : index
    %c0_104 = arith.constant 0 : index
    %595 = vector.load %arg14[%c8_103, %c0_104] : memref<14x64xf32, #tpu.memory_space<vmem>>, vector<2x64xf32>
    tpu.vector_store %arg14[%c8_103, %c0_104], %594 {strides = array<i32>} : memref<14x64xf32, #tpu.memory_space<vmem>>, vector<2x64xf32>,
    %596 = vector.extract_strided_slice %575 {offsets = [20, 0], sizes = [2, 64], strides = [1, 1]} : vector<28x64xf32> to vector<2x64xf32>
    %597 = vector.extract_strided_slice %575 {offsets = [22, 0], sizes = [2, 64], strides = [1, 1]} : vector<28x64xf32> to vector<2x64xf32>
    %598 = arith.maximumf %596, %597 : vector<2x64xf32>
    %c10_105 = arith.constant 10 : index
    %c0_106 = arith.constant 0 : index
    %599 = vector.load %arg14[%c10_105, %c0_106] : memref<14x64xf32, #tpu.memory_space<vmem>>, vector<2x64xf32>
    tpu.vector_store %arg14[%c10_105, %c0_106], %598 {strides = array<i32>} : memref<14x64xf32, #tpu.memory_space<vmem>>, vector<2x64xf32>,
    %600 = vector.extract_strided_slice %575 {offsets = [24, 0], sizes = [2, 64], strides = [1, 1]} : vector<28x64xf32> to vector<2x64xf32>
    %601 = vector.extract_strided_slice %575 {offsets = [26, 0], sizes = [2, 64], strides = [1, 1]} : vector<28x64xf32> to vector<2x64xf32>
    %602 = arith.maximumf %600, %601 : vector<2x64xf32>
    %c12_107 = arith.constant 12 : index
    %c0_108 = arith.constant 0 : index
    %603 = vector.load %arg14[%c12_107, %c0_108] : memref<14x64xf32, #tpu.memory_space<vmem>>, vector<2x64xf32>
    tpu.vector_store %arg14[%c12_107, %c0_108], %602 {strides = array<i32>} : memref<14x64xf32, #tpu.memory_space<vmem>>, vector<2x64xf32>,
    %c1_i32_109 = arith.constant 1 : i32
    %604 = tpu.memref_slice %arg20[%c1_i32_109] : memref<4x!tpu.dma_semaphore, #tpu.memory_space<semaphore_mem>> -> memref<1x!tpu.dma_semaphore, #tpu.memory_space<semaphore_mem>>
    %605 = tpu.memref_squeeze %604 : memref<1x!tpu.dma_semaphore, #tpu.memory_space<semaphore_mem>> -> memref<!tpu.dma_semaphore, #tpu.memory_space<semaphore_mem>>
    tpu.wait_dma2 semaphore(%605 : memref<!tpu.dma_semaphore, #tpu.memory_space<semaphore_mem>>) src(%arg9 : memref<192x32xf32, #tpu.memory_space<any>>) dst(%arg17 : memref<192x32xf32, #tpu.memory_space<vmem>>)
    %c0_110 = arith.constant 0 : index
    %c0_111 = arith.constant 0 : index
    %606 = vector.load %arg14[%c0_110, %c0_111] : memref<14x64xf32, #tpu.memory_space<vmem>>, vector<10x64xf32>
    %c0_112 = arith.constant 0 : index
    %c0_113 = arith.constant 0 : index
    %607 = vector.load %arg17[%c0_112, %c0_113] : memref<192x32xf32, #tpu.memory_space<vmem>>, vector<64x32xf32>
    %cst_114 = arith.constant dense<0.000000e+00> : vector<10x32xf32>
    %608 = tpu.matmul %606, %607, %cst_114 {dimension_numbers = #tpu.dot_dimension_numbers<[1], [0], [0], [1], [0, 0, 1, 1], [], []>} : vector<10x64xf32>, vector<64x32xf32>, vector<10x32xf32> -> vector<10x32xf32>
    %c2_115 = arith.constant 2 : index
    %c0_116 = arith.constant 0 : index
    %609 = vector.load %arg14[%c2_115, %c0_116] : memref<14x64xf32, #tpu.memory_space<vmem>>, vector<10x64xf32>
    %c64_117 = arith.constant 64 : index
    %c0_118 = arith.constant 0 : index
    %610 = vector.load %arg17[%c64_117, %c0_118] : memref<192x32xf32, #tpu.memory_space<vmem>>, vector<64x32xf32>
    %cst_119 = arith.constant dense<0.000000e+00> : vector<10x32xf32>
    %611 = tpu.matmul %609, %610, %cst_119 {dimension_numbers = #tpu.dot_dimension_numbers<[1], [0], [0], [1], [0, 0, 1, 1], [], []>} : vector<10x64xf32>, vector<64x32xf32>, vector<10x32xf32> -> vector<10x32xf32>
    %612 = arith.addf %608, %611 : vector<10x32xf32>
    %c4_120 = arith.constant 4 : index
    %c0_121 = arith.constant 0 : index
    %613 = vector.load %arg14[%c4_120, %c0_121] : memref<14x64xf32, #tpu.memory_space<vmem>>, vector<10x64xf32>
    %c128 = arith.constant 128 : index
    %c0_122 = arith.constant 0 : index
    %614 = vector.load %arg17[%c128, %c0_122] : memref<192x32xf32, #tpu.memory_space<vmem>>, vector<64x32xf32>
    %cst_123 = arith.constant dense<0.000000e+00> : vector<10x32xf32>
    %615 = tpu.matmul %613, %614, %cst_123 {dimension_numbers = #tpu.dot_dimension_numbers<[1], [0], [0], [1], [0, 0, 1, 1], [], []>} : vector<10x64xf32>, vector<64x32xf32>, vector<10x32xf32> -> vector<10x32xf32>
    %616 = arith.addf %612, %615 : vector<10x32xf32>
    %c0_124 = arith.constant 0 : index
    %c0_125 = arith.constant 0 : index
    %617 = vector.load %arg5[%c0_124, %c0_125] : memref<1x32xf32, #tpu.memory_space<vmem>>, vector<1x32xf32>
    %618 = vector.broadcast %617 : vector<1x32xf32> to vector<10x32xf32>
    %619 = arith.addf %616, %618 : vector<10x32xf32>
    %620 = vector.extract_strided_slice %619 {offsets = [0, 0], sizes = [2, 32], strides = [1, 1]} : vector<10x32xf32> to vector<2x32xf32>
    %621 = vector.extract_strided_slice %619 {offsets = [2, 0], sizes = [2, 32], strides = [1, 1]} : vector<10x32xf32> to vector<2x32xf32>
    %622 = arith.maximumf %620, %621 : vector<2x32xf32>
    %c0_126 = arith.constant 0 : index
    %c0_127 = arith.constant 0 : index
    %623 = vector.load %arg15[%c0_126, %c0_127] : memref<4x32xf32, #tpu.memory_space<vmem>>, vector<2x32xf32>
    tpu.vector_store %arg15[%c0_126, %c0_127], %622 {strides = array<i32>} : memref<4x32xf32, #tpu.memory_space<vmem>>, vector<2x32xf32>,
    %624 = vector.extract_strided_slice %619 {offsets = [4, 0], sizes = [2, 32], strides = [1, 1]} : vector<10x32xf32> to vector<2x32xf32>
    %625 = vector.extract_strided_slice %619 {offsets = [6, 0], sizes = [2, 32], strides = [1, 1]} : vector<10x32xf32> to vector<2x32xf32>
    %626 = arith.maximumf %624, %625 : vector<2x32xf32>
    %c2_128 = arith.constant 2 : index
    %c0_129 = arith.constant 0 : index
    %627 = vector.load %arg15[%c2_128, %c0_129] : memref<4x32xf32, #tpu.memory_space<vmem>>, vector<2x32xf32>
    tpu.vector_store %arg15[%c2_128, %c0_129], %626 {strides = array<i32>} : memref<4x32xf32, #tpu.memory_space<vmem>>, vector<2x32xf32>,
    %c2_i32_130 = arith.constant 2 : i32
    %628 = tpu.memref_slice %arg20[%c2_i32_130] : memref<4x!tpu.dma_semaphore, #tpu.memory_space<semaphore_mem>> -> memref<1x!tpu.dma_semaphore, #tpu.memory_space<semaphore_mem>>
    %629 = tpu.memref_squeeze %628 : memref<1x!tpu.dma_semaphore, #tpu.memory_space<semaphore_mem>> -> memref<!tpu.dma_semaphore, #tpu.memory_space<semaphore_mem>>
    tpu.wait_dma2 semaphore(%629 : memref<!tpu.dma_semaphore, #tpu.memory_space<semaphore_mem>>) src(%arg10 : memref<32x1024xf32, #tpu.memory_space<any>>) dst(%arg18 : memref<32x1024xf32, #tpu.memory_space<vmem>>)
    %c0_131 = arith.constant 0 : index
    %c0_132 = arith.constant 0 : index
    %630 = vector.load %arg15[%c0_131, %c0_132] : memref<4x32xf32, #tpu.memory_space<vmem>>, vector<4x32xf32>
    %c0_133 = arith.constant 0 : index
    %c0_134 = arith.constant 0 : index
    %631 = vector.load %arg18[%c0_133, %c0_134] : memref<32x1024xf32, #tpu.memory_space<vmem>>, vector<32x1024xf32>
    %cst_135 = arith.constant dense<0.000000e+00> : vector<4x1024xf32>
    %632 = tpu.matmul %630, %631, %cst_135 {dimension_numbers = #tpu.dot_dimension_numbers<[1], [0], [0], [1], [0, 0, 1, 1], [], []>} : vector<4x32xf32>, vector<32x1024xf32>, vector<4x1024xf32> -> vector<4x1024xf32>
    %c0_136 = arith.constant 0 : index
    %c0_137 = arith.constant 0 : index
    %633 = vector.load %arg6[%c0_136, %c0_137] : memref<1x1024xf32, #tpu.memory_space<vmem>>, vector<1x1024xf32>
    %634 = vector.broadcast %633 : vector<1x1024xf32> to vector<4x1024xf32>
    %635 = arith.addf %632, %634 : vector<4x1024xf32>
    %cst_138 = arith.constant 0.000000e+00 : f32
    %636 = vector.broadcast %cst_138 : f32 to vector<4x1024xf32>
    %637 = arith.maximumf %635, %636 : vector<4x1024xf32>
    %c3_i32_139 = arith.constant 3 : i32
    %638 = tpu.memref_slice %arg20[%c3_i32_139] : memref<4x!tpu.dma_semaphore, #tpu.memory_space<semaphore_mem>> -> memref<1x!tpu.dma_semaphore, #tpu.memory_space<semaphore_mem>>
    %639 = tpu.memref_squeeze %638 : memref<1x!tpu.dma_semaphore, #tpu.memory_space<semaphore_mem>> -> memref<!tpu.dma_semaphore, #tpu.memory_space<semaphore_mem>>
    tpu.wait_dma2 semaphore(%639 : memref<!tpu.dma_semaphore, #tpu.memory_space<semaphore_mem>>) src(%arg11 : memref<1024x16xf32, #tpu.memory_space<any>>) dst(%arg19 : memref<1024x16xf32, #tpu.memory_space<vmem>>)
    %c0_140 = arith.constant 0 : index
    %c0_141 = arith.constant 0 : index
    %640 = vector.load %arg19[%c0_140, %c0_141] : memref<1024x16xf32, #tpu.memory_space<vmem>>, vector<1024x16xf32>
    %cst_142 = arith.constant dense<0.000000e+00> : vector<4x16xf32>
    %641 = tpu.matmul %637, %640, %cst_142 {dimension_numbers = #tpu.dot_dimension_numbers<[1], [0], [0], [1], [0, 0, 1, 1], [], []>} : vector<4x1024xf32>, vector<1024x16xf32>, vector<4x16xf32> -> vector<4x16xf32>
    %cst_143 = arith.constant 0.000000e+00 : f32
    %642 = vector.broadcast %cst_143 : f32 to vector<2x8xf32>
    %c0_144 = arith.constant 0 : index
    %c0_145 = arith.constant 0 : index
    %643 = vector.load %arg7[%c0_144, %c0_145] : memref<1x8xf32, #tpu.memory_space<vmem>>, vector<1x8xf32>
    %644 = vector.broadcast %643 : vector<1x8xf32> to vector<2x8xf32>
    %645 = arith.addf %642, %644 : vector<2x8xf32>
    %646 = vector.extract_strided_slice %641 {offsets = [0, 0], sizes = [2, 8], strides = [1, 1]} : vector<4x16xf32> to vector<2x8xf32>
    %647 = arith.addf %645, %646 : vector<2x8xf32>
    %648 = vector.extract_strided_slice %641 {offsets = [2, 8], sizes = [2, 8], strides = [1, 1]} : vector<4x16xf32> to vector<2x8xf32>
    %649 = arith.addf %647, %648 : vector<2x8xf32>
    %c0_146 = arith.constant 0 : index
    %c0_147 = arith.constant 0 : index
    %650 = vector.load %arg12[%c0_146, %c0_147] : memref<2x8xf32, #tpu.memory_space<vmem>>, vector<2x8xf32>
    tpu.vector_store %arg12[%c0_146, %c0_147], %649 {strides = array<i32>} : memref<2x8xf32, #tpu.memory_space<vmem>>, vector<2x8xf32>,
    return
  }
}

</mosaic_0001>

<bundles_post_ra>
// kernel: forward.1
= control target key start
LH: loop header
LB: loop body
LE: loop exit
PB: predicated region body
PF: predicated region fallthrough
CT: control target
= control target key end

     0   :  { %17 = vsyncpa [#allocation11], 0  ;;  %s8098_s0 = inlined_call_operand.vmem [shape: f32[34,4], index: 0, kind: input, shape index: {}]   ;;  %s8099_s1 = inlined_call_operand.vmem [shape: f32[4,256], index: 1, kind: input, shape index: {}]   ;;  %s8100_s2 = inlined_call_operand.vmem [shape: f32[96,256], index: 2, kind: input, shape index: {}]   ;;  %s8101_s3 = inlined_call_operand.vmem [shape: f32[1,256], index: 3, kind: input, shape index: {}]   ;;  %s8102_s4 = inlined_call_operand.vmem [shape: f32[1,64], index: 4, kind: input, shape index: {}]   ;;  %s8103_s5 = inlined_call_operand.vmem [shape: f32[1,32], index: 5, kind: input, shape index: {}]   ;;  %s8104_s6 = inlined_call_operand.vmem [shape: f32[1,1024], index: 6, kind: input, shape index: {}]   ;;  %s8105_s7 = inlined_call_operand.vmem [shape: f32[1,8], index: 7, kind: input, shape index: {}]   ;;  %s8106_s8 = inlined_call_operand.vmem [shape: f32[96,64], index: 8, kind: input, shape index: {}]   ;;  %s8107_s9 = inlined_call_operand.vmem [shape: f32[192,32], index: 9, kind: input, shape index: {}]   ;;  %s8108_s10 = inlined_call_operand.vmem [shape: f32[32,1024], index: 10, kind: input, shape index: {}]   ;;  %s8109_s11 = inlined_call_operand.vmem [shape: f32[1024,16], index: 11, kind: input, shape index: {}]   ;;  %s8110_s12 = inlined_call_operand.hbm [shape: f32[2,8], index: 12, kind: output, shape index: {}]  }
   0x1   :  { %v5510_v0 = vld [vmem:[%s8106_s8] sm:$0xff]  ;;  %v5515_v1 = vld [vmem:[%s8106_s8 + $0x8] sm:$0xff]  ;;  %v5520_v2 = vld [vmem:[%s8106_s8 + $0x10] sm:$0xff] }
   0x2   :  { %8148 = vst [vmem:[#allocation21_spill] sm:$0xff] %v5510_v0  ;;  %8149 = vst [vmem:[#allocation22_spill] sm:$0xff] %v5515_v1  ;;  %v5525_v3 = vld [vmem:[%s8106_s8 + $0x18] sm:$0xff]  ;;  %v5530_v4 = vld [vmem:[%s8106_s8 + $0x20] sm:$0xff] }
   0x3   :  { %8150 = vst [vmem:[#allocation23_spill] sm:$0xff] %v5520_v2  ;;  %v5535_v5 = vld [vmem:[%s8106_s8 + $0x28] sm:$0xff]  ;;  %v5540_v6 = vld [vmem:[%s8106_s8 + $0x30] sm:$0xff]  ;;  %v5545_v7 = vld [vmem:[%s8106_s8 + $0x38] sm:$0xff] }
   0x4   :  { %v5550_v8 = vld [vmem:[%s8106_s8 + $0x40] sm:$0xff]  ;;  %v5555_v9 = vld [vmem:[%s8106_s8 + $0x48] sm:$0xff]  ;;  %v5560_v10 = vld [vmem:[%s8106_s8 + $0x50] sm:$0xff] }
   0x5   :  { %8151 = vst [vmem:[#allocation24_spill] sm:$0xff] %v5550_v8  ;;  %8152 = vst [vmem:[#allocation25_spill] sm:$0xff] %v5555_v9  ;;  %v5565_v11 = vld [vmem:[%s8106_s8 + $0x58] sm:$0xff] }
   0x6   :  { %8153 = vst [vmem:[#allocation26_spill] sm:$0xff] %v5560_v10  ;;  %8154 = vst [vmem:[#allocation27_spill] sm:$0xff] %v5565_v11 }
   0x7   :  { %98 = vsyncadd [#allocation9], 1536  ;;  %v5570_v12 = vld [vmem:[%s8107_s9] sm:$0xff]  ;;  %v5575_v13 = vld [vmem:[%s8107_s9 + $0x8] sm:$0xff] }
   0x8   :  { %8155 = vst [vmem:[#allocation28_spill] sm:$0xff] %v5570_v12  ;;  %8156 = vst [vmem:[#allocation29_spill] sm:$0xff] %v5575_v13  ;;  %v5580_v14 = vld [vmem:[%s8107_s9 + $0x10] sm:$0xff]  ;;  %v5585_v15 = vld [vmem:[%s8107_s9 + $0x18] sm:$0xff] }
   0x9   :  { %8157 = vst [vmem:[#allocation30_spill] sm:$0xff] %v5580_v14  ;;  %8158 = vst [vmem:[#allocation31_spill] sm:$0xff] %v5585_v15  ;;  %v5590_v16 = vld [vmem:[%s8107_s9 + $0x20] sm:$0xff]  ;;  %v5595_v17 = vld [vmem:[%s8107_s9 + $0x28] sm:$0xff] }
   0xa   :  { %8159 = vst [vmem:[#allocation32_spill] sm:$0xff] %v5590_v16  ;;  %8160 = vst [vmem:[#allocation33_spill] sm:$0xff] %v5595_v17  ;;  %v5600_v18 = vld [vmem:[%s8107_s9 + $0x30] sm:$0xff]  ;;  %v5605_v19 = vld [vmem:[%s8107_s9 + $0x38] sm:$0xff] }
   0xb   :  { %8161 = vst [vmem:[#allocation34_spill] sm:$0xff] %v5600_v18  ;;  %8162 = vst [vmem:[#allocation35_spill] sm:$0xff] %v5605_v19  ;;  %v5610_v20 = vld [vmem:[%s8107_s9 + $0x40] sm:$0xff]  ;;  %v5615_v21 = vld [vmem:[%s8107_s9 + $0x48] sm:$0xff] }
   0xc   :  { %8163 = vst [vmem:[#allocation36_spill] sm:$0xff] %v5610_v20  ;;  %8164 = vst [vmem:[#allocation37_spill] sm:$0xff] %v5615_v21  ;;  %v5620_v22 = vld [vmem:[%s8107_s9 + $0x50] sm:$0xff]  ;;  %v5625_v23 = vld [vmem:[%s8107_s9 + $0x58] sm:$0xff] }
   0xd   :  { %8165 = vst [vmem:[#allocation38_spill] sm:$0xff] %v5620_v22  ;;  %8166 = vst [vmem:[#allocation39_spill] sm:$0xff] %v5625_v23  ;;  %v5630_v24 = vld [vmem:[%s8107_s9 + $0x60] sm:$0xff]  ;;  %v5635_v25 = vld [vmem:[%s8107_s9 + $0x68] sm:$0xff] }
   0xe   :  { %8167 = vst [vmem:[#allocation40_spill] sm:$0xff] %v5630_v24  ;;  %8168 = vst [vmem:[#allocation41_spill] sm:$0xff] %v5635_v25  ;;  %v5640_v26 = vld [vmem:[%s8107_s9 + $0x70] sm:$0xff]  ;;  %v5645_v27 = vld [vmem:[%s8107_s9 + $0x78] sm:$0xff] }
   0xf   :  { %8169 = vst [vmem:[#allocation42_spill] sm:$0xff] %v5640_v26  ;;  %8170 = vst [vmem:[#allocation43_spill] sm:$0xff] %v5645_v27  ;;  %v5650_v28 = vld [vmem:[%s8107_s9 + $0x80] sm:$0xff]  ;;  %v5655_v29 = vld [vmem:[%s8107_s9 + $0x88] sm:$0xff] }
  0x10   :  { %8171 = vst [vmem:[#allocation44_spill] sm:$0xff] %v5650_v28  ;;  %8172 = vst [vmem:[#allocation45_spill] sm:$0xff] %v5655_v29  ;;  %v5660_v30 = vld [vmem:[%s8107_s9 + $0x90] sm:$0xff]  ;;  %v5665_v31 = vld [vmem:[%s8107_s9 + $0x98] sm:$0xff] }
  0x11   :  { %8173 = vst [vmem:[#allocation46_spill] sm:$0xff] %v5660_v30  ;;  %8174 = vst [vmem:[#allocation47_spill] sm:$0xff] %v5665_v31  ;;  %v5670_v32 = vld [vmem:[%s8107_s9 + $0xa0] sm:$0xff]  ;;  %v5675_v33 = vld [vmem:[%s8107_s9 + $0xa8] sm:$0xff] }
  0x12   :  { %8175 = vst [vmem:[#allocation48_spill] sm:$0xff] %v5670_v32  ;;  %8176 = vst [vmem:[#allocation49_spill] sm:$0xff] %v5675_v33  ;;  %v5680_v34 = vld [vmem:[%s8107_s9 + $0xb0] sm:$0xff]  ;;  %v5685_v35 = vld [vmem:[%s8107_s9 + $0xb8] sm:$0xff] }
  0x13   :  { %8177 = vst [vmem:[#allocation50_spill] sm:$0xff] %v5680_v34  ;;  %8178 = vst [vmem:[#allocation51_spill] sm:$0xff] %v5685_v35 }
  0x14   :  { %188 = vsyncadd [#allocation9 + $0x1], 3072  ;;  %v5690_v36 = vld [vmem:[%s8108_s10] sm:$0xff]  ;;  %v5695_v37 = vld [vmem:[%s8108_s10 + $0x8] sm:$0xff] }
  0x15   :  { %8179 = vst [vmem:[#allocation52_spill] sm:$0xff] %v5690_v36  ;;  %8180 = vst [vmem:[#allocation53_spill] sm:$0xff] %v5695_v37  ;;  %v5700_v38 = vld [vmem:[%s8108_s10 + $0x10] sm:$0xff]  ;;  %v5705_v39 = vld [vmem:[%s8108_s10 + $0x18] sm:$0xff] }
  0x16   :  { %8181 = vst [vmem:[#allocation54_spill] sm:$0xff] %v5700_v38  ;;  %8182 = vst [vmem:[#allocation55_spill] sm:$0xff] %v5705_v39  ;;  %v5710_v40 = vld [vmem:[%s8108_s10 + $0x20] sm:$0xff]  ;;  %v5715_v41 = vld [vmem:[%s8108_s10 + $0x28] sm:$0xff] }
  0x17   :  { %8183 = vst [vmem:[#allocation56_spill] sm:$0xff] %v5710_v40  ;;  %8184 = vst [vmem:[#allocation57_spill] sm:$0xff] %v5715_v41  ;;  %v5720_v42 = vld [vmem:[%s8108_s10 + $0x30] sm:$0xff]  ;;  %v5725_v43 = vld [vmem:[%s8108_s10 + $0x38] sm:$0xff] }
  0x18   :  { %8185 = vst [vmem:[#allocation58_spill] sm:$0xff] %v5720_v42  ;;  %8186 = vst [vmem:[#allocation59_spill] sm:$0xff] %v5725_v43  ;;  %v5730_v44 = vld [vmem:[%s8108_s10 + $0x40] sm:$0xff]  ;;  %v5735_v45 = vld [vmem:[%s8108_s10 + $0x48] sm:$0xff] }
  0x19   :  { %8187 = vst [vmem:[#allocation60_spill] sm:$0xff] %v5730_v44  ;;  %8188 = vst [vmem:[#allocation61_spill] sm:$0xff] %v5735_v45  ;;  %v5740_v46 = vld [vmem:[%s8108_s10 + $0x50] sm:$0xff]  ;;  %v5745_v47 = vld [vmem:[%s8108_s10 + $0x58] sm:$0xff] }
  0x1a   :  { %8189 = vst [vmem:[#allocation62_spill] sm:$0xff] %v5740_v46  ;;  %8190 = vst [vmem:[#allocation63_spill] sm:$0xff] %v5745_v47  ;;  %v5750_v48 = vld [vmem:[%s8108_s10 + $0x60] sm:$0xff]  ;;  %v5755_v49 = vld [vmem:[%s8108_s10 + $0x68] sm:$0xff] }
  0x1b   :  { %8191 = vst [vmem:[#allocation64_spill] sm:$0xff] %v5750_v48  ;;  %8192 = vst [vmem:[#allocation65_spill] sm:$0xff] %v5755_v49  ;;  %v5760_v50 = vld [vmem:[%s8108_s10 + $0x70] sm:$0xff]  ;;  %v5765_v51 = vld [vmem:[%s8108_s10 + $0x78] sm:$0xff] }
  0x1c   :  { %8193 = vst [vmem:[#allocation66_spill] sm:$0xff] %v5760_v50  ;;  %8194 = vst [vmem:[#allocation67_spill] sm:$0xff] %v5765_v51  ;;  %v5770_v52 = vld [vmem:[%s8108_s10 + $0x80] sm:$0xff]  ;;  %v5775_v53 = vld [vmem:[%s8108_s10 + $0x88] sm:$0xff] }
  0x1d   :  { %8195 = vst [vmem:[#allocation68_spill] sm:$0xff] %v5770_v52  ;;  %8196 = vst [vmem:[#allocation69_spill] sm:$0xff] %v5775_v53  ;;  %v5780_v54 = vld [vmem:[%s8108_s10 + $0x90] sm:$0xff]  ;;  %v5785_v55 = vld [vmem:[%s8108_s10 + $0x98] sm:$0xff] }
  0x1e   :  { %8197 = vst [vmem:[#allocation70_spill] sm:$0xff] %v5780_v54  ;;  %8198 = vst [vmem:[#allocation71_spill] sm:$0xff] %v5785_v55  ;;  %v5790_v56 = vld [vmem:[%s8108_s10 + $0xa0] sm:$0xff]  ;;  %v5795_v57 = vld [vmem:[%s8108_s10 + $0xa8] sm:$0xff] }
  0x1f   :  { %8199 = vst [vmem:[#allocation72_spill] sm:$0xff] %v5790_v56  ;;  %8200 = vst [vmem:[#allocation73_spill] sm:$0xff] %v5795_v57  ;;  %v5800_v58 = vld [vmem:[%s8108_s10 + $0xb0] sm:$0xff]  ;;  %v5805_v59 = vld [vmem:[%s8108_s10 + $0xb8] sm:$0xff] }
  0x20   :  { %8201 = vst [vmem:[#allocation74_spill] sm:$0xff] %v5800_v58  ;;  %8202 = vst [vmem:[#allocation75_spill] sm:$0xff] %v5805_v59  ;;  %v5810_v60 = vld [vmem:[%s8108_s10 + $0xc0] sm:$0xff]  ;;  %v5815_v61 = vld [vmem:[%s8108_s10 + $0xc8] sm:$0xff] }
  0x21   :  { %8203 = vst [vmem:[#allocation76_spill] sm:$0xff] %v5810_v60  ;;  %8204 = vst [vmem:[#allocation77_spill] sm:$0xff] %v5815_v61  ;;  %v5820_v62 = vld [vmem:[%s8108_s10 + $0xd0] sm:$0xff]  ;;  %v5825_v63 = vld [vmem:[%s8108_s10 + $0xd8] sm:$0xff] }
  0x22   :  { %8205 = vst [vmem:[#allocation78_spill] sm:$0xff] %v5820_v62  ;;  %8206 = vst [vmem:[#allocation79_spill] sm:$0xff] %v5825_v63  ;;  %v5830_v42 = vld [vmem:[%s8108_s10 + $0xe0] sm:$0xff]  ;;  %v5835_v43 = vld [vmem:[%s8108_s10 + $0xe8] sm:$0xff] }
  0x23   :  { %8207 = vst [vmem:[#allocation80_spill] sm:$0xff] %v5830_v42  ;;  %8208 = vst [vmem:[#allocation81_spill] sm:$0xff] %v5835_v43  ;;  %v5840_v50 = vld [vmem:[%s8108_s10 + $0xf0] sm:$0xff]  ;;  %v5845_v51 = vld [vmem:[%s8108_s10 + $0xf8] sm:$0xff] }
  0x24   :  { %8209 = vst [vmem:[#allocation82_spill] sm:$0xff] %v5840_v50  ;;  %8210 = vst [vmem:[#allocation83_spill] sm:$0xff] %v5845_v51 }
  0x25   :  { %294 = vsyncadd [#allocation9 + $0x2], 4096  ;;  %v5850_v58 = vld [vmem:[%s8109_s11] sm:$0xff]  ;;  %v5855_v59 = vld [vmem:[%s8109_s11 + $0x8] sm:$0xff] }
  0x26   :  { %8211 = vst [vmem:[#allocation84_spill] sm:$0xff] %v5850_v58  ;;  %8212 = vst [vmem:[#allocation85_spill] sm:$0xff] %v5855_v59  ;;  %v5860_v50 = vld [vmem:[%s8109_s11 + $0x10] sm:$0xff]  ;;  %v5865_v51 = vld [vmem:[%s8109_s11 + $0x18] sm:$0xff] }
  0x27   :  { %8213 = vst [vmem:[#allocation86_spill] sm:$0xff] %v5860_v50  ;;  %8214 = vst [vmem:[#allocation87_spill] sm:$0xff] %v5865_v51  ;;  %v5870_v38 = vld [vmem:[%s8109_s11 + $0x20] sm:$0xff]  ;;  %v5875_v58 = vld [vmem:[%s8109_s11 + $0x28] sm:$0xff] }
  0x28   :  { %8215 = vst [vmem:[#allocation88_spill] sm:$0xff] %v5870_v38  ;;  %8216 = vst [vmem:[#allocation89_spill] sm:$0xff] %v5875_v58  ;;  %v5880_v59 = vld [vmem:[%s8109_s11 + $0x30] sm:$0xff]  ;;  %v5885_v50 = vld [vmem:[%s8109_s11 + $0x38] sm:$0xff] }
  0x29   :  { %8217 = vst [vmem:[#allocation90_spill] sm:$0xff] %v5880_v59  ;;  %8218 = vst [vmem:[#allocation91_spill] sm:$0xff] %v5885_v50  ;;  %v5890_v51 = vld [vmem:[%s8109_s11 + $0x40] sm:$0xff]  ;;  %v5895_v38 = vld [vmem:[%s8109_s11 + $0x48] sm:$0xff] }
  0x2a   :  { %8219 = vst [vmem:[#allocation92_spill] sm:$0xff] %v5890_v51  ;;  %8220 = vst [vmem:[#allocation93_spill] sm:$0xff] %v5895_v38  ;;  %v5900_v58 = vld [vmem:[%s8109_s11 + $0x50] sm:$0xff]  ;;  %v5905_v59 = vld [vmem:[%s8109_s11 + $0x58] sm:$0xff] }
  0x2b   :  { %8221 = vst [vmem:[#allocation94_spill] sm:$0xff] %v5900_v58  ;;  %8222 = vst [vmem:[#allocation95_spill] sm:$0xff] %v5905_v59  ;;  %v5910_v50 = vld [vmem:[%s8109_s11 + $0x60] sm:$0xff]  ;;  %v5915_v51 = vld [vmem:[%s8109_s11 + $0x68] sm:$0xff] }
  0x2c   :  { %8223 = vst [vmem:[#allocation96_spill] sm:$0xff] %v5910_v50  ;;  %8224 = vst [vmem:[#allocation97_spill] sm:$0xff] %v5915_v51  ;;  %v5920_v38 = vld [vmem:[%s8109_s11 + $0x70] sm:$0xff]  ;;  %v5925_v58 = vld [vmem:[%s8109_s11 + $0x78] sm:$0xff] }
  0x2d   :  { %8225 = vst [vmem:[#allocation98_spill] sm:$0xff] %v5920_v38  ;;  %8226 = vst [vmem:[#allocation99_spill] sm:$0xff] %v5925_v58  ;;  %v5930_v59 = vld [vmem:[%s8109_s11 + $0x80] sm:$0xff]  ;;  %v5935_v50 = vld [vmem:[%s8109_s11 + $0x88] sm:$0xff] }
  0x2e   :  { %8227 = vst [vmem:[#allocation100_spill] sm:$0xff] %v5930_v59  ;;  %8228 = vst [vmem:[#allocation101_spill] sm:$0xff] %v5935_v50  ;;  %v5940_v51 = vld [vmem:[%s8109_s11 + $0x90] sm:$0xff]  ;;  %v5945_v38 = vld [vmem:[%s8109_s11 + $0x98] sm:$0xff] }
  0x2f   :  { %8229 = vst [vmem:[#allocation102_spill] sm:$0xff] %v5940_v51  ;;  %8230 = vst [vmem:[#allocation103_spill] sm:$0xff] %v5945_v38  ;;  %v5950_v58 = vld [vmem:[%s8109_s11 + $0xa0] sm:$0xff]  ;;  %v5955_v59 = vld [vmem:[%s8109_s11 + $0xa8] sm:$0xff] }
  0x30   :  { %8231 = vst [vmem:[#allocation104_spill] sm:$0xff] %v5950_v58  ;;  %8232 = vst [vmem:[#allocation105_spill] sm:$0xff] %v5955_v59  ;;  %v5960_v50 = vld [vmem:[%s8109_s11 + $0xb0] sm:$0xff]  ;;  %v5965_v51 = vld [vmem:[%s8109_s11 + $0xb8] sm:$0xff] }
  0x31   :  { %8233 = vst [vmem:[#allocation106_spill] sm:$0xff] %v5960_v50  ;;  %8234 = vst [vmem:[#allocation107_spill] sm:$0xff] %v5965_v51  ;;  %v5970_v38 = vld [vmem:[%s8109_s11 + $0xc0] sm:$0xff]  ;;  %v5975_v58 = vld [vmem:[%s8109_s11 + $0xc8] sm:$0xff] }
  0x32   :  { %8235 = vst [vmem:[#allocation108_spill] sm:$0xff] %v5970_v38  ;;  %8236 = vst [vmem:[#allocation109_spill] sm:$0xff] %v5975_v58  ;;  %v5980_v59 = vld [vmem:[%s8109_s11 + $0xd0] sm:$0xff]  ;;  %v5985_v50 = vld [vmem:[%s8109_s11 + $0xd8] sm:$0xff] }
  0x33   :  { %8237 = vst [vmem:[#allocation110_spill] sm:$0xff] %v5980_v59  ;;  %8238 = vst [vmem:[#allocation111_spill] sm:$0xff] %v5985_v50  ;;  %v5990_v51 = vld [vmem:[%s8109_s11 + $0xe0] sm:$0xff]  ;;  %v5995_v38 = vld [vmem:[%s8109_s11 + $0xe8] sm:$0xff] }
  0x34   :  { %8239 = vst [vmem:[#allocation112_spill] sm:$0xff] %v5990_v51  ;;  %8240 = vst [vmem:[#allocation113_spill] sm:$0xff] %v5995_v38  ;;  %v6000_v58 = vld [vmem:[%s8109_s11 + $0xf0] sm:$0xff]  ;;  %v6005_v59 = vld [vmem:[%s8109_s11 + $0xf8] sm:$0xff] }
  0x35   :  { %8241 = vst [vmem:[#allocation114_spill] sm:$0xff] %v6000_v58  ;;  %8242 = vst [vmem:[#allocation115_spill] sm:$0xff] %v6005_v59  ;;  %v6010_v50 = vld [vmem:[%s8109_s11 + $0x100] sm:$0xff]  ;;  %v6015_v51 = vld [vmem:[%s8109_s11 + $0x108] sm:$0xff] }
  0x36   :  { %8243 = vst [vmem:[#allocation116_spill] sm:$0xff] %v6010_v50  ;;  %8244 = vst [vmem:[#allocation117_spill] sm:$0xff] %v6015_v51  ;;  %v6020_v38 = vld [vmem:[%s8109_s11 + $0x110] sm:$0xff]  ;;  %v6025_v58 = vld [vmem:[%s8109_s11 + $0x118] sm:$0xff] }
  0x37   :  { %8245 = vst [vmem:[#allocation118_spill] sm:$0xff] %v6020_v38  ;;  %8246 = vst [vmem:[#allocation119_spill] sm:$0xff] %v6025_v58  ;;  %v6030_v59 = vld [vmem:[%s8109_s11 + $0x120] sm:$0xff]  ;;  %v6035_v50 = vld [vmem:[%s8109_s11 + $0x128] sm:$0xff] }
  0x38   :  { %8247 = vst [vmem:[#allocation120_spill] sm:$0xff] %v6030_v59  ;;  %8248 = vst [vmem:[#allocation121_spill] sm:$0xff] %v6035_v50  ;;  %v6040_v51 = vld [vmem:[%s8109_s11 + $0x130] sm:$0xff]  ;;  %v6045_v38 = vld [vmem:[%s8109_s11 + $0x138] sm:$0xff] }
  0x39   :  { %8249 = vst [vmem:[#allocation122_spill] sm:$0xff] %v6040_v51  ;;  %8250 = vst [vmem:[#allocation123_spill] sm:$0xff] %v6045_v38  ;;  %v6050_v58 = vld [vmem:[%s8109_s11 + $0x140] sm:$0xff]  ;;  %v6055_v59 = vld [vmem:[%s8109_s11 + $0x148] sm:$0xff] }
  0x3a   :  { %8251 = vst [vmem:[#allocation124_spill] sm:$0xff] %v6050_v58  ;;  %8252 = vst [vmem:[#allocation125_spill] sm:$0xff] %v6055_v59  ;;  %v6060_v50 = vld [vmem:[%s8109_s11 + $0x150] sm:$0xff]  ;;  %v6065_v51 = vld [vmem:[%s8109_s11 + $0x158] sm:$0xff] }
  0x3b   :  { %8253 = vst [vmem:[#allocation126_spill] sm:$0xff] %v6060_v50  ;;  %8254 = vst [vmem:[#allocation127_spill] sm:$0xff] %v6065_v51  ;;  %v6070_v38 = vld [vmem:[%s8109_s11 + $0x160] sm:$0xff]  ;;  %v6075_v58 = vld [vmem:[%s8109_s11 + $0x168] sm:$0xff] }
  0x3c   :  { %8255 = vst [vmem:[#allocation128_spill] sm:$0xff] %v6070_v38  ;;  %8256 = vst [vmem:[#allocation129_spill] sm:$0xff] %v6075_v58  ;;  %v6080_v59 = vld [vmem:[%s8109_s11 + $0x170] sm:$0xff]  ;;  %v6085_v50 = vld [vmem:[%s8109_s11 + $0x178] sm:$0xff] }
  0x3d   :  { %8257 = vst [vmem:[#allocation130_spill] sm:$0xff] %v6080_v59  ;;  %8258 = vst [vmem:[#allocation131_spill] sm:$0xff] %v6085_v50  ;;  %v6090_v51 = vld [vmem:[%s8109_s11 + $0x180] sm:$0xff]  ;;  %v6095_v38 = vld [vmem:[%s8109_s11 + $0x188] sm:$0xff] }
  0x3e   :  { %8259 = vst [vmem:[#allocation132_spill] sm:$0xff] %v6090_v51  ;;  %8260 = vst [vmem:[#allocation133_spill] sm:$0xff] %v6095_v38  ;;  %v6100_v58 = vld [vmem:[%s8109_s11 + $0x190] sm:$0xff]  ;;  %v6105_v59 = vld [vmem:[%s8109_s11 + $0x198] sm:$0xff] }
  0x3f   :  { %8261 = vst [vmem:[#allocation134_spill] sm:$0xff] %v6100_v58  ;;  %8262 = vst [vmem:[#allocation135_spill] sm:$0xff] %v6105_v59  ;;  %v6110_v50 = vld [vmem:[%s8109_s11 + $0x1a0] sm:$0xff]  ;;  %v6115_v51 = vld [vmem:[%s8109_s11 + $0x1a8] sm:$0xff] }
  0x40   :  { %8263 = vst [vmem:[#allocation136_spill] sm:$0xff] %v6110_v50  ;;  %8264 = vst [vmem:[#allocation137_spill] sm:$0xff] %v6115_v51  ;;  %v6120_v38 = vld [vmem:[%s8109_s11 + $0x1b0] sm:$0xff]  ;;  %v6125_v58 = vld [vmem:[%s8109_s11 + $0x1b8] sm:$0xff] }
  0x41   :  { %8265 = vst [vmem:[#allocation138_spill] sm:$0xff] %v6120_v38  ;;  %8266 = vst [vmem:[#allocation139_spill] sm:$0xff] %v6125_v58  ;;  %v6130_v59 = vld [vmem:[%s8109_s11 + $0x1c0] sm:$0xff]  ;;  %v6135_v50 = vld [vmem:[%s8109_s11 + $0x1c8] sm:$0xff] }
  0x42   :  { %8267 = vst [vmem:[#allocation140_spill] sm:$0xff] %v6130_v59  ;;  %8268 = vst [vmem:[#allocation141_spill] sm:$0xff] %v6135_v50  ;;  %v6140_v51 = vld [vmem:[%s8109_s11 + $0x1d0] sm:$0xff]  ;;  %v6145_v38 = vld [vmem:[%s8109_s11 + $0x1d8] sm:$0xff] }
  0x43   :  { %8269 = vst [vmem:[#allocation142_spill] sm:$0xff] %v6140_v51  ;;  %8270 = vst [vmem:[#allocation143_spill] sm:$0xff] %v6145_v38  ;;  %v6150_v58 = vld [vmem:[%s8109_s11 + $0x1e0] sm:$0xff]  ;;  %v6155_v59 = vld [vmem:[%s8109_s11 + $0x1e8] sm:$0xff] }
  0x44   :  { %8271 = vst [vmem:[#allocation144_spill] sm:$0xff] %v6150_v58  ;;  %8272 = vst [vmem:[#allocation145_spill] sm:$0xff] %v6155_v59  ;;  %v6160_v50 = vld [vmem:[%s8109_s11 + $0x1f0] sm:$0xff]  ;;  %v6165_v51 = vld [vmem:[%s8109_s11 + $0x1f8] sm:$0xff] }
  0x45   :  { %8273 = vst [vmem:[#allocation146_spill] sm:$0xff] %v6160_v50  ;;  %8274 = vst [vmem:[#allocation147_spill] sm:$0xff] %v6165_v51  ;;  %v6170_v38 = vld [vmem:[%s8109_s11 + $0x200] sm:$0xff]  ;;  %v6175_v58 = vld [vmem:[%s8109_s11 + $0x208] sm:$0xff] }
  0x46   :  { %8275 = vst [vmem:[#allocation148_spill] sm:$0xff] %v6170_v38  ;;  %8276 = vst [vmem:[#allocation149_spill] sm:$0xff] %v6175_v58  ;;  %v6180_v59 = vld [vmem:[%s8109_s11 + $0x210] sm:$0xff]  ;;  %v6185_v50 = vld [vmem:[%s8109_s11 + $0x218] sm:$0xff] }
  0x47   :  { %8277 = vst [vmem:[#allocation150_spill] sm:$0xff] %v6180_v59  ;;  %8278 = vst [vmem:[#allocation151_spill] sm:$0xff] %v6185_v50  ;;  %v6190_v51 = vld [vmem:[%s8109_s11 + $0x220] sm:$0xff]  ;;  %v6195_v38 = vld [vmem:[%s8109_s11 + $0x228] sm:$0xff] }
  0x48   :  { %8279 = vst [vmem:[#allocation152_spill] sm:$0xff] %v6190_v51  ;;  %8280 = vst [vmem:[#allocation153_spill] sm:$0xff] %v6195_v38  ;;  %v6200_v58 = vld [vmem:[%s8109_s11 + $0x230] sm:$0xff]  ;;  %v6205_v59 = vld [vmem:[%s8109_s11 + $0x238] sm:$0xff] }
  0x49   :  { %8281 = vst [vmem:[#allocation154_spill] sm:$0xff] %v6200_v58  ;;  %8282 = vst [vmem:[#allocation155_spill] sm:$0xff] %v6205_v59  ;;  %v6210_v50 = vld [vmem:[%s8109_s11 + $0x240] sm:$0xff]  ;;  %v6215_v51 = vld [vmem:[%s8109_s11 + $0x248] sm:$0xff] }
  0x4a   :  { %8283 = vst [vmem:[#allocation156_spill] sm:$0xff] %v6210_v50  ;;  %8284 = vst [vmem:[#allocation157_spill] sm:$0xff] %v6215_v51  ;;  %v6220_v38 = vld [vmem:[%s8109_s11 + $0x250] sm:$0xff]  ;;  %v6225_v58 = vld [vmem:[%s8109_s11 + $0x258] sm:$0xff] }
  0x4b   :  { %8285 = vst [vmem:[#allocation158_spill] sm:$0xff] %v6220_v38  ;;  %8286 = vst [vmem:[#allocation159_spill] sm:$0xff] %v6225_v58  ;;  %v6230_v59 = vld [vmem:[%s8109_s11 + $0x260] sm:$0xff]  ;;  %v6235_v50 = vld [vmem:[%s8109_s11 + $0x268] sm:$0xff] }
  0x4c   :  { %8287 = vst [vmem:[#allocation160_spill] sm:$0xff] %v6230_v59  ;;  %8288 = vst [vmem:[#allocation161_spill] sm:$0xff] %v6235_v50  ;;  %v6240_v51 = vld [vmem:[%s8109_s11 + $0x270] sm:$0xff]  ;;  %v6245_v38 = vld [vmem:[%s8109_s11 + $0x278] sm:$0xff] }
  0x4d   :  { %8289 = vst [vmem:[#allocation162_spill] sm:$0xff] %v6240_v51  ;;  %8290 = vst [vmem:[#allocation163_spill] sm:$0xff] %v6245_v38  ;;  %v6250_v58 = vld [vmem:[%s8109_s11 + $0x280] sm:$0xff]  ;;  %v6255_v59 = vld [vmem:[%s8109_s11 + $0x288] sm:$0xff] }
  0x4e   :  { %8291 = vst [vmem:[#allocation164_spill] sm:$0xff] %v6250_v58  ;;  %8292 = vst [vmem:[#allocation165_spill] sm:$0xff] %v6255_v59  ;;  %v6260_v50 = vld [vmem:[%s8109_s11 + $0x290] sm:$0xff]  ;;  %v6265_v51 = vld [vmem:[%s8109_s11 + $0x298] sm:$0xff] }
  0x4f   :  { %8293 = vst [vmem:[#allocation166_spill] sm:$0xff] %v6260_v50  ;;  %8294 = vst [vmem:[#allocation167_spill] sm:$0xff] %v6265_v51  ;;  %v6270_v38 = vld [vmem:[%s8109_s11 + $0x2a0] sm:$0xff]  ;;  %v6275_v58 = vld [vmem:[%s8109_s11 + $0x2a8] sm:$0xff] }
  0x50   :  { %8295 = vst [vmem:[#allocation168_spill] sm:$0xff] %v6270_v38  ;;  %8296 = vst [vmem:[#allocation169_spill] sm:$0xff] %v6275_v58  ;;  %v6280_v59 = vld [vmem:[%s8109_s11 + $0x2b0] sm:$0xff]  ;;  %v6285_v50 = vld [vmem:[%s8109_s11 + $0x2b8] sm:$0xff] }
  0x51   :  { %8297 = vst [vmem:[#allocation170_spill] sm:$0xff] %v6280_v59  ;;  %8298 = vst [vmem:[#allocation171_spill] sm:$0xff] %v6285_v50  ;;  %v6290_v51 = vld [vmem:[%s8109_s11 + $0x2c0] sm:$0xff]  ;;  %v6295_v38 = vld [vmem:[%s8109_s11 + $0x2c8] sm:$0xff] }
  0x52   :  { %8299 = vst [vmem:[#allocation172_spill] sm:$0xff] %v6290_v51  ;;  %8300 = vst [vmem:[#allocation173_spill] sm:$0xff] %v6295_v38  ;;  %v6300_v58 = vld [vmem:[%s8109_s11 + $0x2d0] sm:$0xff]  ;;  %v6305_v59 = vld [vmem:[%s8109_s11 + $0x2d8] sm:$0xff] }
  0x53   :  { %8301 = vst [vmem:[#allocation174_spill] sm:$0xff] %v6300_v58  ;;  %8302 = vst [vmem:[#allocation175_spill] sm:$0xff] %v6305_v59  ;;  %v6310_v50 = vld [vmem:[%s8109_s11 + $0x2e0] sm:$0xff]  ;;  %v6315_v51 = vld [vmem:[%s8109_s11 + $0x2e8] sm:$0xff] }
  0x54   :  { %8303 = vst [vmem:[#allocation176_spill] sm:$0xff] %v6310_v50  ;;  %8304 = vst [vmem:[#allocation177_spill] sm:$0xff] %v6315_v51  ;;  %v6320_v38 = vld [vmem:[%s8109_s11 + $0x2f0] sm:$0xff]  ;;  %v6325_v58 = vld [vmem:[%s8109_s11 + $0x2f8] sm:$0xff] }
  0x55   :  { %8305 = vst [vmem:[#allocation178_spill] sm:$0xff] %v6320_v38  ;;  %8306 = vst [vmem:[#allocation179_spill] sm:$0xff] %v6325_v58  ;;  %v6330_v59 = vld [vmem:[%s8109_s11 + $0x300] sm:$0xff]  ;;  %v6335_v50 = vld [vmem:[%s8109_s11 + $0x308] sm:$0xff] }
  0x56   :  { %8307 = vst [vmem:[#allocation180_spill] sm:$0xff] %v6330_v59  ;;  %8308 = vst [vmem:[#allocation181_spill] sm:$0xff] %v6335_v50  ;;  %v6340_v51 = vld [vmem:[%s8109_s11 + $0x310] sm:$0xff]  ;;  %v6345_v38 = vld [vmem:[%s8109_s11 + $0x318] sm:$0xff] }
  0x57   :  { %8309 = vst [vmem:[#allocation182_spill] sm:$0xff] %v6340_v51  ;;  %8310 = vst [vmem:[#allocation183_spill] sm:$0xff] %v6345_v38  ;;  %v6350_v58 = vld [vmem:[%s8109_s11 + $0x320] sm:$0xff]  ;;  %v6355_v59 = vld [vmem:[%s8109_s11 + $0x328] sm:$0xff] }
  0x58   :  { %8311 = vst [vmem:[#allocation184_spill] sm:$0xff] %v6350_v58  ;;  %8312 = vst [vmem:[#allocation185_spill] sm:$0xff] %v6355_v59  ;;  %v6360_v50 = vld [vmem:[%s8109_s11 + $0x330] sm:$0xff]  ;;  %v6365_v51 = vld [vmem:[%s8109_s11 + $0x338] sm:$0xff] }
  0x59   :  { %8313 = vst [vmem:[#allocation186_spill] sm:$0xff] %v6360_v50  ;;  %8314 = vst [vmem:[#allocation187_spill] sm:$0xff] %v6365_v51  ;;  %v6370_v38 = vld [vmem:[%s8109_s11 + $0x340] sm:$0xff]  ;;  %v6375_v58 = vld [vmem:[%s8109_s11 + $0x348] sm:$0xff] }
  0x5a   :  { %8315 = vst [vmem:[#allocation188_spill] sm:$0xff] %v6370_v38  ;;  %8316 = vst [vmem:[#allocation189_spill] sm:$0xff] %v6375_v58  ;;  %v6380_v59 = vld [vmem:[%s8109_s11 + $0x350] sm:$0xff]  ;;  %v6385_v50 = vld [vmem:[%s8109_s11 + $0x358] sm:$0xff] }
  0x5b   :  { %8317 = vst [vmem:[#allocation190_spill] sm:$0xff] %v6380_v59  ;;  %8318 = vst [vmem:[#allocation191_spill] sm:$0xff] %v6385_v50  ;;  %v6390_v51 = vld [vmem:[%s8109_s11 + $0x360] sm:$0xff]  ;;  %v6395_v38 = vld [vmem:[%s8109_s11 + $0x368] sm:$0xff] }
  0x5c   :  { %8319 = vst [vmem:[#allocation192_spill] sm:$0xff] %v6390_v51  ;;  %8320 = vst [vmem:[#allocation193_spill] sm:$0xff] %v6395_v38  ;;  %v6400_v58 = vld [vmem:[%s8109_s11 + $0x370] sm:$0xff]  ;;  %v6405_v59 = vld [vmem:[%s8109_s11 + $0x378] sm:$0xff] }
  0x5d   :  { %8321 = vst [vmem:[#allocation194_spill] sm:$0xff] %v6400_v58  ;;  %8322 = vst [vmem:[#allocation195_spill] sm:$0xff] %v6405_v59  ;;  %v6410_v50 = vld [vmem:[%s8109_s11 + $0x380] sm:$0xff]  ;;  %v6415_v51 = vld [vmem:[%s8109_s11 + $0x388] sm:$0xff] }
  0x5e   :  { %8323 = vst [vmem:[#allocation196_spill] sm:$0xff] %v6410_v50  ;;  %8324 = vst [vmem:[#allocation197_spill] sm:$0xff] %v6415_v51  ;;  %v6420_v38 = vld [vmem:[%s8109_s11 + $0x390] sm:$0xff]  ;;  %v6425_v58 = vld [vmem:[%s8109_s11 + $0x398] sm:$0xff] }
  0x5f   :  { %8325 = vst [vmem:[#allocation198_spill] sm:$0xff] %v6420_v38  ;;  %8326 = vst [vmem:[#allocation199_spill] sm:$0xff] %v6425_v58  ;;  %v6430_v59 = vld [vmem:[%s8109_s11 + $0x3a0] sm:$0xff]  ;;  %v6435_v50 = vld [vmem:[%s8109_s11 + $0x3a8] sm:$0xff] }
  0x60   :  { %8327 = vst [vmem:[#allocation200_spill] sm:$0xff] %v6430_v59  ;;  %8328 = vst [vmem:[#allocation201_spill] sm:$0xff] %v6435_v50  ;;  %v6440_v51 = vld [vmem:[%s8109_s11 + $0x3b0] sm:$0xff]  ;;  %v6445_v38 = vld [vmem:[%s8109_s11 + $0x3b8] sm:$0xff] }
  0x61   :  { %8329 = vst [vmem:[#allocation202_spill] sm:$0xff] %v6440_v51  ;;  %8330 = vst [vmem:[#allocation203_spill] sm:$0xff] %v6445_v38  ;;  %v6450_v58 = vld [vmem:[%s8109_s11 + $0x3c0] sm:$0xff]  ;;  %v6455_v59 = vld [vmem:[%s8109_s11 + $0x3c8] sm:$0xff] }
  0x62   :  { %8331 = vst [vmem:[#allocation204_spill] sm:$0xff] %v6450_v58  ;;  %8332 = vst [vmem:[#allocation205_spill] sm:$0xff] %v6455_v59  ;;  %v6460_v50 = vld [vmem:[%s8109_s11 + $0x3d0] sm:$0xff]  ;;  %v6465_v51 = vld [vmem:[%s8109_s11 + $0x3d8] sm:$0xff] }
  0x63   :  { %8333 = vst [vmem:[#allocation206_spill] sm:$0xff] %v6460_v50  ;;  %8334 = vst [vmem:[#allocation207_spill] sm:$0xff] %v6465_v51  ;;  %v6470_v38 = vld [vmem:[%s8109_s11 + $0x3e0] sm:$0xff]  ;;  %v6475_v58 = vld [vmem:[%s8109_s11 + $0x3e8] sm:$0xff] }
  0x64   :  { %8335 = vst [vmem:[#allocation208_spill] sm:$0xff] %v6470_v38  ;;  %8336 = vst [vmem:[#allocation209_spill] sm:$0xff] %v6475_v58  ;;  %v6480_v59 = vld [vmem:[%s8109_s11 + $0x3f0] sm:$0xff]  ;;  %v6485_v50 = vld [vmem:[%s8109_s11 + $0x3f8] sm:$0xff] }
  0x65   :  { %8337 = vst [vmem:[#allocation210_spill] sm:$0xff] %v6480_v59  ;;  %8338 = vst [vmem:[#allocation211_spill] sm:$0xff] %v6485_v50  ;;  %v6490_v51 = vld [vmem:[%s8100_s2 + $0xb8] sm:$0xff]  ;;  %v6495_v38 = vld [vmem:[%s8100_s2 + $0xb0] sm:$0xff]  ;;  %v8111_v50 = vmov 0.0  }
  0x66   :  { %v6500_v58 = vld [vmem:[%s8100_s2 + $0xa8] sm:$0xff]  ;;  %765 = vmatprep.subr.mxu1 %v6490_v51  ;;  %v6506_v59 = vld [vmem:[%s8100_s2 + $0xa0] sm:$0xff]  ;;  %698 = vmatprep.mubr.f32.mxu0 %v8111_v50  ;;  %v6513_v39 = vld [vmem:[%s8100_s2 + $0x98] sm:$0xff] }
  0x67   :  { %766 = vmatpush1.msra.mxu1 %v6495_v38  ;;  %821 = vmatprep.mubr.f32.mxu1 %v8111_v50  ;;  %v6520_v46 = vld [vmem:[%s8100_s2 + $0x90] sm:$0xff]  ;;  %v6526_v47 = vld [vmem:[%s8100_s2 + $0x88] sm:$0xff]  ;;  %v6532_v50 = vld [vmem:[%s8100_s2 + $0x80] sm:$0xff] }
  0x68   :  { %767 = vmatprep.subr.mxu1 %v6500_v58  ;;  %v6538_v54 = vld [vmem:[%s8100_s2 + $0x78] sm:$0xff] }
  0x69   :  { %768 = vmatpush1.msra.mxu1 %v6506_v59 }
  0x6a   :  { %769 = vmatprep.subr.mxu1 %v6513_v39 }
  0x6b   :  { %770 = vmatpush1.msra.mxu1 %v6520_v46 }
  0x6c   :  { %592 = vsyncadd [#allocation9 + $0x3], 16384  ;;  %v598_v40 = vld [vmem:[%s8099_s1] sm:$0xff]  ;;  %vm629_vm0 = vcmask 1043456   ;;  %771 = vmatprep.subr.mxu1 %v6526_v47  ;;  %v6547_v55 = vld [vmem:[%s8100_s2 + $0x70] sm:$0xff]  ;;  %vm613_vm1 = vcmask 31744   ;;  %v601_v43 = vlaneseq }
  0x6d   :  { %v612_v62 = vcombine.high %v598_v40, %v598_v40  ;;  %772 = vmatpush1.msra.mxu1 %v6532_v50  ;;  %v6553_v63 = vld [vmem:[%s8100_s2 + $0x68] sm:$0xff]  ;;  %v593_v41 = vld [vmem:[%s8098_s0] sm:$0xff]  ;;  %v6568_v48 = vld [vmem:[%s8100_s2 + $0x58] sm:$0xff]  ;;  %v8339_v45 = vmov 0.0   ;;  %s5437_s13 = smov 64   ;;  %s5439_s21 = smov 96  }
  0x6e   :  { %773 = vmatprep.subr.mxu1 %v6538_v54  ;;  %v6562_v36 = vld [vmem:[%s8100_s2 + $0x60] sm:$0xff]  ;;  %v6574_v37 = vld [vmem:[%s8100_s2 + $0x50] sm:$0xff]  ;;  %v6609_v44 = vld [vmem:[%s8100_s2 + $0x28] sm:$0xff]  ;;  %v6693_v60 = vshrl.u32 %v601_v43, 7  ;;  %vm863_vm2 = vcmask 261120   ;;  %vm865_vm3 = vcmask 523264  }
  0x6f   :  { %4743 = vmatprep.subr.msk.mxu0 %vm629_vm0, %v612_v62  ;;  %774 = vmatpush1.msra.mxu1 %v6547_v55  ;;  %v6581_v62 = vld [vmem:[%s8100_s2 + $0x48] sm:$0xff]  ;;  %v6602_v49 = vld [vmem:[%s8100_s2 + $0x30] sm:$0xff]  ;;  %v6616_v56 = vld [vmem:[%s8100_s2 + $0x20] sm:$0xff]  ;;  %vm753_vm4 = vcmask 785408   ;;  %vm1000_vm5 = vcmask 257026   ;;  %vm1304_vm6 = vcmask 261126  }
  0x70   :  { %4744 = vmatpush1.msk.msra.mxu0 %vm629_vm0, %v598_v40  ;;  %775 = vmatprep.subr.mxu1 %v6553_v63  ;;  %v6588_v40 = vld [vmem:[%s8100_s2 + $0x40] sm:$0xff]  ;;  %v6623_v57 = vld [vmem:[%s8100_s2 + $0x18] sm:$0xff]  ;;  %v6630_v52 = vld [vmem:[%s8100_s2 + $0x10] sm:$0xff]  ;;  %8340 = vst [vmem:[#allocation212_spill] sm:$0xff] %v6693_v60  ;;  %v8123_v61 = vsub.s32 1, %v6693_v60  ;;  %v8130_v12 = vsub.s32 0, %v6693_v60 }
  0x71   :  { %4745 = vmatmul.mubr.msk.f32.vlgmr.msra.gmra.mxu0 %vm613_vm1, %v593_v41  ;;  %776 = vmatpush1.msra.mxu1 %v6562_v36  ;;  %v6595_v41 = vld [vmem:[%s8100_s2 + $0x38] sm:$0xff]  ;;  %v6637_v42 = vld [vmem:[%s8100_s2 + $0x8] sm:$0xff]  ;;  %v6644_v53 = vld [vmem:[%s8100_s2] sm:$0xff]  ;;  %vm1152_vm7 = vcmask 259076   ;;  %vm1450_vm8 = vcmask 254976  }
  0x72   :  { %878 = vmatprep.subr.mxu0 %v6490_v51  ;;  %777 = vmatprep.subr.mxu1 %v6568_v48  ;;  %v599_v28 = vld [vmem:[%s8101_s3] sm:$0x3]  ;;  %s5438_s3 = smov 32  }
  0x73   :  { %879 = vmatpush1.msra.mxu0 %v6495_v38  ;;  %778 = vmatpush1.msra.mxu1 %v6574_v37  ;;  %v6701_v30 = vrot.slane %v599_v28, %v8123_v61  ;;  %v6711_v20 = vrot.slane %v599_v28, %v8130_v12 }
  0x74   :  { %880 = vmatprep.subr.mxu0 %v6500_v58  ;;  %779 = vmatprep.subr.mxu1 %v6581_v62 }
  0x75   :  { %881 = vmatpush1.msra.mxu0 %v6506_v59  ;;  %780 = vmatpush1.msra.mxu1 %v6588_v40 }
  0x76   :  { %882 = vmatprep.subr.mxu0 %v6513_v39  ;;  %781 = vmatprep.subr.mxu1 %v6595_v41 }
  0x77   :  { %704 = vmatprep.mubr.f32.mxu0 %v8339_v45  ;;  %782 = vmatpush1.msra.mxu1 %v6602_v49 }
  0x78   :  { %883 = vmatpush1.msra.mxu0 %v6520_v46  ;;  %783 = vmatprep.subr.mxu1 %v6609_v44 }
  0x79   :  { %884 = vmatprep.subr.mxu0 %v6526_v47  ;;  %784 = vmatpush1.msra.mxu1 %v6616_v56 }
  0x7a   :  { %885 = vmatpush1.msra.mxu0 %v6532_v50  ;;  %785 = vmatprep.subr.mxu1 %v6623_v57 }
  0x7b   :  { %886 = vmatprep.subr.mxu0 %v6538_v54  ;;  %786 = vmatpush1.msra.mxu1 %v6630_v52 }
  0x7c   :  { %887 = vmatpush1.msra.mxu0 %v6547_v55  ;;  %787 = vmatprep.subr.mxu1 %v6637_v42 }
  0x7d   :  { %888 = vmatprep.subr.mxu0 %v6553_v63  ;;  %788 = vmatpush1.msra.mxu1 %v6644_v53 }
  0x7e   :  { %889 = vmatpush1.msra.mxu0 %v6562_v36  ;;  %822 = vmatmul.mubr.f32.vlgmr.msra.gmra.mxu1 %v8339_v45 }
  0x7f   :  { %890 = vmatprep.subr.mxu0 %v6568_v48  ;;  %1027 = vmatprep.subr.mxu1 %v6490_v51 }
  0x80   :  { %891 = vmatpush1.msra.mxu0 %v6574_v37  ;;  %1028 = vmatpush1.msra.mxu1 %v6495_v38 }
  0x81   :  { %892 = vmatprep.subr.mxu0 %v6581_v62  ;;  %1029 = vmatprep.subr.mxu1 %v6500_v58 }
  0x82   :  { %893 = vmatpush1.msra.mxu0 %v6588_v40  ;;  %1030 = vmatpush1.msra.mxu1 %v6506_v59 }
  0x83   :  { %894 = vmatprep.subr.mxu0 %v6595_v41  ;;  %1031 = vmatprep.subr.mxu1 %v6513_v39 }
  0x84   :  { %895 = vmatpush1.msra.mxu0 %v6602_v49  ;;  %1032 = vmatpush1.msra.mxu1 %v6520_v46 }
  0x85   :  { %896 = vmatprep.subr.mxu0 %v6609_v44  ;;  %1033 = vmatprep.subr.mxu1 %v6526_v47 }
  0x86   :  { %897 = vmatpush1.msra.mxu0 %v6616_v56  ;;  %1034 = vmatpush1.msra.mxu1 %v6532_v50 }
  0x87   :  { %898 = vmatprep.subr.mxu0 %v6623_v57  ;;  %1035 = vmatprep.subr.mxu1 %v6538_v54 }
  0x88   :  { %899 = vmatpush1.msra.mxu0 %v6630_v52  ;;  %1036 = vmatpush1.msra.mxu1 %v6547_v55 }
  0x89   :  { %900 = vmatprep.subr.mxu0 %v6637_v42  ;;  %1037 = vmatprep.subr.mxu1 %v6553_v63 }
  0x8a   :  { %901 = vmatpush1.msra.mxu0 %v6644_v53  ;;  %1038 = vmatpush1.msra.mxu1 %v6562_v36 }
  0x8b   :  { %1083 = vmatprep.mubr.f32.mxu1 %v8339_v45  ;;  %1039 = vmatprep.subr.mxu1 %v6568_v48 }
  0x8c   :  { %1179 = vmatprep.subr.mxu0 %v6490_v51  ;;  %1040 = vmatpush1.msra.mxu1 %v6574_v37 }
  0x8d   :  { %1041 = vmatprep.subr.mxu1 %v6581_v62 }
  0x8e   :  { %1042 = vmatpush1.msra.mxu1 %v6588_v40 }
  0x8f   :  { %1043 = vmatprep.subr.mxu1 %v6595_v41 }
  0x90   :  { %1044 = vmatpush1.msra.mxu1 %v6602_v49 }
  0x91   :  { %1045 = vmatprep.subr.mxu1 %v6609_v44 }
  0x92   :  { %1046 = vmatpush1.msra.mxu1 %v6616_v56 }
  0x93   :  { %1047 = vmatprep.subr.mxu1 %v6623_v57 }
  0x94   :  { %1048 = vmatpush1.msra.mxu1 %v6630_v52 }
  0x95   :  { %1049 = vmatprep.subr.mxu1 %v6637_v42 }
  0x96   :  { %1050 = vmatpush1.msra.mxu1 %v6644_v53 }
  0x97   :  { %1331 = vmatprep.subr.mxu1 %v6490_v51 }
 0x131   :  { %v700_v29 = vpop.f32.mrf.mxu0 }
 0x132   :  { %v6714_v61 = vadd.f32 %v700_v29, %v6711_v20  ;;  %v594_v29 = vld [vmem:[%s8098_s0 + $0x8] sm:$0xff] }
 0x133   :  { %v702_v31 = vpop.f32.mrf.mxu0  ;;  %4746 = vmatmul.mubr.msk.f32.gmra.mxu0 %vm613_vm1, %v594_v29 }
 0x134   :  { %v6704_v33 = vadd.f32 %v702_v31, %v6701_v30  ;;  %710 = vmatprep.mubr.f32.mxu0 %v8339_v45 }
 0x13e   :  { %v823_v32 = vpop.f32.mrf.mxu1 }
 0x13f   :  { %v828_v31 = vadd.f32 %v823_v32, %v6714_v61 }
 0x140   :  { %v825_v34 = vpop.f32.mrf.mxu1 }
 0x141   :  { %v829_v43 = vadd.f32 %v825_v34, %v6704_v33  ;;  %v4750_v13 = vmul.f32 -1.442695, %v828_v31 }
 0x143   :  { %5128 = vtanh.f32 %v829_v43 }
 0x144   :  { %5130 = vpow2.f32 %v4750_v13  ;;  %v595_v13 = vld [vmem:[%s8098_s0 + $0x10] sm:$0xff] }
 0x145   :  { %4747 = vmatmul.mubr.msk.f32.gmra.mxu0 %vm613_vm1, %v595_v13 }
 0x146   :  { %716 = vmatprep.mubr.f32.mxu0 %v8339_v45 }
 0x150   :  { %v5129_v35 = vpop.eup %5128 }
 0x151   :  { %839 = vrot.lane.b32.xlu0 %v5129_v35, %s5437_s13  ;;  %v5131_v21 = vpop.eup %5130 }
 0x152   :  { %v833_v34 = vadd.f32 1.0, %v5131_v21 }
 0x154   :  { %5132 = vrcp.f32 %v833_v34 }
 0x161   :  { %v5133_v43 = vpop.eup %5132 }
 0x162   :  { %v837_v35 = vmul.f32 0.0, %v5133_v43 }
 0x1c3   :  { %v840_v14 = vpop.permute.xlu0 %839 }
 0x1c4   :  { %v842_v22 = vmul.f32 %v5133_v43, %v840_v14  ;;  %v596_v14 = vld [vmem:[%s8098_s0 + $0x18] sm:$0xff] }
 0x1c5   :  { %4748 = vmatmul.mubr.msk.f32.gmra.mxu0 %vm613_vm1, %v596_v14 }
 0x1c6   :  { %844 = vrot.lane.b32.xlu0 %v842_v22, %s5438_s3  ;;  %722 = vmatprep.mubr.f32.mxu0 %v8339_v45  ;;  %v597_v22 = vld [vmem:[%s8098_s0 + $0x20] sm:$0x3] }
 0x1c9   :  { %4749 = vmatmul.mubr.msk.f32.gmra.mxu0 %vm613_vm1, %v597_v22 }
 0x1ca   :  { %934 = vmatprep.mubr.f32.mxu0 %v8339_v45 }
 0x238   :  { %v845_v60 = vpop.permute.xlu0 %844 }
 0x239   :  { %v6718_v28 = vadd.f32 %v845_v60, %v837_v35 }
 0x23b   :  { %5134 = vtanh.f32 %v6718_v28 }
 0x248   :  { %v5135_v21 = vpop.eup %5134 }
 0x249   :  { %850 = vrot.lane.b32.xlu1 %v5135_v21, %s5438_s3 }
 0x2bb   :  { %v851_v32 = vpop.permute.xlu1 %850 }
 0x2bc   :  { %v853_v60 = vmul.f32 %v5133_v43, %v851_v32  ;;  %v6772_v43 = vpop.f32.mrf.mxu0 }
 0x2be   :  { %v854_v31 = vmax.f32 %v853_v60, 0.0  ;;  %856 = vrot.lane.b32.xlu1 %v853_v60, %s5437_s13  ;;  %v6774_v14 = vpop.f32.mrf.mxu0 }
 0x2c0   :  { %860 = vrot.lane.b32.xlu0 %v854_v31, %s5439_s21  ;;  %v6776_v21 = vpop.f32.mrf.mxu0 }
 0x2c2   :  { %v6778_v22 = vpop.f32.mrf.mxu0 }
 0x2c4   :  { %v6780_v32 = vpop.f32.mrf.mxu0 }
 0x2c6   :  { %v6782_v60 = vpop.f32.mrf.mxu0 }
 0x2c8   :  { %v6784_v31 = vpop.f32.mrf.mxu0 }
 0x330   :  { %v857_v34 = vpop.permute.xlu1 %856 }
 0x332   :  { %v861_v35 = vpop.permute.xlu0 %860 }
 0x333   :  { %v864_v29 = vsel %vm863_vm2, %v857_v34, %v861_v35  ;;  %v6786_v34 = vpop.f32.mrf.mxu0 }
 0x334   :  { %v866_v13 = vsel %vm865_vm3, %v864_v29, 0.0 }
 0x335   :  { %4751 = vmatmul.mubr.msk.f32.vlgmr.msra.gmra.mxu0 %vm753_vm4, %v866_v13 }
 0x336   :  { %1180 = vmatpush1.msra.mxu0 %v6495_v38  ;;  %1235 = vmatprep.mubr.f32.mxu0 %v8339_v45 }
 0x337   :  { %1181 = vmatprep.subr.mxu0 %v6500_v58 }
 0x338   :  { %1182 = vmatpush1.msra.mxu0 %v6506_v59 }
 0x339   :  { %1183 = vmatprep.subr.mxu0 %v6513_v39 }
 0x33a   :  { %1184 = vmatpush1.msra.mxu0 %v6520_v46 }
 0x33b   :  { %1185 = vmatprep.subr.mxu0 %v6526_v47 }
 0x33c   :  { %1186 = vmatpush1.msra.mxu0 %v6532_v50 }
 0x33d   :  { %1187 = vmatprep.subr.mxu0 %v6538_v54 }
 0x33e   :  { %1188 = vmatpush1.msra.mxu0 %v6547_v55 }
 0x33f   :  { %1189 = vmatprep.subr.mxu0 %v6553_v63 }
 0x340   :  { %1190 = vmatpush1.msra.mxu0 %v6562_v36 }
 0x341   :  { %1191 = vmatprep.subr.mxu0 %v6568_v48 }
 0x342   :  { %1192 = vmatpush1.msra.mxu0 %v6574_v37 }
 0x343   :  { %1193 = vmatprep.subr.mxu0 %v6581_v62 }
 0x344   :  { %1194 = vmatpush1.msra.mxu0 %v6588_v40 }
 0x345   :  { %1195 = vmatprep.subr.mxu0 %v6595_v41 }
 0x346   :  { %1196 = vmatpush1.msra.mxu0 %v6602_v49 }
 0x347   :  { %1197 = vmatprep.subr.mxu0 %v6609_v44 }
 0x348   :  { %1198 = vmatpush1.msra.mxu0 %v6616_v56 }
 0x349   :  { %1199 = vmatprep.subr.mxu0 %v6623_v57 }
 0x34a   :  { %1200 = vmatpush1.msra.mxu0 %v6630_v52 }
 0x34b   :  { %1201 = vmatprep.subr.mxu0 %v6637_v42 }
 0x34c   :  { %1202 = vmatpush1.msra.mxu0 %v6644_v53 }
 0x34d   :  { %1476 = vmatprep.subr.mxu0 %v6490_v51 }
 0x3f5   :  { %v936_v35 = vpop.f32.mrf.mxu0 }
 0x3f6   :  { %v943_v29 = vrot.slane %v936_v35, 6 }
 0x3f7   :  { %v938_v13 = vpop.f32.mrf.mxu0 }
 0x3f8   :  { %v947_v12 = vadd.f32 %v943_v29, %v6714_v61  ;;  %v944_v15 = vrot.slane %v938_v13, 6 }
 0x3fa   :  { %v4752_v23 = vmul.f32 -1.442695, %v947_v12  ;;  %v948_v16 = vadd.f32 %v944_v15, %v6704_v33 }
 0x3fc   :  { %5136 = vpow2.f32 %v4752_v23  ;;  %v4753_v35 = vmul.f32 -1.442695, %v948_v16 }
 0x3fd   :  { %5138 = vtanh.f32 %v948_v16  ;;  %v963_v16 = vrot.slane %v6718_v28, 6 }
 0x409   :  { %v5137_v24 = vpop.eup %5136 }
 0x40a   :  { %v5139_v17 = vpop.eup %5138  ;;  %v955_v25 = vadd.f32 1.0, %v5137_v24 }
 0x40b   :  { %967 = vrot.lane.b32.xlu1 %v5139_v17, %s5437_s13 }
 0x40c   :  { %5140 = vrcp.f32 %v955_v25 }
 0x40d   :  { %5142 = vpow2.f32 %v4753_v35 }
 0x419   :  { %v5141_v18 = vpop.eup %5140 }
 0x41a   :  { %v984_v26 = vmul.f32 %v5141_v18, %v5139_v17  ;;  %v5143_v19 = vpop.eup %5142  ;;  %v965_v17 = vmul.f32 %v5141_v18, %v963_v16 }
 0x41b   :  { %v956_v29 = vadd.f32 1.0, %v5143_v19 }
 0x41c   :  { %986 = vrot.lane.b32.xlu1 %v984_v26, %s5438_s3 }
 0x41d   :  { %5144 = vrcp.f32 %v956_v29 }
 0x42a   :  { %v5145_v15 = vpop.eup %5144 }
 0x42b   :  { %v983_v23 = vmul.f32 0.0, %v5145_v15 }
 0x47d   :  { %v968_v12 = vpop.permute.xlu1 %967 }
 0x47e   :  { %v970_v13 = vmul.f32 %v5141_v18, %v968_v12 }
 0x480   :  { %972 = vrot.lane.b32.xlu0 %v970_v13, %s5438_s3 }
 0x48e   :  { %v987_v27 = vpop.permute.xlu1 %986 }
 0x48f   :  { %v6793_v24 = vadd.f32 %v987_v27, %v983_v23 }
 0x491   :  { %5146 = vtanh.f32 %v6793_v24 }
 0x49e   :  { %v5147_v25 = vpop.eup %5146 }
 0x49f   :  { %992 = vrot.lane.b32.xlu1 %v5147_v25, %s5438_s3 }
 0x4f2   :  { %v973_v26 = vpop.permute.xlu0 %972 }
 0x4f3   :  { %v6798_v19 = vadd.f32 %v973_v26, %v965_v17 }
 0x4f5   :  { %5148 = vtanh.f32 %v6798_v19 }
 0x502   :  { %v5149_v35 = vpop.eup %5148 }
 0x503   :  { %978 = vrot.lane.b32.xlu0 %v5149_v35, %s5438_s3 }
 0x511   :  { %v993_v27 = vpop.permute.xlu1 %992 }
 0x512   :  { %v6803_v23 = vmul.f32 %v5145_v15, %v993_v27 }
 0x575   :  { %v979_v29 = vpop.permute.xlu0 %978 }
 0x576   :  { %v981_v12 = vmul.f32 %v5141_v18, %v979_v29 }
 0x578   :  { %v982_v13 = vmax.f32 %v981_v12, 0.0  ;;  %1003 = vrot.lane.b32.xlu0 %v981_v12, %s5437_s13 }
 0x57a   :  { %1007 = vrot.lane.b32.xlu1 %v982_v13, %s5439_s21 }
 0x57c   :  { %1010 = vrot.lane.b32.xlu0 %v6803_v23, %s5438_s3 }
 0x5ea   :  { %v1004_v28 = vpop.permute.xlu0 %1003 }
 0x5ec   :  { %v1008_v25 = vpop.permute.xlu1 %1007 }
 0x5ed   :  { %v1013_v16 = vsel %vm863_vm2, %v1004_v28, %v1008_v25 }
 0x5ee   :  { %v1011_v17 = vpop.permute.xlu0 %1010 }
 0x5ef   :  { %v1014_v26 = vsel %vm865_vm3, %v1013_v16, %v1011_v17 }
 0x5f0   :  { %v1016_v35 = vrot.slane %v1014_v26, 2 }
 0x5f2   :  { %4754 = vmatmul.mubr.msk.f32.vlgmr.msra.gmra.mxu1 %vm753_vm4, %v1016_v35 }
 0x5f3   :  { %1332 = vmatpush1.msra.mxu1 %v6495_v38  ;;  %1387 = vmatprep.mubr.f32.mxu1 %v8339_v45 }
 0x5f4   :  { %1333 = vmatprep.subr.mxu1 %v6500_v58 }
 0x5f5   :  { %1334 = vmatpush1.msra.mxu1 %v6506_v59 }
 0x5f6   :  { %1335 = vmatprep.subr.mxu1 %v6513_v39 }
 0x5f7   :  { %1336 = vmatpush1.msra.mxu1 %v6520_v46 }
 0x5f8   :  { %1337 = vmatprep.subr.mxu1 %v6526_v47 }
 0x5f9   :  { %1338 = vmatpush1.msra.mxu1 %v6532_v50 }
 0x5fa   :  { %1339 = vmatprep.subr.mxu1 %v6538_v54 }
 0x5fb   :  { %1340 = vmatpush1.msra.mxu1 %v6547_v55 }
 0x5fc   :  { %1341 = vmatprep.subr.mxu1 %v6553_v63 }
 0x5fd   :  { %1342 = vmatpush1.msra.mxu1 %v6562_v36 }
 0x5fe   :  { %1343 = vmatprep.subr.mxu1 %v6568_v48 }
 0x5ff   :  { %1344 = vmatpush1.msra.mxu1 %v6574_v37 }
 0x600   :  { %1345 = vmatprep.subr.mxu1 %v6581_v62 }
 0x601   :  { %1346 = vmatpush1.msra.mxu1 %v6588_v40 }
 0x602   :  { %1347 = vmatprep.subr.mxu1 %v6595_v41 }
 0x603   :  { %1348 = vmatpush1.msra.mxu1 %v6602_v49 }
 0x604   :  { %1349 = vmatprep.subr.mxu1 %v6609_v44 }
 0x605   :  { %1350 = vmatpush1.msra.mxu1 %v6616_v56 }
 0x606   :  { %1351 = vmatprep.subr.mxu1 %v6623_v57 }
 0x607   :  { %1352 = vmatpush1.msra.mxu1 %v6630_v52 }
 0x608   :  { %1353 = vmatprep.subr.mxu1 %v6637_v42 }
 0x609   :  { %1354 = vmatpush1.msra.mxu1 %v6644_v53 }
 0x60a   :  { %1627 = vmatprep.subr.mxu1 %v6490_v51 }
 0x6b2   :  { %v1085_v18 = vpop.f32.mrf.mxu1 }
 0x6b3   :  { %v1092_v15 = vrot.slane %v1085_v18, 4 }
 0x6b4   :  { %v1087_v29 = vpop.f32.mrf.mxu1 }
 0x6b5   :  { %v1096_v12 = vadd.f32 %v1092_v15, %v6714_v61  ;;  %v1093_v27 = vrot.slane %v1087_v29, 4 }
 0x6b7   :  { %v4755_v13 = vmul.f32 -1.442695, %v1096_v12  ;;  %v1097_v28 = vadd.f32 %v1093_v27, %v6704_v33 }
 0x6b9   :  { %5150 = vpow2.f32 %v4755_v13  ;;  %v4756_v18 = vmul.f32 -1.442695, %v1097_v28  ;;  %v1133_v13 = vrot.slane %v6793_v24, 6 }
 0x6ba   :  { %5152 = vtanh.f32 %v1097_v28  ;;  %v1112_v28 = vrot.slane %v6798_v19, 6 }
 0x6c6   :  { %v5151_v25 = vpop.eup %5150 }
 0x6c7   :  { %v5153_v16 = vpop.eup %5152  ;;  %v1104_v17 = vadd.f32 1.0, %v5151_v25 }
 0x6c8   :  { %1116 = vrot.lane.b32.xlu1 %v5153_v16, %s5437_s13 }
 0x6c9   :  { %5154 = vrcp.f32 %v1104_v17 }
 0x6ca   :  { %5156 = vpow2.f32 %v4756_v18 }
 0x6d6   :  { %v5155_v26 = vpop.eup %5154 }
 0x6d7   :  { %v1136_v35 = vmul.f32 %v5155_v26, %v5153_v16  ;;  %v5157_v8 = vpop.eup %5156 }
 0x6d8   :  { %v1105_v15 = vadd.f32 1.0, %v5157_v8  ;;  %v1114_v8 = vmul.f32 %v5155_v26, %v1112_v28 }
 0x6d9   :  { %1138 = vrot.lane.b32.xlu1 %v1136_v35, %s5438_s3 }
 0x6da   :  { %5158 = vrcp.f32 %v1105_v15 }
 0x6e7   :  { %v5159_v27 = vpop.eup %5158 }
 0x6e8   :  { %v1135_v25 = vmul.f32 %v5159_v27, %v1133_v13 }
 0x73a   :  { %v1117_v29 = vpop.permute.xlu1 %1116 }
 0x73b   :  { %v1119_v12 = vmul.f32 %v5155_v26, %v1117_v29 }
 0x73d   :  { %1121 = vrot.lane.b32.xlu0 %v1119_v12, %s5438_s3 }
 0x74b   :  { %v1139_v9 = vpop.permute.xlu1 %1138 }
 0x74c   :  { %v6842_v10 = vadd.f32 %v1139_v9, %v1135_v25 }
 0x74e   :  { %5160 = vtanh.f32 %v6842_v10 }
 0x75b   :  { %v5161_v16 = vpop.eup %5160 }
 0x75c   :  { %1144 = vrot.lane.b32.xlu1 %v5161_v16, %s5438_s3 }
 0x7af   :  { %v1122_v17 = vpop.permute.xlu0 %1121 }
 0x7b0   :  { %v6847_v35 = vadd.f32 %v1122_v17, %v1114_v8 }
 0x7b2   :  { %5162 = vtanh.f32 %v6847_v35 }
 0x7bf   :  { %v5163_v18 = vpop.eup %5162 }
 0x7c0   :  { %1127 = vrot.lane.b32.xlu0 %v5163_v18, %s5438_s3 }
 0x7ce   :  { %v1145_v9 = vpop.permute.xlu1 %1144 }
 0x7cf   :  { %v6852_v12 = vmul.f32 %v5159_v27, %v1145_v9 }
 0x832   :  { %v1128_v24 = vpop.permute.xlu0 %1127 }
 0x833   :  { %v1130_v15 = vmul.f32 %v5155_v26, %v1128_v24 }
 0x835   :  { %v1131_v29 = vmax.f32 %v1130_v15, 0.0  ;;  %1155 = vrot.lane.b32.xlu0 %v1130_v15, %s5437_s13 }
 0x837   :  { %1159 = vrot.lane.b32.xlu1 %v1131_v29, %s5439_s21 }
 0x839   :  { %1162 = vrot.lane.b32.xlu0 %v6852_v12, %s5438_s3 }
 0x8a7   :  { %v1156_v19 = vpop.permute.xlu0 %1155 }
 0x8a9   :  { %v1160_v13 = vpop.permute.xlu1 %1159 }
 0x8aa   :  { %v1165_v25 = vsel %vm863_vm2, %v1156_v19, %v1160_v13 }
 0x8ab   :  { %v1163_v16 = vpop.permute.xlu0 %1162 }
 0x8ac   :  { %v1166_v28 = vsel %vm865_vm3, %v1165_v25, %v1163_v16 }
 0x8ad   :  { %v1168_v8 = vrot.slane %v1166_v28, 4 }
 0x8af   :  { %4757 = vmatmul.mubr.msk.f32.vlgmr.msra.gmra.mxu0 %vm753_vm4, %v1168_v8 }
 0x8b0   :  { %1477 = vmatpush1.msra.mxu0 %v6495_v38  ;;  %1532 = vmatprep.mubr.f32.mxu0 %v8339_v45 }
 0x8b1   :  { %1478 = vmatprep.subr.mxu0 %v6500_v58 }
 0x8b2   :  { %1479 = vmatpush1.msra.mxu0 %v6506_v59 }
 0x8b3   :  { %1480 = vmatprep.subr.mxu0 %v6513_v39 }
 0x8b4   :  { %1481 = vmatpush1.msra.mxu0 %v6520_v46 }
 0x8b5   :  { %1482 = vmatprep.subr.mxu0 %v6526_v47 }
 0x8b6   :  { %1483 = vmatpush1.msra.mxu0 %v6532_v50 }
 0x8b7   :  { %1484 = vmatprep.subr.mxu0 %v6538_v54 }
 0x8b8   :  { %1485 = vmatpush1.msra.mxu0 %v6547_v55 }
 0x8b9   :  { %1486 = vmatprep.subr.mxu0 %v6553_v63 }
 0x8ba   :  { %1487 = vmatpush1.msra.mxu0 %v6562_v36 }
 0x8bb   :  { %1488 = vmatprep.subr.mxu0 %v6568_v48 }
 0x8bc   :  { %1489 = vmatpush1.msra.mxu0 %v6574_v37 }
 0x8bd   :  { %1490 = vmatprep.subr.mxu0 %v6581_v62 }
 0x8be   :  { %1491 = vmatpush1.msra.mxu0 %v6588_v40 }
 0x8bf   :  { %1492 = vmatprep.subr.mxu0 %v6595_v41 }
 0x8c0   :  { %1493 = vmatpush1.msra.mxu0 %v6602_v49 }
 0x8c1   :  { %1494 = vmatprep.subr.mxu0 %v6609_v44 }
 0x8c2   :  { %1495 = vmatpush1.msra.mxu0 %v6616_v56 }
 0x8c3   :  { %1496 = vmatprep.subr.mxu0 %v6623_v57 }
 0x8c4   :  { %1497 = vmatpush1.msra.mxu0 %v6630_v52 }
 0x8c5   :  { %1498 = vmatprep.subr.mxu0 %v6637_v42 }
 0x8c6   :  { %1499 = vmatpush1.msra.mxu0 %v6644_v53 }
 0x8c7   :  { %1778 = vmatprep.subr.mxu0 %v6490_v51 }
 0x96f   :  { %v1237_v26 = vpop.f32.mrf.mxu0 }
 0x970   :  { %v1244_v27 = vrot.slane %v1237_v26, 2 }
 0x971   :  { %v1239_v17 = vpop.f32.mrf.mxu0 }
 0x972   :  { %v1248_v18 = vadd.f32 %v1244_v27, %v6714_v61  ;;  %v1245_v24 = vrot.slane %v1239_v17, 2  ;;  %v1285_v17 = vrot.slane %v6842_v10, 6 }
 0x974   :  { %v4758_v15 = vmul.f32 -1.442695, %v1248_v18  ;;  %v1249_v9 = vadd.f32 %v1245_v24, %v6704_v33 }
 0x976   :  { %5164 = vpow2.f32 %v4758_v15  ;;  %v4759_v28 = vmul.f32 -1.442695, %v1249_v9 }
 0x977   :  { %5166 = vtanh.f32 %v1249_v9  ;;  %v1264_v9 = vrot.slane %v6847_v35, 6 }
 0x983   :  { %v5165_v29 = vpop.eup %5164 }
 0x984   :  { %v5167_v19 = vpop.eup %5166  ;;  %v1256_v13 = vadd.f32 1.0, %v5165_v29 }
 0x985   :  { %1268 = vrot.lane.b32.xlu1 %v5167_v19, %s5437_s13 }
 0x986   :  { %5168 = vrcp.f32 %v1256_v13 }
 0x987   :  { %5170 = vpow2.f32 %v4759_v28 }
 0x993   :  { %v5169_v25 = vpop.eup %5168 }
 0x994   :  { %v1288_v16 = vmul.f32 %v5169_v25, %v5167_v19  ;;  %v5171_v8 = vpop.eup %5170  ;;  %v1266_v19 = vmul.f32 %v5169_v25, %v1264_v9 }
 0x995   :  { %v1257_v61 = vadd.f32 1.0, %v5171_v8 }
 0x996   :  { %1290 = vrot.lane.b32.xlu1 %v1288_v16, %s5438_s3 }
 0x997   :  { %5172 = vrcp.f32 %v1257_v61 }
 0x9a4   :  { %v5173_v33 = vpop.eup %5172 }
 0x9a5   :  { %v1287_v18 = vmul.f32 %v5173_v33, %v1285_v17 }
 0x9f7   :  { %v1269_v26 = vpop.permute.xlu1 %1268 }
 0x9f8   :  { %v1271_v27 = vmul.f32 %v5169_v25, %v1269_v26 }
 0x9fa   :  { %1273 = vrot.lane.b32.xlu0 %v1271_v27, %s5438_s3 }
 0xa08   :  { %v1291_v24 = vpop.permute.xlu1 %1290 }
 0xa09   :  { %v6891_v15 = vadd.f32 %v1291_v24, %v1287_v18 }
 0xa0b   :  { %5174 = vtanh.f32 %v6891_v15 }
 0xa18   :  { %v5175_v29 = vpop.eup %5174 }
 0xa19   :  { %1296 = vrot.lane.b32.xlu1 %v5175_v29, %s5438_s3 }
 0xa6c   :  { %v1274_v13 = vpop.permute.xlu0 %1273 }
 0xa6d   :  { %v6896_v16 = vadd.f32 %v1274_v13, %v1266_v19  ;;  %v6940_v19 = vadd.f32 %v6774_v14, %v6701_v30 }
 0xa6f   :  { %5176 = vtanh.f32 %v6896_v16 }
 0xa7c   :  { %v5177_v28 = vpop.eup %5176 }
 0xa7d   :  { %1279 = vrot.lane.b32.xlu0 %v5177_v28, %s5438_s3 }
 0xa8b   :  { %v1297_v61 = vpop.permute.xlu1 %1296 }
 0xa8c   :  { %v6901_v27 = vmul.f32 %v5173_v33, %v1297_v61 }
 0xaef   :  { %v1280_v10 = vpop.permute.xlu0 %1279 }
 0xaf0   :  { %v1282_v8 = vmul.f32 %v5169_v25, %v1280_v10  ;;  %v6936_v25 = vadd.f32 %v6772_v43, %v6711_v20 }
 0xaf2   :  { %v1283_v26 = vmax.f32 %v1282_v8, 0.0  ;;  %1307 = vrot.lane.b32.xlu0 %v1282_v8, %s5437_s13 }
 0xaf4   :  { %1311 = vrot.lane.b32.xlu1 %v1283_v26, %s5439_s21 }
 0xaf6   :  { %1314 = vrot.lane.b32.xlu0 %v6901_v27, %s5438_s3 }
 0xb64   :  { %v1308_v35 = vpop.permute.xlu0 %1307 }
 0xb66   :  { %v1312_v17 = vpop.permute.xlu1 %1311 }
 0xb67   :  { %v1317_v18 = vsel %vm863_vm2, %v1308_v35, %v1312_v17 }
 0xb68   :  { %v1315_v24 = vpop.permute.xlu0 %1314 }
 0xb69   :  { %v1318_v29 = vsel %vm865_vm3, %v1317_v18, %v1315_v24 }
 0xb6a   :  { %v1320_v9 = vrot.slane %v1318_v29, 6 }
 0xb6c   :  { %4760 = vmatmul.mubr.msk.f32.vlgmr.msra.gmra.mxu1 %vm753_vm4, %v1320_v9 }
 0xb6d   :  { %1628 = vmatpush1.msra.mxu1 %v6495_v38  ;;  %1683 = vmatprep.mubr.f32.mxu1 %v8339_v45 }
 0xb6e   :  { %1629 = vmatprep.subr.mxu1 %v6500_v58 }
 0xb6f   :  { %1630 = vmatpush1.msra.mxu1 %v6506_v59 }
 0xb70   :  { %1631 = vmatprep.subr.mxu1 %v6513_v39 }
 0xb71   :  { %1632 = vmatpush1.msra.mxu1 %v6520_v46 }
 0xb72   :  { %1633 = vmatprep.subr.mxu1 %v6526_v47 }
 0xb73   :  { %1634 = vmatpush1.msra.mxu1 %v6532_v50 }
 0xb74   :  { %1635 = vmatprep.subr.mxu1 %v6538_v54 }
 0xb75   :  { %1636 = vmatpush1.msra.mxu1 %v6547_v55 }
 0xb76   :  { %1637 = vmatprep.subr.mxu1 %v6553_v63 }
 0xb77   :  { %1638 = vmatpush1.msra.mxu1 %v6562_v36 }
 0xb78   :  { %1639 = vmatprep.subr.mxu1 %v6568_v48 }
 0xb79   :  { %1640 = vmatpush1.msra.mxu1 %v6574_v37 }
 0xb7a   :  { %1641 = vmatprep.subr.mxu1 %v6581_v62 }
 0xb7b   :  { %1642 = vmatpush1.msra.mxu1 %v6588_v40 }
 0xb7c   :  { %1643 = vmatprep.subr.mxu1 %v6595_v41 }
 0xb7d   :  { %1644 = vmatpush1.msra.mxu1 %v6602_v49 }
 0xb7e   :  { %1645 = vmatprep.subr.mxu1 %v6609_v44 }
 0xb7f   :  { %1646 = vmatpush1.msra.mxu1 %v6616_v56 }
 0xb80   :  { %1647 = vmatprep.subr.mxu1 %v6623_v57 }
 0xb81   :  { %1648 = vmatpush1.msra.mxu1 %v6630_v52 }
 0xb82   :  { %1649 = vmatprep.subr.mxu1 %v6637_v42 }
 0xb83   :  { %1650 = vmatpush1.msra.mxu1 %v6644_v53 }
 0xb84   :  { %1929 = vmatprep.subr.mxu1 %v6490_v51 }
 0xc2c   :  { %v1389_v33 = vpop.f32.mrf.mxu1 }
 0xc2d   :  { %v1394_v13 = vadd.f32 %v1389_v33, %v6936_v25  ;;  %v1431_v33 = vrot.slane %v6891_v15, 6 }
 0xc2e   :  { %v1391_v28 = vpop.f32.mrf.mxu1 }
 0xc2f   :  { %v4761_v10 = vmul.f32 -1.442695, %v1394_v13  ;;  %v1395_v8 = vadd.f32 %v1391_v28, %v6940_v19 }
 0xc31   :  { %5178 = vpow2.f32 %v4761_v10  ;;  %v4762_v14 = vmul.f32 -1.442695, %v1395_v8 }
 0xc32   :  { %5180 = vtanh.f32 %v1395_v8  ;;  %v1410_v8 = vrot.slane %v6896_v16, 6 }
 0xc3e   :  { %v5179_v61 = vpop.eup %5178 }
 0xc3f   :  { %v5181_v26 = vpop.eup %5180  ;;  %v1402_v51 = vadd.f32 1.0, %v5179_v61 }
 0xc40   :  { %1414 = vrot.lane.b32.xlu1 %v5181_v26, %s5437_s13 }
 0xc41   :  { %5182 = vrcp.f32 %v1402_v51 }
 0xc42   :  { %5184 = vpow2.f32 %v4762_v14 }
 0xc4e   :  { %v5183_v43 = vpop.eup %5182 }
 0xc4f   :  { %v1434_v35 = vmul.f32 %v5183_v43, %v5181_v26  ;;  %v5185_v17 = vpop.eup %5184  ;;  %v1412_v26 = vmul.f32 %v5183_v43, %v1410_v8 }
 0xc50   :  { %v1403_v18 = vadd.f32 1.0, %v5185_v17 }
 0xc51   :  { %1436 = vrot.lane.b32.xlu1 %v1434_v35, %s5438_s3 }
 0xc52   :  { %5186 = vrcp.f32 %v1403_v18 }
 0xc5f   :  { %v5187_v9 = vpop.eup %5186 }
 0xc60   :  { %v1433_v13 = vmul.f32 %v5187_v9, %v1431_v33 }
 0xcb2   :  { %v1415_v24 = vpop.permute.xlu1 %1414 }
 0xcb3   :  { %v1417_v29 = vmul.f32 %v5183_v43, %v1415_v24 }
 0xcb5   :  { %1419 = vrot.lane.b32.xlu0 %v1417_v29, %s5438_s3 }
 0xcc3   :  { %v1437_v28 = vpop.permute.xlu1 %1436 }
 0xcc4   :  { %v6948_v10 = vadd.f32 %v1437_v28, %v1433_v13 }
 0xcc6   :  { %5188 = vtanh.f32 %v6948_v10 }
 0xcd3   :  { %v5189_v61 = vpop.eup %5188 }
 0xcd4   :  { %1442 = vrot.lane.b32.xlu1 %v5189_v61, %s5438_s3 }
 0xd27   :  { %v1420_v51 = vpop.permute.xlu0 %1419 }
 0xd28   :  { %v6953_v35 = vadd.f32 %v1420_v51, %v1412_v26 }
 0xd2a   :  { %5190 = vtanh.f32 %v6953_v35 }
 0xd37   :  { %v5191_v14 = vpop.eup %5190 }
 0xd38   :  { %1425 = vrot.lane.b32.xlu0 %v5191_v14, %s5438_s3 }
 0xd46   :  { %v1443_v18 = vpop.permute.xlu1 %1442 }
 0xd47   :  { %v6958_v29 = vmul.f32 %v5187_v9, %v1443_v18  ;;  %v1561_v9 = vrot.slane %v6953_v35, 6 }
 0xdaa   :  { %v1426_v15 = vpop.permute.xlu0 %1425 }
 0xdab   :  { %v1428_v17 = vmul.f32 %v5183_v43, %v1426_v15 }
 0xdad   :  { %v1429_v24 = vmax.f32 %v1428_v17, 0.0  ;;  %1453 = vrot.lane.b32.xlu0 %v1428_v17, %s5437_s13 }
 0xdaf   :  { %1457 = vrot.lane.b32.xlu1 %v1429_v24, %s5439_s21 }
 0xdb1   :  { %1460 = vrot.lane.b32.xlu0 %v6958_v29, %s5438_s3 }
 0xe1f   :  { %v1454_v16 = vpop.permute.xlu0 %1453 }
 0xe21   :  { %v1458_v33 = vpop.permute.xlu1 %1457 }
 0xe22   :  { %v1463_v13 = vsel %vm863_vm2, %v1454_v16, %v1458_v33 }
 0xe23   :  { %v1461_v28 = vpop.permute.xlu0 %1460 }
 0xe24   :  { %v1464_v61 = vsel %vm865_vm3, %v1463_v13, %v1461_v28 }
 0xe25   :  { %4763 = vmatmul.mubr.msk.f32.vlgmr.msra.gmra.mxu0 %vm753_vm4, %v1464_v61 }
 0xe26   :  { %1779 = vmatpush1.msra.mxu0 %v6495_v38  ;;  %1834 = vmatprep.mubr.f32.mxu0 %v8339_v45 }
 0xe27   :  { %1780 = vmatprep.subr.mxu0 %v6500_v58 }
 0xe28   :  { %1781 = vmatpush1.msra.mxu0 %v6506_v59 }
 0xe29   :  { %1782 = vmatprep.subr.mxu0 %v6513_v39 }
 0xe2a   :  { %1783 = vmatpush1.msra.mxu0 %v6520_v46 }
 0xe2b   :  { %1784 = vmatprep.subr.mxu0 %v6526_v47 }
 0xe2c   :  { %1785 = vmatpush1.msra.mxu0 %v6532_v50 }
 0xe2d   :  { %1786 = vmatprep.subr.mxu0 %v6538_v54 }
 0xe2e   :  { %1787 = vmatpush1.msra.mxu0 %v6547_v55 }
 0xe2f   :  { %1788 = vmatprep.subr.mxu0 %v6553_v63  ;;  %v1582_v63 = vrot.slane %v6948_v10, 6 }
 0xe30   :  { %1789 = vmatpush1.msra.mxu0 %v6562_v36  ;;  %v6993_v36 = vld [vmem:[%s8100_s2 + $0xb8] sm:$0xff] }
 0xe31   :  { %1790 = vmatprep.subr.mxu0 %v6568_v48 }
 0xe32   :  { %1791 = vmatpush1.msra.mxu0 %v6574_v37 }
 0xe33   :  { %1792 = vmatprep.subr.mxu0 %v6581_v62 }
 0xe34   :  { %1793 = vmatpush1.msra.mxu0 %v6588_v40 }
 0xe35   :  { %1794 = vmatprep.subr.mxu0 %v6595_v41 }
 0xe36   :  { %1795 = vmatpush1.msra.mxu0 %v6602_v49 }
 0xe37   :  { %1796 = vmatprep.subr.mxu0 %v6609_v44 }
 0xe38   :  { %1797 = vmatpush1.msra.mxu0 %v6616_v56 }
 0xe39   :  { %1798 = vmatprep.subr.mxu0 %v6623_v57 }
 0xe3a   :  { %1799 = vmatpush1.msra.mxu0 %v6630_v52 }
 0xe3b   :  { %1800 = vmatprep.subr.mxu0 %v6637_v42 }
 0xe3c   :  { %1801 = vmatpush1.msra.mxu0 %v6644_v53 }
 0xe3d   :  { %2073 = vmatprep.subr.mxu0 %v6993_v36 }
 0xee5   :  { %v1534_v37 = vpop.f32.mrf.mxu0 }
 0xee6   :  { %v1541_v38 = vrot.slane %v1534_v37, 6  ;;  %v7023_v37 = vld [vmem:[%s8100_s2 + $0xb0] sm:$0xff] }
 0xee7   :  { %v1536_v39 = vpop.f32.mrf.mxu0 }
 0xee8   :  { %v1545_v44 = vadd.f32 %v1541_v38, %v6936_v25  ;;  %v1542_v46 = vrot.slane %v1536_v39, 6  ;;  %v7030_v38 = vld [vmem:[%s8100_s2 + $0xa8] sm:$0xff]  ;;  %v7036_v39 = vld [vmem:[%s8100_s2 + $0xa0] sm:$0xff] }
 0xeea   :  { %v4764_v47 = vmul.f32 -1.442695, %v1545_v44  ;;  %v1546_v48 = vadd.f32 %v1542_v46, %v6940_v19  ;;  %v7042_v44 = vld [vmem:[%s8100_s2 + $0x98] sm:$0xff]  ;;  %v7048_v46 = vld [vmem:[%s8100_s2 + $0x90] sm:$0xff] }
 0xeec   :  { %5192 = vpow2.f32 %v4764_v47  ;;  %v4765_v54 = vmul.f32 -1.442695, %v1546_v48  ;;  %v7054_v47 = vld [vmem:[%s8100_s2 + $0x88] sm:$0xff] }
 0xeed   :  { %5194 = vtanh.f32 %v1546_v48  ;;  %v7060_v48 = vld [vmem:[%s8100_s2 + $0x80] sm:$0xff] }
 0xef9   :  { %v5193_v42 = vpop.eup %5192 }
 0xefa   :  { %v5195_v49 = vpop.eup %5194  ;;  %v1553_v50 = vadd.f32 1.0, %v5193_v42  ;;  %v7066_v42 = vld [vmem:[%s8100_s2 + $0x78] sm:$0xff] }
 0xefb   :  { %1565 = vrot.lane.b32.xlu1 %v5195_v49, %s5437_s13 }
 0xefc   :  { %5196 = vrcp.f32 %v1553_v50  ;;  %v7078_v50 = vld [vmem:[%s8100_s2 + $0x68] sm:$0xff] }
 0xefd   :  { %5198 = vpow2.f32 %v4765_v54  ;;  %v7096_v54 = vld [vmem:[%s8100_s2 + $0x50] sm:$0xff] }
 0xf09   :  { %v5197_v52 = vpop.eup %5196 }
 0xf0a   :  { %v1585_v53 = vmul.f32 %v5197_v52, %v5195_v49  ;;  %v5199_v55 = vpop.eup %5198  ;;  %v1563_v8 = vmul.f32 %v5197_v52, %v1561_v9  ;;  %v7072_v49 = vld [vmem:[%s8100_s2 + $0x70] sm:$0xff]  ;;  %v7156_v9 = vld [vmem:[%s8100_s2] sm:$0xff] }
 0xf0b   :  { %v1554_v56 = vadd.f32 1.0, %v5199_v55  ;;  %v7102_v55 = vld [vmem:[%s8100_s2 + $0x48] sm:$0xff] }
 0xf0c   :  { %1587 = vrot.lane.b32.xlu1 %v1585_v53, %s5438_s3  ;;  %v7090_v53 = vld [vmem:[%s8100_s2 + $0x58] sm:$0xff] }
 0xf0d   :  { %5200 = vrcp.f32 %v1554_v56  ;;  %v7108_v56 = vld [vmem:[%s8100_s2 + $0x40] sm:$0xff] }
 0xf1a   :  { %v5201_v59 = vpop.eup %5200 }
 0xf1b   :  { %v1584_v62 = vmul.f32 %v5201_v59, %v1582_v63  ;;  %v7132_v63 = vld [vmem:[%s8100_s2 + $0x20] sm:$0xff] }
 0xf6d   :  { %v1566_v57 = vpop.permute.xlu1 %1565 }
 0xf6e   :  { %v1568_v58 = vmul.f32 %v5197_v52, %v1566_v57  ;;  %v7114_v57 = vld [vmem:[%s8100_s2 + $0x38] sm:$0xff] }
 0xf70   :  { %1570 = vrot.lane.b32.xlu0 %v1568_v58, %s5438_s3  ;;  %v7120_v58 = vld [vmem:[%s8100_s2 + $0x30] sm:$0xff] }
 0xf7e   :  { %v1588_v40 = vpop.permute.xlu1 %1587 }
 0xf7f   :  { %v7002_v41 = vadd.f32 %v1588_v40, %v1584_v62  ;;  %v7138_v62 = vld [vmem:[%s8100_s2 + $0x18] sm:$0xff]  ;;  %v7144_v40 = vld [vmem:[%s8100_s2 + $0x10] sm:$0xff] }
 0xf81   :  { %5202 = vtanh.f32 %v7002_v41 }
 0xf8e   :  { %v5203_v43 = vpop.eup %5202 }
 0xf8f   :  { %1593 = vrot.lane.b32.xlu1 %v5203_v43, %s5438_s3  ;;  %v7150_v43 = vld [vmem:[%s8100_s2 + $0x8] sm:$0xff] }
 0xfe2   :  { %v1571_v26 = vpop.permute.xlu0 %1570 }
 0xfe3   :  { %v7007_v51 = vadd.f32 %v1571_v26, %v1563_v8 }
 0xfe5   :  { %5204 = vtanh.f32 %v7007_v51 }
 0xff2   :  { %v5205_v14 = vpop.eup %5204 }
 0xff3   :  { %1576 = vrot.lane.b32.xlu0 %v5205_v14, %s5438_s3 }
0x1001   :  { %v1594_v17 = vpop.permute.xlu1 %1593 }
0x1002   :  { %v7012_v24 = vmul.f32 %v5201_v59, %v1594_v17  ;;  %v7126_v59 = vld [vmem:[%s8100_s2 + $0x28] sm:$0xff] }
0x1065   :  { %v1577_v10 = vpop.permute.xlu0 %1576 }
0x1066   :  { %v1579_v15 = vmul.f32 %v5197_v52, %v1577_v10  ;;  %v7084_v52 = vld [vmem:[%s8100_s2 + $0x60] sm:$0xff] }
0x1068   :  { %v1580_v18 = vmax.f32 %v1579_v15, 0.0  ;;  %1603 = vrot.lane.b32.xlu0 %v1579_v15, %s5437_s13 }
0x106a   :  { %1607 = vrot.lane.b32.xlu1 %v1580_v18, %s5439_s21 }
0x106c   :  { %1610 = vrot.lane.b32.xlu0 %v7012_v24, %s5438_s3 }
0x10da   :  { %v1604_v35 = vpop.permute.xlu0 %1603 }
0x10dc   :  { %v1608_v16 = vpop.permute.xlu1 %1607 }
0x10dd   :  { %v1613_v33 = vsel %vm863_vm2, %v1604_v35, %v1608_v16 }
0x10de   :  { %v1611_v13 = vpop.permute.xlu0 %1610 }
0x10df   :  { %v1614_v28 = vsel %vm865_vm3, %v1613_v33, %v1611_v13 }
0x10e0   :  { %v1616_v61 = vrot.slane %v1614_v28, 2 }
0x10e2   :  { %4766 = vmatmul.mubr.msk.f32.vlgmr.msra.gmra.mxu1 %vm753_vm4, %v1616_v61 }
0x10e3   :  { %1930 = vmatpush1.msra.mxu1 %v7023_v37  ;;  %1985 = vmatprep.mubr.f32.mxu1 %v8339_v45 }
0x10e4   :  { %1931 = vmatprep.subr.mxu1 %v7030_v38 }
0x10e5   :  { %1932 = vmatpush1.msra.mxu1 %v7036_v39 }
0x10e6   :  { %1933 = vmatprep.subr.mxu1 %v7042_v44 }
0x10e7   :  { %1934 = vmatpush1.msra.mxu1 %v7048_v46 }
0x10e8   :  { %1935 = vmatprep.subr.mxu1 %v7054_v47 }
0x10e9   :  { %1936 = vmatpush1.msra.mxu1 %v7060_v48 }
0x10ea   :  { %1937 = vmatprep.subr.mxu1 %v7066_v42 }
0x10eb   :  { %1938 = vmatpush1.msra.mxu1 %v7072_v49 }
0x10ec   :  { %1939 = vmatprep.subr.mxu1 %v7078_v50 }
0x10ed   :  { %1940 = vmatpush1.msra.mxu1 %v7084_v52 }
0x10ee   :  { %1941 = vmatprep.subr.mxu1 %v7090_v53 }
0x10ef   :  { %1942 = vmatpush1.msra.mxu1 %v7096_v54 }
0x10f0   :  { %1943 = vmatprep.subr.mxu1 %v7102_v55 }
0x10f1   :  { %1944 = vmatpush1.msra.mxu1 %v7108_v56 }
0x10f2   :  { %1945 = vmatprep.subr.mxu1 %v7114_v57 }
0x10f3   :  { %1946 = vmatpush1.msra.mxu1 %v7120_v58 }
0x10f4   :  { %1947 = vmatprep.subr.mxu1 %v7126_v59 }
0x10f5   :  { %1948 = vmatpush1.msra.mxu1 %v7132_v63 }
0x10f6   :  { %1949 = vmatprep.subr.mxu1 %v7138_v62 }
0x10f7   :  { %1950 = vmatpush1.msra.mxu1 %v7144_v40 }
0x10f8   :  { %1951 = vmatprep.subr.mxu1 %v7150_v43 }
0x10f9   :  { %1952 = vmatpush1.msra.mxu1 %v7156_v9 }
0x10fa   :  { %2224 = vmatprep.subr.mxu1 %v6993_v36 }
0x11a2   :  { %v1685_v8 = vpop.f32.mrf.mxu1 }
0x11a3   :  { %v1692_v26 = vrot.slane %v1685_v8, 4 }
0x11a4   :  { %v1687_v14 = vpop.f32.mrf.mxu1 }
0x11a5   :  { %v1696_v10 = vadd.f32 %v1692_v26, %v6936_v25  ;;  %v1693_v15 = vrot.slane %v1687_v14, 4 }
0x11a7   :  { %v4767_v17 = vmul.f32 -1.442695, %v1696_v10  ;;  %v1697_v18 = vadd.f32 %v1693_v15, %v6940_v19 }
0x11a9   :  { %5206 = vpow2.f32 %v4767_v17  ;;  %v4768_v61 = vmul.f32 -1.442695, %v1697_v18  ;;  %v1733_v17 = vrot.slane %v7002_v41, 6 }
0x11aa   :  { %5208 = vtanh.f32 %v1697_v18  ;;  %v1712_v18 = vrot.slane %v7007_v51, 6 }
0x11b6   :  { %v5207_v35 = vpop.eup %5206 }
0x11b7   :  { %v5209_v16 = vpop.eup %5208  ;;  %v1704_v33 = vadd.f32 1.0, %v5207_v35 }
0x11b8   :  { %1716 = vrot.lane.b32.xlu1 %v5209_v16, %s5437_s13 }
0x11b9   :  { %5210 = vrcp.f32 %v1704_v33 }
0x11ba   :  { %5212 = vpow2.f32 %v4768_v61 }
0x11c6   :  { %v5211_v13 = vpop.eup %5210 }
0x11c7   :  { %v1736_v28 = vmul.f32 %v5211_v13, %v5209_v16  ;;  %v5213_v8 = vpop.eup %5212  ;;  %v1714_v33 = vmul.f32 %v5211_v13, %v1712_v18 }
0x11c8   :  { %v1705_v26 = vadd.f32 1.0, %v5213_v8 }
0x11c9   :  { %1738 = vrot.lane.b32.xlu1 %v1736_v28, %s5438_s3 }
0x11ca   :  { %5214 = vrcp.f32 %v1705_v26 }
0x11d7   :  { %v5215_v15 = vpop.eup %5214 }
0x11d8   :  { %v1735_v35 = vmul.f32 %v5215_v15, %v1733_v17 }
0x122a   :  { %v1717_v14 = vpop.permute.xlu1 %1716 }
0x122b   :  { %v1719_v10 = vmul.f32 %v5211_v13, %v1717_v14 }
0x122d   :  { %1721 = vrot.lane.b32.xlu0 %v1719_v10, %s5438_s3 }
0x123b   :  { %v1739_v11 = vpop.permute.xlu1 %1738 }
0x123c   :  { %v7166_v0 = vadd.f32 %v1739_v11, %v1735_v35 }
0x123e   :  { %5216 = vtanh.f32 %v7166_v0 }
0x124b   :  { %v5217_v16 = vpop.eup %5216 }
0x124c   :  { %1744 = vrot.lane.b32.xlu1 %v5217_v16, %s5438_s3 }
0x129f   :  { %v1722_v28 = vpop.permute.xlu0 %1721 }
0x12a0   :  { %v7171_v61 = vadd.f32 %v1722_v28, %v1714_v33 }
0x12a2   :  { %5218 = vtanh.f32 %v7171_v61 }
0x12af   :  { %v5219_v8 = vpop.eup %5218 }
0x12b0   :  { %1727 = vrot.lane.b32.xlu0 %v5219_v8, %s5438_s3 }
0x12be   :  { %v1745_v11 = vpop.permute.xlu1 %1744 }
0x12bf   :  { %v7176_v10 = vmul.f32 %v5215_v15, %v1745_v11 }
0x1322   :  { %v1728_v41 = vpop.permute.xlu0 %1727 }
0x1323   :  { %v1730_v26 = vmul.f32 %v5211_v13, %v1728_v41 }
0x1325   :  { %v1731_v14 = vmax.f32 %v1730_v26, 0.0  ;;  %1754 = vrot.lane.b32.xlu0 %v1730_v26, %s5437_s13 }
0x1327   :  { %1758 = vrot.lane.b32.xlu1 %v1731_v14, %s5439_s21 }
0x1329   :  { %1761 = vrot.lane.b32.xlu0 %v7176_v10, %s5438_s3 }
0x1397   :  { %v1755_v51 = vpop.permute.xlu0 %1754 }
0x1399   :  { %v1759_v17 = vpop.permute.xlu1 %1758 }
0x139a   :  { %v1764_v35 = vsel %vm863_vm2, %v1755_v51, %v1759_v17 }
0x139b   :  { %v1762_v16 = vpop.permute.xlu0 %1761 }
0x139c   :  { %v1765_v18 = vsel %vm865_vm3, %v1764_v35, %v1762_v16 }
0x139d   :  { %v1767_v33 = vrot.slane %v1765_v18, 4 }
0x139f   :  { %4769 = vmatmul.mubr.msk.f32.vlgmr.msra.gmra.mxu0 %vm753_vm4, %v1767_v33 }
0x13a0   :  { %2074 = vmatpush1.msra.mxu0 %v7023_v37  ;;  %2129 = vmatprep.mubr.f32.mxu0 %v8339_v45 }
0x13a1   :  { %2075 = vmatprep.subr.mxu0 %v7030_v38 }
0x13a2   :  { %2076 = vmatpush1.msra.mxu0 %v7036_v39 }
0x13a3   :  { %2077 = vmatprep.subr.mxu0 %v7042_v44 }
0x13a4   :  { %2078 = vmatpush1.msra.mxu0 %v7048_v46 }
0x13a5   :  { %2079 = vmatprep.subr.mxu0 %v7054_v47 }
0x13a6   :  { %2080 = vmatpush1.msra.mxu0 %v7060_v48 }
0x13a7   :  { %2081 = vmatprep.subr.mxu0 %v7066_v42 }
0x13a8   :  { %2082 = vmatpush1.msra.mxu0 %v7072_v49 }
0x13a9   :  { %2083 = vmatprep.subr.mxu0 %v7078_v50 }
0x13aa   :  { %2084 = vmatpush1.msra.mxu0 %v7084_v52 }
0x13ab   :  { %2085 = vmatprep.subr.mxu0 %v7090_v53 }
0x13ac   :  { %2086 = vmatpush1.msra.mxu0 %v7096_v54 }
0x13ad   :  { %2087 = vmatprep.subr.mxu0 %v7102_v55 }
0x13ae   :  { %2088 = vmatpush1.msra.mxu0 %v7108_v56 }
0x13af   :  { %2089 = vmatprep.subr.mxu0 %v7114_v57 }
0x13b0   :  { %2090 = vmatpush1.msra.mxu0 %v7120_v58 }
0x13b1   :  { %2091 = vmatprep.subr.mxu0 %v7126_v59 }
0x13b2   :  { %2092 = vmatpush1.msra.mxu0 %v7132_v63 }
0x13b3   :  { %2093 = vmatprep.subr.mxu0 %v7138_v62 }
0x13b4   :  { %2094 = vmatpush1.msra.mxu0 %v7144_v40 }
0x13b5   :  { %2095 = vmatprep.subr.mxu0 %v7150_v43 }
0x13b6   :  { %2096 = vmatpush1.msra.mxu0 %v7156_v9 }
0x13b7   :  { %2375 = vmatprep.subr.mxu0 %v6993_v36 }
0x145f   :  { %v1836_v13 = vpop.f32.mrf.mxu0 }
0x1460   :  { %v1843_v15 = vrot.slane %v1836_v13, 2 }
0x1461   :  { %v1838_v28 = vpop.f32.mrf.mxu0 }
0x1462   :  { %v1847_v8 = vadd.f32 %v1843_v15, %v6936_v25  ;;  %v1844_v41 = vrot.slane %v1838_v28, 2  ;;  %v1884_v28 = vrot.slane %v7166_v0, 6 }
0x1464   :  { %v4770_v26 = vmul.f32 -1.442695, %v1847_v8  ;;  %v1848_v11 = vadd.f32 %v1844_v41, %v6940_v19 }
0x1466   :  { %5220 = vpow2.f32 %v4770_v26  ;;  %v4771_v18 = vmul.f32 -1.442695, %v1848_v11 }
0x1467   :  { %5222 = vtanh.f32 %v1848_v11  ;;  %v1863_v11 = vrot.slane %v7171_v61, 6 }
0x1473   :  { %v5221_v14 = vpop.eup %5220 }
0x1474   :  { %v5223_v51 = vpop.eup %5222  ;;  %v1855_v17 = vadd.f32 1.0, %v5221_v14 }
0x1475   :  { %1867 = vrot.lane.b32.xlu1 %v5223_v51, %s5437_s13 }
0x1476   :  { %5224 = vrcp.f32 %v1855_v17 }
0x1477   :  { %5226 = vpow2.f32 %v4771_v18 }
0x1483   :  { %v5225_v35 = vpop.eup %5224 }
0x1484   :  { %v1887_v16 = vmul.f32 %v5225_v35, %v5223_v51  ;;  %v5227_v33 = vpop.eup %5226  ;;  %v1865_v51 = vmul.f32 %v5225_v35, %v1863_v11 }
0x1485   :  { %v1856_v25 = vadd.f32 1.0, %v5227_v33 }
0x1486   :  { %1889 = vrot.lane.b32.xlu1 %v1887_v16, %s5438_s3 }
0x1487   :  { %5228 = vrcp.f32 %v1856_v25 }
0x1494   :  { %v5229_v19 = vpop.eup %5228 }
0x1495   :  { %v1886_v8 = vmul.f32 %v5229_v19, %v1884_v28 }
0x14e7   :  { %v1868_v13 = vpop.permute.xlu1 %1867 }
0x14e8   :  { %v1870_v15 = vmul.f32 %v5225_v35, %v1868_v13 }
0x14ea   :  { %1872 = vrot.lane.b32.xlu0 %v1870_v15, %s5438_s3 }
0x14f8   :  { %v1890_v41 = vpop.permute.xlu1 %1889 }
0x14f9   :  { %v7215_v26 = vadd.f32 %v1890_v41, %v1886_v8 }
0x14fb   :  { %5230 = vtanh.f32 %v7215_v26 }
0x1508   :  { %v5231_v14 = vpop.eup %5230 }
0x1509   :  { %1895 = vrot.lane.b32.xlu1 %v5231_v14, %s5438_s3 }
0x155c   :  { %v1873_v17 = vpop.permute.xlu0 %1872 }
0x155d   :  { %v7220_v16 = vadd.f32 %v1873_v17, %v1865_v51  ;;  %v7264_v51 = vadd.f32 %v6778_v22, %v6701_v30 }
0x155f   :  { %5232 = vtanh.f32 %v7220_v16 }
0x156c   :  { %v5233_v18 = vpop.eup %5232 }
0x156d   :  { %1878 = vrot.lane.b32.xlu0 %v5233_v18, %s5438_s3 }
0x157b   :  { %v1896_v25 = vpop.permute.xlu1 %1895 }
0x157c   :  { %v7225_v15 = vmul.f32 %v5229_v19, %v1896_v25 }
0x15df   :  { %v1879_v0 = vpop.permute.xlu0 %1878 }
0x15e0   :  { %v1881_v33 = vmul.f32 %v5225_v35, %v1879_v0  ;;  %v7260_v35 = vadd.f32 %v6776_v21, %v6711_v20 }
0x15e2   :  { %v1882_v13 = vmax.f32 %v1881_v33, 0.0  ;;  %1905 = vrot.lane.b32.xlu0 %v1881_v33, %s5437_s13 }
0x15e4   :  { %1909 = vrot.lane.b32.xlu1 %v1882_v13, %s5439_s21 }
0x15e6   :  { %1912 = vrot.lane.b32.xlu0 %v7225_v15, %s5438_s3 }
0x1654   :  { %v1906_v61 = vpop.permute.xlu0 %1905 }
0x1656   :  { %v1910_v28 = vpop.permute.xlu1 %1909 }
0x1657   :  { %v1915_v8 = vsel %vm863_vm2, %v1906_v61, %v1910_v28 }
0x1658   :  { %v1913_v41 = vpop.permute.xlu0 %1912 }
0x1659   :  { %v1916_v14 = vsel %vm865_vm3, %v1915_v8, %v1913_v41 }
0x165a   :  { %v1918_v11 = vrot.slane %v1916_v14, 6 }
0x165c   :  { %4772 = vmatmul.mubr.msk.f32.vlgmr.msra.gmra.mxu1 %vm753_vm4, %v1918_v11 }
0x165d   :  { %2225 = vmatpush1.msra.mxu1 %v7023_v37  ;;  %2280 = vmatprep.mubr.f32.mxu1 %v8339_v45 }
0x165e   :  { %2226 = vmatprep.subr.mxu1 %v7030_v38 }
0x165f   :  { %2227 = vmatpush1.msra.mxu1 %v7036_v39 }
0x1660   :  { %2228 = vmatprep.subr.mxu1 %v7042_v44 }
0x1661   :  { %2229 = vmatpush1.msra.mxu1 %v7048_v46 }
0x1662   :  { %2230 = vmatprep.subr.mxu1 %v7054_v47 }
0x1663   :  { %2231 = vmatpush1.msra.mxu1 %v7060_v48 }
0x1664   :  { %2232 = vmatprep.subr.mxu1 %v7066_v42 }
0x1665   :  { %2233 = vmatpush1.msra.mxu1 %v7072_v49 }
0x1666   :  { %2234 = vmatprep.subr.mxu1 %v7078_v50 }
0x1667   :  { %2235 = vmatpush1.msra.mxu1 %v7084_v52 }
0x1668   :  { %2236 = vmatprep.subr.mxu1 %v7090_v53 }
0x1669   :  { %2237 = vmatpush1.msra.mxu1 %v7096_v54 }
0x166a   :  { %2238 = vmatprep.subr.mxu1 %v7102_v55 }
0x166b   :  { %2239 = vmatpush1.msra.mxu1 %v7108_v56 }
0x166c   :  { %2240 = vmatprep.subr.mxu1 %v7114_v57 }
0x166d   :  { %2241 = vmatpush1.msra.mxu1 %v7120_v58 }
0x166e   :  { %2242 = vmatprep.subr.mxu1 %v7126_v59 }
0x166f   :  { %2243 = vmatpush1.msra.mxu1 %v7132_v63 }
0x1670   :  { %2244 = vmatprep.subr.mxu1 %v7138_v62 }
0x1671   :  { %2245 = vmatpush1.msra.mxu1 %v7144_v40 }
0x1672   :  { %2246 = vmatprep.subr.mxu1 %v7150_v43 }
0x1673   :  { %2247 = vmatpush1.msra.mxu1 %v7156_v9 }
0x1674   :  { %2526 = vmatprep.subr.mxu1 %v6993_v36 }
0x171c   :  { %v1987_v19 = vpop.f32.mrf.mxu1 }
0x171d   :  { %v1992_v17 = vadd.f32 %v1987_v19, %v7260_v35 }
0x171e   :  { %v1989_v18 = vpop.f32.mrf.mxu1 }
0x171f   :  { %v4773_v0 = vmul.f32 -1.442695, %v1992_v17  ;;  %v1993_v33 = vadd.f32 %v1989_v18, %v7264_v51  ;;  %v2029_v17 = vrot.slane %v7215_v26, 6 }
0x1721   :  { %5234 = vpow2.f32 %v4773_v0  ;;  %v4774_v22 = vmul.f32 -1.442695, %v1993_v33 }
0x1722   :  { %5236 = vtanh.f32 %v1993_v33  ;;  %v2008_v33 = vrot.slane %v7220_v16, 6 }
0x172e   :  { %v5235_v25 = vpop.eup %5234 }
0x172f   :  { %v5237_v13 = vpop.eup %5236  ;;  %v2000_v61 = vadd.f32 1.0, %v5235_v25 }
0x1730   :  { %2012 = vrot.lane.b32.xlu1 %v5237_v13, %s5437_s13 }
0x1731   :  { %5238 = vrcp.f32 %v2000_v61 }
0x1732   :  { %5240 = vpow2.f32 %v4774_v22 }
0x173e   :  { %v5239_v21 = vpop.eup %5238 }
0x173f   :  { %v2032_v28 = vmul.f32 %v5239_v21, %v5237_v13  ;;  %v5241_v8 = vpop.eup %5240  ;;  %v2010_v61 = vmul.f32 %v5239_v21, %v2008_v33 }
0x1740   :  { %v2001_v41 = vadd.f32 1.0, %v5241_v8 }
0x1741   :  { %2034 = vrot.lane.b32.xlu1 %v2032_v28, %s5438_s3 }
0x1742   :  { %5242 = vrcp.f32 %v2001_v41 }
0x174f   :  { %v5243_v19 = vpop.eup %5242 }
0x1750   :  { %v2031_v18 = vmul.f32 %v5243_v19, %v2029_v17 }
0x17a2   :  { %v2013_v14 = vpop.permute.xlu1 %2012 }
0x17a3   :  { %v2015_v11 = vmul.f32 %v5239_v21, %v2013_v14 }
0x17a5   :  { %2017 = vrot.lane.b32.xlu0 %v2015_v11, %s5438_s3 }
0x17b3   :  { %v2035_v0 = vpop.permute.xlu1 %2034 }
0x17b4   :  { %v7272_v25 = vadd.f32 %v2035_v0, %v2031_v18 }
0x17b6   :  { %5244 = vtanh.f32 %v7272_v25 }
0x17c3   :  { %v5245_v13 = vpop.eup %5244 }
0x17c4   :  { %2040 = vrot.lane.b32.xlu1 %v5245_v13, %s5438_s3 }
0x1817   :  { %v2018_v28 = vpop.permute.xlu0 %2017 }
0x1818   :  { %v7277_v22 = vadd.f32 %v2018_v28, %v2010_v61 }
0x181a   :  { %5246 = vtanh.f32 %v7277_v22 }
0x1827   :  { %v5247_v8 = vpop.eup %5246 }
0x1828   :  { %2023 = vrot.lane.b32.xlu0 %v5247_v8, %s5438_s3 }
0x1836   :  { %v2041_v14 = vpop.permute.xlu1 %2040 }
0x1837   :  { %v7282_v17 = vmul.f32 %v5243_v19, %v2041_v14 }
0x189a   :  { %v2024_v26 = vpop.permute.xlu0 %2023 }
0x189b   :  { %v2026_v41 = vmul.f32 %v5239_v21, %v2024_v26 }
0x189d   :  { %v2027_v11 = vmax.f32 %v2026_v41, 0.0  ;;  %2050 = vrot.lane.b32.xlu0 %v2026_v41, %s5437_s13 }
0x189f   :  { %2054 = vrot.lane.b32.xlu1 %v2027_v11, %s5439_s21 }
0x18a1   :  { %2057 = vrot.lane.b32.xlu0 %v7282_v17, %s5438_s3 }
0x190f   :  { %v2051_v16 = vpop.permute.xlu0 %2050 }
0x1911   :  { %v2055_v18 = vpop.permute.xlu1 %2054 }
0x1912   :  { %v2060_v0 = vsel %vm863_vm2, %v2051_v16, %v2055_v18 }
0x1913   :  { %v2058_v13 = vpop.permute.xlu0 %2057 }
0x1914   :  { %v2061_v33 = vsel %vm865_vm3, %v2060_v0, %v2058_v13 }
0x1915   :  { %4775 = vmatmul.mubr.msk.f32.vlgmr.msra.gmra.mxu0 %vm753_vm4, %v2061_v33 }
0x1916   :  { %2376 = vmatpush1.msra.mxu0 %v7023_v37  ;;  %2431 = vmatprep.mubr.f32.mxu0 %v8339_v45 }
0x1917   :  { %2377 = vmatprep.subr.mxu0 %v7030_v38 }
0x1918   :  { %2378 = vmatpush1.msra.mxu0 %v7036_v39 }
0x1919   :  { %2379 = vmatprep.subr.mxu0 %v7042_v44 }
0x191a   :  { %2380 = vmatpush1.msra.mxu0 %v7048_v46 }
0x191b   :  { %2381 = vmatprep.subr.mxu0 %v7054_v47 }
0x191c   :  { %2382 = vmatpush1.msra.mxu0 %v7060_v48 }
0x191d   :  { %2383 = vmatprep.subr.mxu0 %v7066_v42 }
0x191e   :  { %2384 = vmatpush1.msra.mxu0 %v7072_v49 }
0x191f   :  { %2385 = vmatprep.subr.mxu0 %v7078_v50 }
0x1920   :  { %2386 = vmatpush1.msra.mxu0 %v7084_v52 }
0x1921   :  { %2387 = vmatprep.subr.mxu0 %v7090_v53 }
0x1922   :  { %2388 = vmatpush1.msra.mxu0 %v7096_v54 }
0x1923   :  { %2389 = vmatprep.subr.mxu0 %v7102_v55 }
0x1924   :  { %2390 = vmatpush1.msra.mxu0 %v7108_v56 }
0x1925   :  { %2391 = vmatprep.subr.mxu0 %v7114_v57 }
0x1926   :  { %2392 = vmatpush1.msra.mxu0 %v7120_v58 }
0x1927   :  { %2393 = vmatprep.subr.mxu0 %v7126_v59 }
0x1928   :  { %2394 = vmatpush1.msra.mxu0 %v7132_v63 }
0x1929   :  { %2395 = vmatprep.subr.mxu0 %v7138_v62 }
0x192a   :  { %2396 = vmatpush1.msra.mxu0 %v7144_v40 }
0x192b   :  { %2397 = vmatprep.subr.mxu0 %v7150_v43 }
0x192c   :  { %2398 = vmatpush1.msra.mxu0 %v7156_v9 }
0x192d   :  { %2670 = vmatprep.subr.mxu0 %v6993_v36 }
0x19d5   :  { %v2131_v21 = vpop.f32.mrf.mxu0 }
0x19d6   :  { %v2138_v19 = vrot.slane %v2131_v21, 6 }
0x19d7   :  { %v2133_v61 = vpop.f32.mrf.mxu0 }
0x19d8   :  { %v2142_v28 = vadd.f32 %v2138_v19, %v7260_v35  ;;  %v2139_v8 = vrot.slane %v2133_v61, 6 }
0x19da   :  { %v4776_v26 = vmul.f32 -1.442695, %v2142_v28  ;;  %v2143_v41 = vadd.f32 %v2139_v8, %v7264_v51  ;;  %v2179_v8 = vrot.slane %v7272_v25, 6 }
0x19dc   :  { %5248 = vpow2.f32 %v4776_v26  ;;  %v4777_v13 = vmul.f32 -1.442695, %v2143_v41 }
0x19dd   :  { %5250 = vtanh.f32 %v2143_v41  ;;  %v2158_v41 = vrot.slane %v7277_v22, 6 }
0x19e9   :  { %v5249_v14 = vpop.eup %5248 }
0x19ea   :  { %v5251_v11 = vpop.eup %5250  ;;  %v2150_v16 = vadd.f32 1.0, %v5249_v14 }
0x19eb   :  { %2162 = vrot.lane.b32.xlu1 %v5251_v11, %s5437_s13 }
0x19ec   :  { %5252 = vrcp.f32 %v2150_v16 }
0x19ed   :  { %5254 = vpow2.f32 %v4777_v13 }
0x19f9   :  { %v5253_v18 = vpop.eup %5252 }
0x19fa   :  { %v2182_v0 = vmul.f32 %v5253_v18, %v5251_v11  ;;  %v5255_v33 = vpop.eup %5254  ;;  %v2160_v16 = vmul.f32 %v5253_v18, %v2158_v41 }
0x19fb   :  { %v2151_v21 = vadd.f32 1.0, %v5255_v33 }
0x19fc   :  { %2184 = vrot.lane.b32.xlu1 %v2182_v0, %s5438_s3 }
0x19fd   :  { %5256 = vrcp.f32 %v2151_v21 }
0x1a0a   :  { %v5257_v28 = vpop.eup %5256 }
0x1a0b   :  { %v2181_v26 = vmul.f32 %v5257_v28, %v2179_v8 }
0x1a5d   :  { %v2163_v19 = vpop.permute.xlu1 %2162 }
0x1a5e   :  { %v2165_v61 = vmul.f32 %v5253_v18, %v2163_v19 }
0x1a60   :  { %2167 = vrot.lane.b32.xlu0 %v2165_v61, %s5438_s3 }
0x1a6e   :  { %v2185_v14 = vpop.permute.xlu1 %2184 }
0x1a6f   :  { %v7321_v1 = vadd.f32 %v2185_v14, %v2181_v26 }
0x1a71   :  { %5258 = vtanh.f32 %v7321_v1 }
0x1a7e   :  { %v5259_v11 = vpop.eup %5258 }
0x1a7f   :  { %2190 = vrot.lane.b32.xlu1 %v5259_v11, %s5438_s3 }
0x1ad2   :  { %v2168_v0 = vpop.permute.xlu0 %2167 }
0x1ad3   :  { %v7326_v13 = vadd.f32 %v2168_v0, %v2160_v16 }
0x1ad5   :  { %5260 = vtanh.f32 %v7326_v13 }
0x1ae2   :  { %v5261_v33 = vpop.eup %5260 }
0x1ae3   :  { %2173 = vrot.lane.b32.xlu0 %v5261_v33, %s5438_s3 }
0x1af1   :  { %v2191_v19 = vpop.permute.xlu1 %2190 }
0x1af2   :  { %v7331_v8 = vmul.f32 %v5257_v28, %v2191_v19 }
0x1b55   :  { %v2174_v25 = vpop.permute.xlu0 %2173 }
0x1b56   :  { %v2176_v21 = vmul.f32 %v5253_v18, %v2174_v25 }
0x1b58   :  { %v2177_v61 = vmax.f32 %v2176_v21, 0.0  ;;  %2200 = vrot.lane.b32.xlu0 %v2176_v21, %s5437_s13 }
0x1b5a   :  { %2204 = vrot.lane.b32.xlu1 %v2177_v61, %s5439_s21 }
0x1b5c   :  { %2207 = vrot.lane.b32.xlu0 %v7331_v8, %s5438_s3 }
0x1bca   :  { %v2201_v22 = vpop.permute.xlu0 %2200 }
0x1bcc   :  { %v2205_v26 = vpop.permute.xlu1 %2204 }
0x1bcd   :  { %v2210_v14 = vsel %vm863_vm2, %v2201_v22, %v2205_v26 }
0x1bce   :  { %v2208_v11 = vpop.permute.xlu0 %2207 }
0x1bcf   :  { %v2211_v41 = vsel %vm865_vm3, %v2210_v14, %v2208_v11 }
0x1bd0   :  { %v2213_v16 = vrot.slane %v2211_v41, 2 }
0x1bd2   :  { %4778 = vmatmul.mubr.msk.f32.vlgmr.msra.gmra.mxu1 %vm753_vm4, %v2213_v16 }
0x1bd3   :  { %2527 = vmatpush1.msra.mxu1 %v7023_v37  ;;  %2582 = vmatprep.mubr.f32.mxu1 %v8339_v45 }
0x1bd4   :  { %2528 = vmatprep.subr.mxu1 %v7030_v38 }
0x1bd5   :  { %2529 = vmatpush1.msra.mxu1 %v7036_v39 }
0x1bd6   :  { %2530 = vmatprep.subr.mxu1 %v7042_v44 }
0x1bd7   :  { %2531 = vmatpush1.msra.mxu1 %v7048_v46 }
0x1bd8   :  { %2532 = vmatprep.subr.mxu1 %v7054_v47 }
0x1bd9   :  { %2533 = vmatpush1.msra.mxu1 %v7060_v48 }
0x1bda   :  { %2534 = vmatprep.subr.mxu1 %v7066_v42 }
0x1bdb   :  { %2535 = vmatpush1.msra.mxu1 %v7072_v49 }
0x1bdc   :  { %2536 = vmatprep.subr.mxu1 %v7078_v50 }
0x1bdd   :  { %2537 = vmatpush1.msra.mxu1 %v7084_v52 }
0x1bde   :  { %2538 = vmatprep.subr.mxu1 %v7090_v53 }
0x1bdf   :  { %2539 = vmatpush1.msra.mxu1 %v7096_v54 }
0x1be0   :  { %2540 = vmatprep.subr.mxu1 %v7102_v55 }
0x1be1   :  { %2541 = vmatpush1.msra.mxu1 %v7108_v56 }
0x1be2   :  { %2542 = vmatprep.subr.mxu1 %v7114_v57 }
0x1be3   :  { %2543 = vmatpush1.msra.mxu1 %v7120_v58 }
0x1be4   :  { %2544 = vmatprep.subr.mxu1 %v7126_v59 }
0x1be5   :  { %2545 = vmatpush1.msra.mxu1 %v7132_v63 }
0x1be6   :  { %2546 = vmatprep.subr.mxu1 %v7138_v62 }
0x1be7   :  { %2547 = vmatpush1.msra.mxu1 %v7144_v40 }
0x1be8   :  { %2548 = vmatprep.subr.mxu1 %v7150_v43 }
0x1be9   :  { %2549 = vmatpush1.msra.mxu1 %v7156_v9 }
0x1bea   :  { %2821 = vmatprep.subr.mxu1 %v6993_v36 }
0x1c92   :  { %v2282_v18 = vpop.f32.mrf.mxu1 }
0x1c93   :  { %v2289_v28 = vrot.slane %v2282_v18, 4 }
0x1c94   :  { %v2284_v0 = vpop.f32.mrf.mxu1 }
0x1c95   :  { %v2293_v33 = vadd.f32 %v2289_v28, %v7260_v35  ;;  %v2290_v25 = vrot.slane %v2284_v0, 4 }
0x1c97   :  { %v4779_v21 = vmul.f32 -1.442695, %v2293_v33  ;;  %v2294_v19 = vadd.f32 %v2290_v25, %v7264_v51  ;;  %v2330_v25 = vrot.slane %v7321_v1, 6 }
0x1c99   :  { %5262 = vpow2.f32 %v4779_v21  ;;  %v4780_v41 = vmul.f32 -1.442695, %v2294_v19 }
0x1c9a   :  { %5264 = vtanh.f32 %v2294_v19  ;;  %v2309_v19 = vrot.slane %v7326_v13, 6 }
0x1ca6   :  { %v5263_v61 = vpop.eup %5262 }
0x1ca7   :  { %v5265_v22 = vpop.eup %5264  ;;  %v2301_v26 = vadd.f32 1.0, %v5263_v61 }
0x1ca8   :  { %2313 = vrot.lane.b32.xlu1 %v5265_v22, %s5437_s13 }
0x1ca9   :  { %5266 = vrcp.f32 %v2301_v26 }
0x1caa   :  { %5268 = vpow2.f32 %v4780_v41 }
0x1cb6   :  { %v5267_v14 = vpop.eup %5266 }
0x1cb7   :  { %v2333_v11 = vmul.f32 %v5267_v14, %v5265_v22  ;;  %v5269_v16 = vpop.eup %5268  ;;  %v2311_v26 = vmul.f32 %v5267_v14, %v2309_v19 }
0x1cb8   :  { %v2302_v18 = vadd.f32 1.0, %v5269_v16 }
0x1cb9   :  { %2335 = vrot.lane.b32.xlu1 %v2333_v11, %s5438_s3 }
0x1cba   :  { %5270 = vrcp.f32 %v2302_v18 }
0x1cc7   :  { %v5271_v33 = vpop.eup %5270 }
0x1cc8   :  { %v2332_v21 = vmul.f32 %v5271_v33, %v2330_v25 }
0x1d1a   :  { %v2314_v28 = vpop.permute.xlu1 %2313 }
0x1d1b   :  { %v2316_v0 = vmul.f32 %v5267_v14, %v2314_v28 }
0x1d1d   :  { %2318 = vrot.lane.b32.xlu0 %v2316_v0, %s5438_s3 }
0x1d2b   :  { %v2336_v61 = vpop.permute.xlu1 %2335 }
0x1d2c   :  { %v7370_v2 = vadd.f32 %v2336_v61, %v2332_v21 }
0x1d2e   :  { %5272 = vtanh.f32 %v7370_v2 }
0x1d3b   :  { %v5273_v22 = vpop.eup %5272 }
0x1d3c   :  { %2341 = vrot.lane.b32.xlu1 %v5273_v22, %s5438_s3 }
0x1d8f   :  { %v2319_v11 = vpop.permute.xlu0 %2318 }
0x1d90   :  { %v7375_v41 = vadd.f32 %v2319_v11, %v2311_v26 }
0x1d92   :  { %5274 = vtanh.f32 %v7375_v41 }
0x1d9f   :  { %v5275_v16 = vpop.eup %5274 }
0x1da0   :  { %2324 = vrot.lane.b32.xlu0 %v5275_v16, %s5438_s3 }
0x1dae   :  { %v2342_v28 = vpop.permute.xlu1 %2341 }
0x1daf   :  { %v7380_v25 = vmul.f32 %v5271_v33, %v2342_v28 }
0x1e12   :  { %v2325_v1 = vpop.permute.xlu0 %2324 }
0x1e13   :  { %v2327_v18 = vmul.f32 %v5267_v14, %v2325_v1 }
0x1e15   :  { %v2328_v0 = vmax.f32 %v2327_v18, 0.0  ;;  %2351 = vrot.lane.b32.xlu0 %v2327_v18, %s5437_s13 }
0x1e17   :  { %2355 = vrot.lane.b32.xlu1 %v2328_v0, %s5439_s21 }
0x1e19   :  { %2358 = vrot.lane.b32.xlu0 %v7380_v25, %s5438_s3 }
0x1e87   :  { %v2352_v13 = vpop.permute.xlu0 %2351 }
0x1e89   :  { %v2356_v21 = vpop.permute.xlu1 %2355 }
0x1e8a   :  { %v2361_v61 = vsel %vm863_vm2, %v2352_v13, %v2356_v21 }
0x1e8b   :  { %v2359_v22 = vpop.permute.xlu0 %2358 }
0x1e8c   :  { %v2362_v19 = vsel %vm865_vm3, %v2361_v61, %v2359_v22 }
0x1e8d   :  { %v2364_v26 = vrot.slane %v2362_v19, 4 }
0x1e8f   :  { %4781 = vmatmul.mubr.msk.f32.vlgmr.msra.gmra.mxu0 %vm753_vm4, %v2364_v26 }
0x1e90   :  { %2671 = vmatpush1.msra.mxu0 %v7023_v37  ;;  %2726 = vmatprep.mubr.f32.mxu0 %v8339_v45 }
0x1e91   :  { %2672 = vmatprep.subr.mxu0 %v7030_v38 }
0x1e92   :  { %2673 = vmatpush1.msra.mxu0 %v7036_v39 }
0x1e93   :  { %2674 = vmatprep.subr.mxu0 %v7042_v44 }
0x1e94   :  { %2675 = vmatpush1.msra.mxu0 %v7048_v46 }
0x1e95   :  { %2676 = vmatprep.subr.mxu0 %v7054_v47 }
0x1e96   :  { %2677 = vmatpush1.msra.mxu0 %v7060_v48 }
0x1e97   :  { %2678 = vmatprep.subr.mxu0 %v7066_v42 }
0x1e98   :  { %2679 = vmatpush1.msra.mxu0 %v7072_v49 }
0x1e99   :  { %2680 = vmatprep.subr.mxu0 %v7078_v50 }
0x1e9a   :  { %2681 = vmatpush1.msra.mxu0 %v7084_v52 }
0x1e9b   :  { %2682 = vmatprep.subr.mxu0 %v7090_v53 }
0x1e9c   :  { %2683 = vmatpush1.msra.mxu0 %v7096_v54 }
0x1e9d   :  { %2684 = vmatprep.subr.mxu0 %v7102_v55 }
0x1e9e   :  { %2685 = vmatpush1.msra.mxu0 %v7108_v56 }
0x1e9f   :  { %2686 = vmatprep.subr.mxu0 %v7114_v57 }
0x1ea0   :  { %2687 = vmatpush1.msra.mxu0 %v7120_v58 }
0x1ea1   :  { %2688 = vmatprep.subr.mxu0 %v7126_v59 }
0x1ea2   :  { %2689 = vmatpush1.msra.mxu0 %v7132_v63 }
0x1ea3   :  { %2690 = vmatprep.subr.mxu0 %v7138_v62 }
0x1ea4   :  { %2691 = vmatpush1.msra.mxu0 %v7144_v40 }
0x1ea5   :  { %2692 = vmatprep.subr.mxu0 %v7150_v43 }
0x1ea6   :  { %2693 = vmatpush1.msra.mxu0 %v7156_v9 }
0x1ea7   :  { %2972 = vmatprep.subr.mxu0 %v6993_v36 }
0x1f4f   :  { %v2433_v14 = vpop.f32.mrf.mxu0 }
0x1f50   :  { %v2440_v33 = vrot.slane %v2433_v14, 2 }
0x1f51   :  { %v2435_v11 = vpop.f32.mrf.mxu0 }
0x1f52   :  { %v2444_v16 = vadd.f32 %v2440_v33, %v7260_v35  ;;  %v2441_v1 = vrot.slane %v2435_v11, 2  ;;  %v2481_v33 = vrot.slane %v7370_v2, 6 }
0x1f54   :  { %v4782_v18 = vmul.f32 -1.442695, %v2444_v16  ;;  %v2445_v28 = vadd.f32 %v2441_v1, %v7264_v51 }
0x1f56   :  { %5276 = vpow2.f32 %v4782_v18  ;;  %v4783_v36 = vmul.f32 -1.442695, %v2445_v28 }
0x1f57   :  { %5278 = vtanh.f32 %v2445_v28  ;;  %v2460_v28 = vrot.slane %v7375_v41, 6 }
0x1f63   :  { %v5277_v0 = vpop.eup %5276 }
0x1f64   :  { %v5279_v13 = vpop.eup %5278  ;;  %v2452_v21 = vadd.f32 1.0, %v5277_v0 }
0x1f65   :  { %2464 = vrot.lane.b32.xlu1 %v5279_v13, %s5437_s13 }
0x1f66   :  { %5280 = vrcp.f32 %v2452_v21 }
0x1f67   :  { %5282 = vpow2.f32 %v4783_v36 }
0x1f73   :  { %v5281_v61 = vpop.eup %5280 }
0x1f74   :  { %v2484_v22 = vmul.f32 %v5281_v61, %v5279_v13  ;;  %v5283_v19 = vpop.eup %5282  ;;  %v2462_v0 = vmul.f32 %v5281_v61, %v2460_v28 }
0x1f75   :  { %v2453_v35 = vadd.f32 1.0, %v5283_v19 }
0x1f76   :  { %2486 = vrot.lane.b32.xlu1 %v2484_v22, %s5438_s3 }
0x1f77   :  { %5284 = vrcp.f32 %v2453_v35 }
0x1f84   :  { %v5285_v51 = vpop.eup %5284 }
0x1f85   :  { %v2483_v11 = vmul.f32 %v5285_v51, %v2481_v33 }
0x1fd7   :  { %v2465_v26 = vpop.permute.xlu1 %2464 }
0x1fd8   :  { %v2467_v14 = vmul.f32 %v5281_v61, %v2465_v26 }
0x1fda   :  { %2469 = vrot.lane.b32.xlu0 %v2467_v14, %s5438_s3 }
0x1fe8   :  { %v2487_v16 = vpop.permute.xlu1 %2486 }
0x1fe9   :  { %v7419_v1 = vadd.f32 %v2487_v16, %v2483_v11 }
0x1feb   :  { %5286 = vtanh.f32 %v7419_v1 }
0x1ff8   :  { %v5287_v18 = vpop.eup %5286 }
0x1ff9   :  { %2492 = vrot.lane.b32.xlu1 %v5287_v18, %s5438_s3 }
0x204c   :  { %v2470_v13 = vpop.permute.xlu0 %2469 }
0x204d   :  { %v7424_v21 = vadd.f32 %v2470_v13, %v2462_v0 }
0x204f   :  { %5288 = vtanh.f32 %v7424_v21 }
0x205c   :  { %v5289_v22 = vpop.eup %5288 }
0x205d   :  { %2475 = vrot.lane.b32.xlu0 %v5289_v22, %s5438_s3 }
0x206b   :  { %v2493_v19 = vpop.permute.xlu1 %2492 }
0x206c   :  { %v7429_v26 = vmul.f32 %v5285_v51, %v2493_v19 }
0x20cf   :  { %v2476_v2 = vpop.permute.xlu0 %2475 }
0x20d0   :  { %v2478_v36 = vmul.f32 %v5281_v61, %v2476_v2 }
0x20d2   :  { %v2479_v35 = vmax.f32 %v2478_v36, 0.0  ;;  %2502 = vrot.lane.b32.xlu0 %v2478_v36, %s5437_s13 }
0x20d4   :  { %2506 = vrot.lane.b32.xlu1 %v2479_v35, %s5439_s21 }
0x20d6   :  { %2509 = vrot.lane.b32.xlu0 %v7429_v26, %s5438_s3 }
0x2144   :  { %v2503_v41 = vpop.permute.xlu0 %2502 }
0x2146   :  { %v2507_v14 = vpop.permute.xlu1 %2506 }
0x2147   :  { %v2512_v33 = vsel %vm863_vm2, %v2503_v41, %v2507_v14 }
0x2148   :  { %v2510_v11 = vpop.permute.xlu0 %2509 }
0x2149   :  { %v2513_v16 = vsel %vm865_vm3, %v2512_v33, %v2510_v11  ;;  %v7499_v33 = vld [vmem:[%s8100_s2 + $0xb0] sm:$0xff]  ;;  %v7506_v11 = vld [vmem:[%s8100_s2 + $0xa8] sm:$0xff] }
0x214a   :  { %v2515_v18 = vrot.slane %v2513_v16, 6  ;;  %v7512_v16 = vld [vmem:[%s8100_s2 + $0xa0] sm:$0xff] }
0x214c   :  { %4784 = vmatmul.mubr.msk.f32.vlgmr.msra.gmra.mxu1 %vm753_vm4, %v2515_v18  ;;  %v7518_v18 = vld [vmem:[%s8100_s2 + $0x98] sm:$0xff] }
0x214d   :  { %2822 = vmatpush1.msra.mxu1 %v7023_v37  ;;  %2877 = vmatprep.mubr.f32.mxu1 %v8339_v45  ;;  %v5382_v37 = vld [vmem:[%s8100_s2 + $0xb8] sm:$0xff] }
0x214e   :  { %2823 = vmatprep.subr.mxu1 %v7030_v38  ;;  %v7466_v38 = vadd.f32 %v6780_v32, %v6711_v20 }
0x214f   :  { %2824 = vmatpush1.msra.mxu1 %v7036_v39 }
0x2150   :  { %2825 = vmatprep.subr.mxu1 %v7042_v44  ;;  %v7470_v44 = vadd.f32 %v6782_v60, %v6701_v30 }
0x2151   :  { %2826 = vmatpush1.msra.mxu1 %v7048_v46 }
0x2152   :  { %2827 = vmatprep.subr.mxu1 %v7054_v47 }
0x2153   :  { %2828 = vmatpush1.msra.mxu1 %v7060_v48 }
0x2154   :  { %2829 = vmatprep.subr.mxu1 %v7066_v42 }
0x2155   :  { %2830 = vmatpush1.msra.mxu1 %v7072_v49 }
0x2156   :  { %2831 = vmatprep.subr.mxu1 %v7078_v50 }
0x2157   :  { %2832 = vmatpush1.msra.mxu1 %v7084_v52 }
0x2158   :  { %2833 = vmatprep.subr.mxu1 %v7090_v53 }
0x2159   :  { %2834 = vmatpush1.msra.mxu1 %v7096_v54 }
0x215a   :  { %2835 = vmatprep.subr.mxu1 %v7102_v55 }
0x215b   :  { %2836 = vmatpush1.msra.mxu1 %v7108_v56 }
0x215c   :  { %2837 = vmatprep.subr.mxu1 %v7114_v57 }
0x215d   :  { %2838 = vmatpush1.msra.mxu1 %v7120_v58 }
0x215e   :  { %2839 = vmatprep.subr.mxu1 %v7126_v59  ;;  %v2626_v59 = vrot.slane %v7419_v1, 6 }
0x215f   :  { %2840 = vmatpush1.msra.mxu1 %v7132_v63 }
0x2160   :  { %2841 = vmatprep.subr.mxu1 %v7138_v62 }
0x2161   :  { %2842 = vmatpush1.msra.mxu1 %v7144_v40 }
0x2162   :  { %2843 = vmatprep.subr.mxu1 %v7150_v43 }
0x2163   :  { %2844 = vmatpush1.msra.mxu1 %v7156_v9  ;;  %v2605_v9 = vrot.slane %v7424_v21, 6 }
0x2164   :  { %3123 = vmatprep.subr.mxu1 %v5382_v37  ;;  %v7524_v37 = vld [vmem:[%s8100_s2 + $0x90] sm:$0xff] }
0x220c   :  { %v2584_v39 = vpop.f32.mrf.mxu1 }
0x220d   :  { %v2589_v46 = vadd.f32 %v2584_v39, %v7466_v38  ;;  %v7530_v39 = vld [vmem:[%s8100_s2 + $0x88] sm:$0xff] }
0x220e   :  { %v2586_v47 = vpop.f32.mrf.mxu1 }
0x220f   :  { %v4785_v48 = vmul.f32 -1.442695, %v2589_v46  ;;  %v2590_v42 = vadd.f32 %v2586_v47, %v7470_v44  ;;  %v7536_v46 = vld [vmem:[%s8100_s2 + $0x80] sm:$0xff]  ;;  %v7542_v47 = vld [vmem:[%s8100_s2 + $0x78] sm:$0xff] }
0x2211   :  { %5290 = vpow2.f32 %v4785_v48  ;;  %v4786_v60 = vmul.f32 -1.442695, %v2590_v42  ;;  %v7548_v48 = vld [vmem:[%s8100_s2 + $0x70] sm:$0xff] }
0x2212   :  { %5292 = vtanh.f32 %v2590_v42  ;;  %v7554_v42 = vld [vmem:[%s8100_s2 + $0x68] sm:$0xff] }
0x221e   :  { %v5291_v49 = vpop.eup %5290 }
0x221f   :  { %v5293_v50 = vpop.eup %5292  ;;  %v2597_v52 = vadd.f32 1.0, %v5291_v49  ;;  %v7560_v49 = vld [vmem:[%s8100_s2 + $0x60] sm:$0xff] }
0x2220   :  { %2609 = vrot.lane.b32.xlu1 %v5293_v50, %s5437_s13 }
0x2221   :  { %5294 = vrcp.f32 %v2597_v52  ;;  %v7572_v52 = vld [vmem:[%s8100_s2 + $0x50] sm:$0xff] }
0x2222   :  { %5296 = vpow2.f32 %v4786_v60  ;;  %v7590_v60 = vld [vmem:[%s8100_s2 + $0x38] sm:$0xff] }
0x222e   :  { %v5295_v32 = vpop.eup %5294 }
0x222f   :  { %v2629_v53 = vmul.f32 %v5295_v32, %v5293_v50  ;;  %v5297_v54 = vpop.eup %5296  ;;  %v2607_v61 = vmul.f32 %v5295_v32, %v2605_v9  ;;  %v7566_v50 = vld [vmem:[%s8100_s2 + $0x58] sm:$0xff] }
0x2230   :  { %v2598_v55 = vadd.f32 1.0, %v5297_v54  ;;  %v7596_v54 = vld [vmem:[%s8100_s2 + $0x30] sm:$0xff] }
0x2231   :  { %2631 = vrot.lane.b32.xlu1 %v2629_v53, %s5438_s3  ;;  %v7584_v53 = vld [vmem:[%s8100_s2 + $0x40] sm:$0xff] }
0x2232   :  { %5298 = vrcp.f32 %v2598_v55  ;;  %v7602_v55 = vld [vmem:[%s8100_s2 + $0x28] sm:$0xff] }
0x223f   :  { %v5299_v58 = vpop.eup %5298 }
0x2240   :  { %v2628_v63 = vmul.f32 %v5299_v58, %v2626_v59  ;;  %v7626_v59 = vld [vmem:[%s8100_s2 + $0x8] sm:$0xff] }
0x2292   :  { %v2610_v56 = vpop.permute.xlu1 %2609 }
0x2293   :  { %v2612_v57 = vmul.f32 %v5295_v32, %v2610_v56  ;;  %v7608_v56 = vld [vmem:[%s8100_s2 + $0x20] sm:$0xff] }
0x2295   :  { %2614 = vrot.lane.b32.xlu0 %v2612_v57, %s5438_s3  ;;  %v7614_v57 = vld [vmem:[%s8100_s2 + $0x18] sm:$0xff] }
0x22a3   :  { %v2632_v62 = vpop.permute.xlu1 %2631 }
0x22a4   :  { %v7478_v40 = vadd.f32 %v2632_v62, %v2628_v63  ;;  %v7632_v63 = vld [vmem:[%s8100_s2] sm:$0xff] }
0x22a6   :  { %5300 = vtanh.f32 %v7478_v40 }
0x22b3   :  { %v5301_v43 = vpop.eup %5300 }
0x22b4   :  { %2637 = vrot.lane.b32.xlu1 %v5301_v43, %s5438_s3 }
0x2307   :  { %v2615_v51 = vpop.permute.xlu0 %2614 }
0x2308   :  { %v7483_v28 = vadd.f32 %v2615_v51, %v2607_v61 }
0x230a   :  { %5302 = vtanh.f32 %v7483_v28 }
0x2317   :  { %v5303_v0 = vpop.eup %5302 }
0x2318   :  { %2620 = vrot.lane.b32.xlu0 %v5303_v0, %s5438_s3 }
0x2326   :  { %v2638_v22 = vpop.permute.xlu1 %2637 }
0x2327   :  { %v7488_v36 = vmul.f32 %v5299_v58, %v2638_v22  ;;  %v7620_v58 = vld [vmem:[%s8100_s2 + $0x10] sm:$0xff] }
0x238a   :  { %v2621_v1 = vpop.permute.xlu0 %2620 }
0x238b   :  { %v2623_v13 = vmul.f32 %v5295_v32, %v2621_v1  ;;  %v7578_v32 = vld [vmem:[%s8100_s2 + $0x48] sm:$0xff] }
0x238d   :  { %v2624_v2 = vmax.f32 %v2623_v13, 0.0  ;;  %2647 = vrot.lane.b32.xlu0 %v2623_v13, %s5437_s13 }
0x238f   :  { %2651 = vrot.lane.b32.xlu1 %v2624_v2, %s5439_s21 }
0x2391   :  { %2654 = vrot.lane.b32.xlu0 %v7488_v36, %s5438_s3 }
0x23ff   :  { %v2648_v21 = vpop.permute.xlu0 %2647 }
0x2401   :  { %v2652_v19 = vpop.permute.xlu1 %2651 }
0x2402   :  { %v2657_v35 = vsel %vm863_vm2, %v2648_v21, %v2652_v19 }
0x2403   :  { %v2655_v41 = vpop.permute.xlu0 %2654 }
0x2404   :  { %v2658_v14 = vsel %vm865_vm3, %v2657_v35, %v2655_v41 }
0x2405   :  { %4787 = vmatmul.mubr.msk.f32.vlgmr.msra.gmra.mxu0 %vm753_vm4, %v2658_v14 }
0x2406   :  { %2973 = vmatpush1.msra.mxu0 %v7499_v33  ;;  %3028 = vmatprep.mubr.f32.mxu0 %v8339_v45 }
0x2407   :  { %2974 = vmatprep.subr.mxu0 %v7506_v11 }
0x2408   :  { %2975 = vmatpush1.msra.mxu0 %v7512_v16 }
0x2409   :  { %2976 = vmatprep.subr.mxu0 %v7518_v18 }
0x240a   :  { %2977 = vmatpush1.msra.mxu0 %v7524_v37 }
0x240b   :  { %2978 = vmatprep.subr.mxu0 %v7530_v39 }
0x240c   :  { %2979 = vmatpush1.msra.mxu0 %v7536_v46 }
0x240d   :  { %2980 = vmatprep.subr.mxu0 %v7542_v47 }
0x240e   :  { %2981 = vmatpush1.msra.mxu0 %v7548_v48 }
0x240f   :  { %2982 = vmatprep.subr.mxu0 %v7554_v42 }
0x2410   :  { %2983 = vmatpush1.msra.mxu0 %v7560_v49 }
0x2411   :  { %2984 = vmatprep.subr.mxu0 %v7566_v50 }
0x2412   :  { %2985 = vmatpush1.msra.mxu0 %v7572_v52 }
0x2413   :  { %2986 = vmatprep.subr.mxu0 %v7578_v32 }
0x2414   :  { %2987 = vmatpush1.msra.mxu0 %v7584_v53 }
0x2415   :  { %2988 = vmatprep.subr.mxu0 %v7590_v60 }
0x2416   :  { %2989 = vmatpush1.msra.mxu0 %v7596_v54 }
0x2417   :  { %2990 = vmatprep.subr.mxu0 %v7602_v55 }
0x2418   :  { %2991 = vmatpush1.msra.mxu0 %v7608_v56 }
0x2419   :  { %2992 = vmatprep.subr.mxu0 %v7614_v57 }
0x241a   :  { %2993 = vmatpush1.msra.mxu0 %v7620_v58 }
0x241b   :  { %2994 = vmatprep.subr.mxu0 %v7626_v59 }
0x241c   :  { %2995 = vmatpush1.msra.mxu0 %v7632_v63 }
0x24c5   :  { %v2728_v62 = vpop.f32.mrf.mxu0 }
0x24c6   :  { %v2735_v43 = vrot.slane %v2728_v62, 6 }
0x24c7   :  { %v2730_v9 = vpop.f32.mrf.mxu0 }
0x24c8   :  { %v2739_v61 = vadd.f32 %v2735_v43, %v7466_v38  ;;  %v2736_v51 = vrot.slane %v2730_v9, 6 }
0x24ca   :  { %v4788_v0 = vmul.f32 -1.442695, %v2739_v61  ;;  %v2740_v1 = vadd.f32 %v2736_v51, %v7470_v44  ;;  %v2776_v61 = vrot.slane %v7478_v40, 6 }
0x24cc   :  { %5304 = vpow2.f32 %v4788_v0  ;;  %v4789_v35 = vmul.f32 -1.442695, %v2740_v1 }
0x24cd   :  { %5306 = vtanh.f32 %v2740_v1  ;;  %v2755_v1 = vrot.slane %v7483_v28, 6 }
0x24d9   :  { %v5305_v13 = vpop.eup %5304 }
0x24da   :  { %v5307_v22 = vpop.eup %5306  ;;  %v2747_v2 = vadd.f32 1.0, %v5305_v13 }
0x24db   :  { %2759 = vrot.lane.b32.xlu1 %v5307_v22, %s5437_s13 }
0x24dc   :  { %5308 = vrcp.f32 %v2747_v2 }
0x24dd   :  { %5310 = vpow2.f32 %v4789_v35 }
0x24e9   :  { %v5309_v21 = vpop.eup %5308 }
0x24ea   :  { %v2779_v19 = vmul.f32 %v5309_v21, %v5307_v22  ;;  %v5311_v41 = vpop.eup %5310  ;;  %v2757_v2 = vmul.f32 %v5309_v21, %v2755_v1 }
0x24eb   :  { %v2748_v14 = vadd.f32 1.0, %v5311_v41 }
0x24ec   :  { %2781 = vrot.lane.b32.xlu1 %v2779_v19, %s5438_s3 }
0x24ed   :  { %5312 = vrcp.f32 %v2748_v14 }
0x24fa   :  { %v5313_v9 = vpop.eup %5312 }
0x24fb   :  { %v2778_v51 = vmul.f32 %v5313_v9, %v2776_v61 }
0x254d   :  { %v2760_v62 = vpop.permute.xlu1 %2759 }
0x254e   :  { %v2762_v43 = vmul.f32 %v5309_v21, %v2760_v62 }
0x2550   :  { %2764 = vrot.lane.b32.xlu0 %v2762_v43, %s5438_s3 }
0x255e   :  { %v2782_v0 = vpop.permute.xlu1 %2781 }
0x255f   :  { %v7641_v13 = vadd.f32 %v2782_v0, %v2778_v51 }
0x2561   :  { %5314 = vtanh.f32 %v7641_v13 }
0x256e   :  { %v5315_v22 = vpop.eup %5314 }
0x256f   :  { %2787 = vrot.lane.b32.xlu1 %v5315_v22, %s5438_s3 }
0x25c2   :  { %v2765_v19 = vpop.permute.xlu0 %2764 }
0x25c3   :  { %v7646_v35 = vadd.f32 %v2765_v19, %v2757_v2 }
0x25c5   :  { %5316 = vtanh.f32 %v7646_v35 }
0x25d2   :  { %v5317_v41 = vpop.eup %5316 }
0x25d3   :  { %2770 = vrot.lane.b32.xlu0 %v5317_v41, %s5438_s3 }
0x25e1   :  { %v2788_v62 = vpop.permute.xlu1 %2787 }
0x25e2   :  { %v7651_v61 = vmul.f32 %v5313_v9, %v2788_v62 }
0x2645   :  { %v2771_v40 = vpop.permute.xlu0 %2770 }
0x2646   :  { %v2773_v14 = vmul.f32 %v5309_v21, %v2771_v40  ;;  %v2906_v21 = vrot.slane %v7646_v35, 6 }
0x2648   :  { %v2774_v43 = vmax.f32 %v2773_v14, 0.0  ;;  %2797 = vrot.lane.b32.xlu0 %v2773_v14, %s5437_s13 }
0x264a   :  { %2801 = vrot.lane.b32.xlu1 %v2774_v43, %s5439_s21 }
0x264c   :  { %2804 = vrot.lane.b32.xlu0 %v7651_v61, %s5438_s3 }
0x26ba   :  { %v2798_v28 = vpop.permute.xlu0 %2797 }
0x26bc   :  { %v2802_v51 = vpop.permute.xlu1 %2801 }
0x26bd   :  { %v2807_v0 = vsel %vm863_vm2, %v2798_v28, %v2802_v51 }
0x26be   :  { %v2805_v22 = vpop.permute.xlu0 %2804 }
0x26bf   :  { %v2808_v1 = vsel %vm865_vm3, %v2807_v0, %v2805_v22 }
0x26c0   :  { %v2810_v2 = vrot.slane %v2808_v1, 2 }
0x26c2   :  { %4790 = vmatmul.mubr.msk.f32.vlgmr.msra.gmra.mxu1 %vm753_vm4, %v2810_v2 }
0x26c3   :  { %3124 = vmatpush1.msra.mxu1 %v7499_v33  ;;  %3179 = vmatprep.mubr.f32.mxu1 %v8339_v45 }
0x26c4   :  { %3125 = vmatprep.subr.mxu1 %v7506_v11 }
0x26c5   :  { %3126 = vmatpush1.msra.mxu1 %v7512_v16 }
0x26c6   :  { %3127 = vmatprep.subr.mxu1 %v7518_v18 }
0x26c7   :  { %3128 = vmatpush1.msra.mxu1 %v7524_v37 }
0x26c8   :  { %3129 = vmatprep.subr.mxu1 %v7530_v39 }
0x26c9   :  { %3130 = vmatpush1.msra.mxu1 %v7536_v46 }
0x26ca   :  { %3131 = vmatprep.subr.mxu1 %v7542_v47 }
0x26cb   :  { %3132 = vmatpush1.msra.mxu1 %v7548_v48 }
0x26cc   :  { %3133 = vmatprep.subr.mxu1 %v7554_v42 }
0x26cd   :  { %3134 = vmatpush1.msra.mxu1 %v7560_v49 }
0x26ce   :  { %3135 = vmatprep.subr.mxu1 %v7566_v50 }
0x26cf   :  { %3136 = vmatpush1.msra.mxu1 %v7572_v52 }
0x26d0   :  { %3137 = vmatprep.subr.mxu1 %v7578_v32 }
0x26d1   :  { %3138 = vmatpush1.msra.mxu1 %v7584_v53 }
0x26d2   :  { %3139 = vmatprep.subr.mxu1 %v7590_v60 }
0x26d3   :  { %3140 = vmatpush1.msra.mxu1 %v7596_v54 }
0x26d4   :  { %3141 = vmatprep.subr.mxu1 %v7602_v55 }
0x26d5   :  { %3142 = vmatpush1.msra.mxu1 %v7608_v56  ;;  %v2927_v56 = vrot.slane %v7641_v13, 6 }
0x26d6   :  { %3143 = vmatprep.subr.mxu1 %v7614_v57 }
0x26d7   :  { %3144 = vmatpush1.msra.mxu1 %v7620_v58 }
0x26d8   :  { %3145 = vmatprep.subr.mxu1 %v7626_v59 }
0x26d9   :  { %3146 = vmatpush1.msra.mxu1 %v7632_v63 }
0x2782   :  { %v2879_v33 = vpop.f32.mrf.mxu1 }
0x2783   :  { %v2886_v11 = vrot.slane %v2879_v33, 4 }
0x2784   :  { %v2881_v16 = vpop.f32.mrf.mxu1 }
0x2785   :  { %v2890_v18 = vadd.f32 %v2886_v11, %v7466_v38  ;;  %v2887_v37 = vrot.slane %v2881_v16, 4 }
0x2787   :  { %v4791_v39 = vmul.f32 -1.442695, %v2890_v18  ;;  %v2891_v46 = vadd.f32 %v2887_v37, %v7470_v44 }
0x2789   :  { %5318 = vpow2.f32 %v4791_v39  ;;  %v4792_v52 = vmul.f32 -1.442695, %v2891_v46 }
0x278a   :  { %5320 = vtanh.f32 %v2891_v46 }
0x2796   :  { %v5319_v47 = vpop.eup %5318 }
0x2797   :  { %v5321_v48 = vpop.eup %5320  ;;  %v2898_v42 = vadd.f32 1.0, %v5319_v47 }
0x2798   :  { %2910 = vrot.lane.b32.xlu1 %v5321_v48, %s5437_s13 }
0x2799   :  { %5322 = vrcp.f32 %v2898_v42 }
0x279a   :  { %5324 = vpow2.f32 %v4792_v52 }
0x27a6   :  { %v5323_v49 = vpop.eup %5322 }
0x27a7   :  { %v2930_v50 = vmul.f32 %v5323_v49, %v5321_v48  ;;  %v5325_v32 = vpop.eup %5324  ;;  %v2908_v9 = vmul.f32 %v5323_v49, %v2906_v21 }
0x27a8   :  { %v2899_v53 = vadd.f32 1.0, %v5325_v32 }
0x27a9   :  { %2932 = vrot.lane.b32.xlu1 %v2930_v50, %s5438_s3 }
0x27aa   :  { %5326 = vrcp.f32 %v2899_v53 }
0x27b7   :  { %v5327_v55 = vpop.eup %5326 }
0x27b8   :  { %v2929_v57 = vmul.f32 %v5327_v55, %v2927_v56 }
0x280a   :  { %v2911_v60 = vpop.permute.xlu1 %2910 }
0x280b   :  { %v2913_v54 = vmul.f32 %v5323_v49, %v2911_v60 }
0x280d   :  { %2915 = vrot.lane.b32.xlu0 %v2913_v54, %s5438_s3 }
0x281b   :  { %v2933_v58 = vpop.permute.xlu1 %2932 }
0x281c   :  { %v2935_v59 = vadd.f32 %v2933_v58, %v2929_v57 }
0x281e   :  { %5328 = vtanh.f32 %v2935_v59  ;;  %v3078_v54 = vrot.slane %v2935_v59, 6 }
0x282b   :  { %v5329_v63 = vpop.eup %5328 }
0x282c   :  { %2938 = vrot.lane.b32.xlu1 %v5329_v63, %s5438_s3 }
0x287f   :  { %v2916_v19 = vpop.permute.xlu0 %2915 }
0x2880   :  { %v2918_v41 = vadd.f32 %v2916_v19, %v2908_v9 }
0x2882   :  { %5330 = vtanh.f32 %v2918_v41  ;;  %v3057_v63 = vrot.slane %v2918_v41, 6 }
0x288f   :  { %v5331_v40 = vpop.eup %5330 }
0x2890   :  { %2921 = vrot.lane.b32.xlu0 %v5331_v40, %s5438_s3 }
0x289e   :  { %v2939_v43 = vpop.permute.xlu1 %2938 }
0x289f   :  { %v7693_v28 = vmul.f32 %v5327_v55, %v2939_v43 }
0x2902   :  { %v2922_v14 = vpop.permute.xlu0 %2921 }
0x2903   :  { %v2924_v62 = vmul.f32 %v5323_v49, %v2922_v14 }
0x2905   :  { %v2925_v13 = vmax.f32 %v2924_v62, 0.0  ;;  %2948 = vrot.lane.b32.xlu0 %v2924_v62, %s5437_s13 }
0x2907   :  { %2952 = vrot.lane.b32.xlu1 %v2925_v13, %s5439_s21 }
0x2909   :  { %2955 = vrot.lane.b32.xlu0 %v7693_v28, %s5438_s3 }
0x2977   :  { %v2949_v35 = vpop.permute.xlu0 %2948 }
0x2979   :  { %v2953_v51 = vpop.permute.xlu1 %2952 }
0x297a   :  { %v2958_v0 = vsel %vm863_vm2, %v2949_v35, %v2953_v51 }
0x297b   :  { %v2956_v22 = vpop.permute.xlu0 %2955 }
0x297c   :  { %v2959_v1 = vsel %vm865_vm3, %v2958_v0, %v2956_v22 }
0x297d   :  { %v2961_v2 = vrot.slane %v2959_v1, 4 }
0x297f   :  { %4793 = vmatmul.mubr.msk.f32.vlgmr.msra.gmra.mxu0 %vm753_vm4, %v2961_v2  ;;  %v725_v2 = vadd.f32 %v6784_v31, %v6711_v20 }
0x2a3f   :  { %v3030_v33 = vpop.f32.mrf.mxu0 }
0x2a40   :  { %v3037_v11 = vrot.slane %v3030_v33, 2 }
0x2a41   :  { %v3032_v16 = vpop.f32.mrf.mxu0 }
0x2a42   :  { %v3041_v18 = vadd.f32 %v3037_v11, %v7466_v38  ;;  %v3038_v37 = vrot.slane %v3032_v16, 2 }
0x2a44   :  { %v4794_v39 = vmul.f32 -1.442695, %v3041_v18  ;;  %v3042_v46 = vadd.f32 %v3038_v37, %v7470_v44  ;;  %v727_v37 = vadd.f32 %v6786_v34, %v6701_v30 }
0x2a46   :  { %5332 = vpow2.f32 %v4794_v39  ;;  %v4795_v52 = vmul.f32 -1.442695, %v3042_v46 }
0x2a47   :  { %5334 = vtanh.f32 %v3042_v46 }
0x2a53   :  { %v5333_v47 = vpop.eup %5332 }
0x2a54   :  { %v5335_v48 = vpop.eup %5334  ;;  %v3049_v42 = vadd.f32 1.0, %v5333_v47 }
0x2a55   :  { %3061 = vrot.lane.b32.xlu1 %v5335_v48, %s5437_s13 }
0x2a56   :  { %5336 = vrcp.f32 %v3049_v42 }
0x2a57   :  { %5338 = vpow2.f32 %v4795_v52 }
0x2a63   :  { %v5337_v49 = vpop.eup %5336 }
0x2a64   :  { %v3081_v50 = vmul.f32 %v5337_v49, %v5335_v48  ;;  %v5339_v32 = vpop.eup %5338  ;;  %v3059_v21 = vmul.f32 %v5337_v49, %v3057_v63 }
0x2a65   :  { %v3050_v38 = vadd.f32 1.0, %v5339_v32 }
0x2a66   :  { %3083 = vrot.lane.b32.xlu1 %v3081_v50, %s5438_s3 }
0x2a67   :  { %5340 = vrcp.f32 %v3050_v38 }
0x2a74   :  { %v5341_v44 = vpop.eup %5340 }
0x2a75   :  { %v3080_v55 = vmul.f32 %v5341_v44, %v3078_v54 }
0x2ac7   :  { %v3062_v53 = vpop.permute.xlu1 %3061 }
0x2ac8   :  { %v3064_v60 = vmul.f32 %v5337_v49, %v3062_v53 }
0x2aca   :  { %3066 = vrot.lane.b32.xlu0 %v3064_v60, %s5438_s3 }
0x2ad8   :  { %v3084_v56 = vpop.permute.xlu1 %3083 }
0x2ad9   :  { %v3086_v57 = vadd.f32 %v3084_v56, %v3080_v55 }
0x2adb   :  { %5342 = vtanh.f32 %v3086_v57 }
0x2ae8   :  { %v5343_v58 = vpop.eup %5342 }
0x2ae9   :  { %3089 = vrot.lane.b32.xlu1 %v5343_v58, %s5438_s3 }
0x2b3c   :  { %v3067_v9 = vpop.permute.xlu0 %3066 }
0x2b3d   :  { %v3069_v19 = vadd.f32 %v3067_v9, %v3059_v21 }
0x2b3f   :  { %5344 = vtanh.f32 %v3069_v19 }
0x2b4c   :  { %v5345_v40 = vpop.eup %5344 }
0x2b4d   :  { %3072 = vrot.lane.b32.xlu0 %v5345_v40, %s5438_s3 }
0x2b5b   :  { %v3090_v43 = vpop.permute.xlu1 %3089 }
0x2b5c   :  { %v3092_v59 = vmul.f32 %v5341_v44, %v3090_v43 }
0x2bbf   :  { %v3073_v14 = vpop.permute.xlu0 %3072 }
0x2bc0   :  { %v3075_v62 = vmul.f32 %v5337_v49, %v3073_v14 }
0x2bc2   :  { %v3076_v13 = vmax.f32 %v3075_v62, 0.0  ;;  %3099 = vrot.lane.b32.xlu0 %v3075_v62, %s5437_s13 }
0x2bc4   :  { %3103 = vrot.lane.b32.xlu1 %v3076_v13, %s5439_s21 }
0x2bc6   :  { %3106 = vrot.lane.b32.xlu0 %v3092_v59, %s5438_s3 }
0x2c34   :  { %v3100_v35 = vpop.permute.xlu0 %3099 }
0x2c36   :  { %v3104_v41 = vpop.permute.xlu1 %3103 }
0x2c37   :  { %v3109_v51 = vsel %vm863_vm2, %v3100_v35, %v3104_v41 }
0x2c38   :  { %v3107_v0 = vpop.permute.xlu0 %3106 }
0x2c39   :  { %v3110_v22 = vsel %vm865_vm3, %v3109_v51, %v3107_v0 }
0x2c3a   :  { %v3112_v1 = vrot.slane %v3110_v22, 6 }
0x2c3c   :  { %4796 = vmatmul.mubr.msk.f32.vlgmr.msra.gmra.mxu1 %vm753_vm4, %v3112_v1 }
0x2cfc   :  { %v3181_v33 = vpop.f32.mrf.mxu1 }
0x2cfd   :  { %v3186_v11 = vadd.f32 %v3181_v33, %v725_v2 }
0x2cfe   :  { %v3183_v18 = vpop.f32.mrf.mxu1 }
0x2cff   :  { %v4797_v16 = vmul.f32 -1.442695, %v3186_v11  ;;  %v3187_v39 = vadd.f32 %v3183_v18, %v727_v37 }
0x2d01   :  { %5346 = vpow2.f32 %v4797_v16  ;;  %v4798_v20 = vmul.f32 -1.442695, %v3187_v39 }
0x2d02   :  { %5348 = vtanh.f32 %v3187_v39 }
0x2d0e   :  { %v5347_v46 = vpop.eup %5346 }
0x2d0f   :  { %v3194_v47 = vadd.f32 1.0, %v5347_v46  ;;  %v5349_v48 = vpop.eup %5348 }
0x2d11   :  { %5350 = vrcp.f32 %v3194_v47 }
0x2d12   :  { %5352 = vpow2.f32 %v4798_v20 }
0x2d1e   :  { %v5351_v42 = vpop.eup %5350 }
0x2d1f   :  { %v3205_v49 = vmul.f32 %v5351_v42, %v5349_v48  ;;  %v5353_v30 = vpop.eup %5352 }
0x2d20   :  { %v3195_v31 = vadd.f32 1.0, %v5353_v30 }
0x2d21   :  { %3207 = vrot.lane.b32.xlu1 %v3205_v49, %s5438_s3 }
0x2d22   :  { %5354 = vrcp.f32 %v3195_v31 }
0x2d25   :  { %997 = vrot.lane.b32.xlu1 %v6803_v23, %s5439_s21  ;;  %v3202_v23 = vrot.slane %v3086_v57, 6 }
0x2d29   :  { %1301 = vrot.lane.b32.xlu1 %v6901_v27, %s5439_s21 }
0x2d2d   :  { %1598 = vrot.lane.b32.xlu1 %v7012_v24, %s5439_s21 }
0x2d2f   :  { %v5355_v34 = vpop.eup %5354 }
0x2d30   :  { %v3204_v27 = vmul.f32 %v5355_v34, %v3202_v23 }
0x2d31   :  { %1900 = vrot.lane.b32.xlu1 %v7225_v15, %s5439_s21 }
0x2d35   :  { %2195 = vrot.lane.b32.xlu1 %v7331_v8, %s5439_s21 }
0x2d39   :  { %2497 = vrot.lane.b32.xlu1 %v7429_v26, %s5439_s21 }
0x2d3d   :  { %2792 = vrot.lane.b32.xlu1 %v7651_v61, %s5439_s21 }
0x2d41   :  { %3094 = vrot.lane.b32.xlu1 %v3092_v59, %s5439_s21 }
0x2d93   :  { %v3208_v24 = vpop.permute.xlu1 %3207 }
0x2d94   :  { %v3210_v15 = vadd.f32 %v3208_v24, %v3204_v27 }
0x2d96   :  { %5356 = vtanh.f32 %v3210_v15 }
0x2d97   :  { %v998_v8 = vpop.permute.xlu1 %997 }
0x2d98   :  { %1001 = vst.msk [vmem:[#allocation2 - $0x2] sm:$0xc] %vm1000_vm5, %v998_v8 }
0x2d9b   :  { %v1302_v26 = vpop.permute.xlu1 %1301 }
0x2d9c   :  { %1305 = vst.msk [vmem:[#allocation2 - $0x2] sm:$0xc0] %vm1304_vm6, %v1302_v26 }
0x2d9f   :  { %v1599_v61 = vpop.permute.xlu1 %1598 }
0x2da0   :  { %1601 = vst.msk [vmem:[#allocation2 + $0x6] sm:$0xc] %vm1000_vm5, %v1599_v61 }
0x2da3   :  { %v5357_v50 = vpop.eup %5356  ;;  %v1901_v52 = vpop.permute.xlu1 %1900 }
0x2da4   :  { %1903 = vst.msk [vmem:[#allocation2 + $0x6] sm:$0xc0] %vm1304_vm6, %v1901_v52  ;;  %3213 = vrot.lane.b32.xlu0 %v5357_v50, %s5438_s3 }
0x2da7   :  { %v2196_v32 = vpop.permute.xlu1 %2195 }
0x2da8   :  { %2198 = vst.msk [vmem:[#allocation2 + $0xe] sm:$0xc] %vm1000_vm5, %v2196_v32  ;;  %1149 = vrot.lane.b32.xlu0 %v6852_v12, %s5439_s21 }
0x2dab   :  { %v2498_v38 = vpop.permute.xlu1 %2497 }
0x2dac   :  { %2500 = vst.msk [vmem:[#allocation2 + $0xe] sm:$0xc0] %vm1304_vm6, %v2498_v38  ;;  %1447 = vrot.lane.b32.xlu0 %v6958_v29, %s5439_s21 }
0x2daf   :  { %v2793_v53 = vpop.permute.xlu1 %2792 }
0x2db0   :  { %2795 = vst.msk [vmem:[#allocation2 + $0x16] sm:$0xc] %vm1000_vm5, %v2793_v53  ;;  %1749 = vrot.lane.b32.xlu0 %v7176_v10, %s5439_s21 }
0x2db3   :  { %v3095_v60 = vpop.permute.xlu1 %3094 }
0x2db4   :  { %3097 = vst.msk [vmem:[#allocation2 + $0x16] sm:$0xc0] %vm1304_vm6, %v3095_v60  ;;  %2045 = vrot.lane.b32.xlu0 %v7282_v17, %s5439_s21 }
0x2db8   :  { %2346 = vrot.lane.b32.xlu0 %v7380_v25, %s5439_s21 }
0x2dbc   :  { %2642 = vrot.lane.b32.xlu0 %v7488_v36, %s5439_s21 }
0x2dc0   :  { %2943 = vrot.lane.b32.xlu0 %v7693_v28, %s5439_s21 }
0x2e16   :  { %v3214_v12 = vpop.permute.xlu0 %3213 }
0x2e17   :  { %v3216_v29 = vmul.f32 %v5355_v34, %v3214_v12 }
0x2e19   :  { %3218 = vrot.lane.b32.xlu0 %v3216_v29, %s5439_s21 }
0x2e1a   :  { %v1150_v10 = vpop.permute.xlu0 %1149 }
0x2e1b   :  { %1153 = vst.msk [vmem:[#allocation2 - $0x2] sm:$0x30] %vm1152_vm7, %v1150_v10 }
0x2e1e   :  { %v1448_v44 = vpop.permute.xlu0 %1447 }
0x2e1f   :  { %1451 = vst.msk [vmem:[#allocation2 + $0x6] sm:$0x3] %vm1450_vm8, %v1448_v44 }
0x2e22   :  { %v1750_v17 = vpop.permute.xlu0 %1749 }
0x2e23   :  { %1752 = vst.msk [vmem:[#allocation2 + $0x6] sm:$0x30] %vm1152_vm7, %v1750_v17 }
0x2e26   :  { %v2046_v25 = vpop.permute.xlu0 %2045 }
0x2e27   :  { %2048 = vst.msk [vmem:[#allocation2 + $0xe] sm:$0x3] %vm1450_vm8, %v2046_v25 }
0x2e2a   :  { %v2347_v36 = vpop.permute.xlu0 %2346 }
0x2e2b   :  { %2349 = vst.msk [vmem:[#allocation2 + $0xe] sm:$0x30] %vm1152_vm7, %v2347_v36 }
0x2e2e   :  { %v2643_v28 = vpop.permute.xlu0 %2642 }
0x2e2f   :  { %2645 = vst.msk [vmem:[#allocation2 + $0x16] sm:$0x3] %vm1450_vm8, %v2643_v28 }
0x2e32   :  { %v2944_v54 = vpop.permute.xlu0 %2943 }
0x2e33   :  { %2946 = vst.msk [vmem:[#allocation2 + $0x16] sm:$0x30] %vm1152_vm7, %v2944_v54 }
0x2e8b   :  { %v3219_v55 = vpop.permute.xlu0 %3218 }
0x2e8c   :  { %3221 = vst.msk [vmem:[#allocation2 + $0x1e] sm:$0x3] %vm1450_vm8, %v3219_v55 }
0x2e8d   :  { %5426 = dma.done.wait [#allocation9], 1536 }
0x2e8e   :  { %5427 = vsyncadd [#allocation9], 4294965760  ;;  %5022 = vmatprep.subr.mxu0 %v5545_v7  ;;  %v3233_v56 = vld [vmem:[#allocation2 + $0x2] sm:$0xff]  ;;  %v3234_v57 = vld [vmem:[#allocation2 + $0xa] sm:$0xff]  ;;  %vm3559_vm9 = vcmask 517120   ;;  %vm3561_vm10 = vcmask 521220  }
0x2e8f   :  { %5023 = vmatpush3.msra.mxu0 %v5545_v7  ;;  %v3235_v58 = vld [vmem:[#allocation2 + $0x12] sm:$0xff]  ;;  %5030 = vmatprep.mubr.msk.f32.mxu0 %vm863_vm2, %v3233_v56  ;;  %v8341_v7 = vld [vmem:[#allocation23_spill] sm:$0xff]  ;;  %v8345_v40 = vld [vmem:[#allocation26_spill] sm:$0xff] }
0x2e90   :  { %5024 = vmatprep.subr.mxu0 %v5540_v6  ;;  %v3226_v63 = vld [vmem:[#allocation2 + $0x8] sm:$0xff]  ;;  %v8343_v21 = vld [vmem:[#allocation21_spill] sm:$0xff]  ;;  %v4811_v37 = vld [vmem:[%s8102_s4] ss:$0 sm:$0xff] }
0x2e91   :  { %5025 = vmatpush3.msra.mxu0 %v5540_v6  ;;  %v3236_v6 = vld [vmem:[#allocation2 + $0x1a] sm:$0xf]  ;;  %v8344_v9 = vld [vmem:[#allocation27_spill] sm:$0xff]  ;;  %v8347_v13 = vld [vmem:[#allocation24_spill] sm:$0xff] }
0x2e92   :  { %5026 = vmatprep.subr.mxu0 %v5535_v5  ;;  %v3228_v19 = vld [vmem:[#allocation2 + $0x18] sm:$0xf]  ;;  %v3435_v14 = vld [vmem:[#allocation2 + $0x4] sm:$0xff]  ;;  %v3436_v43 = vld [vmem:[#allocation2 + $0xc] sm:$0xff] }
0x2e93   :  { %5027 = vmatpush3.msra.mxu0 %v5535_v5  ;;  %v3225_v5 = vld [vmem:[#allocation2] sm:$0xff]  ;;  %v8346_v62 = vld [vmem:[#allocation25_spill] sm:$0xff] }
0x2e94   :  { %5028 = vmatprep.subr.mxu0 %v5530_v4  ;;  %v3437_v59 = vld [vmem:[#allocation2 + $0x14] sm:$0xff]  ;;  %v3438_v35 = vld [vmem:[#allocation2 + $0x1c] sm:$0xf]  ;;  %v8348_v60 = vld [vmem:[#allocation43_spill] sm:$0xff] }
0x2e95   :  { %5029 = vmatpush3.msra.mxu0 %v5530_v4  ;;  %v8342_v4 = vld [vmem:[#allocation22_spill] sm:$0xff]  ;;  %5064 = vmatprep.subr.mxu1 %v8348_v60  ;;  %v8349_v12 = vld [vmem:[#allocation35_spill] sm:$0xff] }
0x2e96   :  { %5036 = vmatprep.subr.mxu0 %v5525_v3  ;;  %5031 = vmatmul.mubr.msk.f32.vlgmr.msra.gmra.mxu0 %vm863_vm2, %v3234_v57 }
0x2e97   :  { %5037 = vmatpush3.msra.mxu0 %v5525_v3  ;;  %5033 = vmatprep.mubr.msk.f32.mxu0 %vm863_vm2, %v3235_v58  ;;  %v3227_v3 = vld [vmem:[#allocation2 + $0x10] sm:$0xff] }
0x2e98   :  { %5038 = vmatprep.subr.mxu0 %v8341_v7 }
0x2e99   :  { %5039 = vmatpush3.msra.mxu0 %v8341_v7 }
0x2e9a   :  { %5040 = vmatprep.subr.mxu0 %v8342_v4  ;;  %5034 = vmatmul.mubr.msk.f32.gmra.mxu0 %vm863_vm2, %v3236_v6 }
0x2e9b   :  { %5041 = vmatpush3.msra.mxu0 %v8342_v4  ;;  %5044 = vmatprep.mubr.msk.f32.mxu0 %vm863_vm2, %v3225_v5 }
0x2e9c   :  { %5042 = vmatprep.subr.mxu0 %v8343_v21 }
0x2e9d   :  { %5043 = vmatpush3.msra.mxu0 %v8343_v21 }
0x2e9e   :  { %5050 = vmatprep.subr.mxu0 %v8344_v9  ;;  %5045 = vmatmul.mubr.msk.f32.vlgmr.msra.gmra.mxu0 %vm863_vm2, %v3226_v63 }
0x2e9f   :  { %5051 = vmatpush3.msra.mxu0 %v8344_v9  ;;  %5047 = vmatprep.mubr.msk.f32.mxu0 %vm863_vm2, %v3227_v3 }
0x2ea0   :  { %5052 = vmatprep.subr.mxu0 %v8345_v40 }
0x2ea1   :  { %5053 = vmatpush3.msra.mxu0 %v8345_v40 }
0x2ea2   :  { %5054 = vmatprep.subr.mxu0 %v8346_v62  ;;  %5048 = vmatmul.mubr.msk.f32.gmra.mxu0 %vm863_vm2, %v3228_v19 }
0x2ea3   :  { %5055 = vmatpush3.msra.mxu0 %v8346_v62  ;;  %5058 = vmatprep.mubr.msk.f32.mxu0 %vm863_vm2, %v3435_v14 }
0x2ea4   :  { %5056 = vmatprep.subr.mxu0 %v8347_v13 }
0x2ea5   :  { %5057 = vmatpush3.msra.mxu0 %v8347_v13 }
0x2ea6   :  { %5059 = vmatmul.mubr.msk.f32.vlgmr.msra.gmra.mxu0 %vm863_vm2, %v3436_v43  ;;  %5083 = vmatprep.subr.mxu0 %v8349_v12 }
0x2ea7   :  { %5061 = vmatprep.mubr.msk.f32.mxu0 %vm863_vm2, %v3437_v59 }
0x2eaa   :  { %5062 = vmatmul.mubr.msk.f32.gmra.mxu0 %vm863_vm2, %v3438_v35 }
0x2f56   :  { %v5032_v41 = vpop.f32.mrf.mxu0 }
0x2f58   :  { %v3319_v51 = vpop.f32.mrf.mxu0 }
0x2f5a   :  { %v5035_v0 = vpop.f32.mrf.mxu0 }
0x2f5c   :  { %v3329_v22 = vpop.f32.mrf.mxu0 }
0x2f5e   :  { %v5046_v1 = vpop.f32.mrf.mxu0 }
0x2f5f   :  { %v3422_v16 = vadd.f32 %v5046_v1, %v5032_v41 }
0x2f60   :  { %v3416_v2 = vpop.f32.mrf.mxu0 }
0x2f61   :  { %v3417_v39 = vadd.f32 %v3416_v2, %v3319_v51 }
0x2f62   :  { %v5049_v33 = vpop.f32.mrf.mxu0 }
0x2f63   :  { %v3432_v48 = vadd.f32 %v5049_v33, %v5035_v0 }
0x2f64   :  { %v3426_v11 = vpop.f32.mrf.mxu0 }
0x2f65   :  { %v3427_v30 = vadd.f32 %v3426_v11, %v3329_v22 }
0x2f66   :  { %v5060_v18 = vpop.f32.mrf.mxu0 }
0x2f67   :  { %v3541_v46 = vadd.f32 %v5060_v18, %v3422_v16 }
0x2f68   :  { %v3521_v47 = vpop.f32.mrf.mxu0 }
0x2f69   :  { %v3552_v42 = vadd.f32 %v4811_v37, %v3541_v46  ;;  %v3540_v49 = vadd.f32 %v3521_v47, %v3417_v39 }
0x2f6a   :  { %v5063_v20 = vpop.f32.mrf.mxu0 }
0x2f6b   :  { %v3564_v31 = vrot.slane %v3552_v42, 2  ;;  %v3551_v34 = vadd.f32 %v4811_v37, %v3540_v49  ;;  %v3543_v23 = vadd.f32 %v5063_v20, %v3432_v48 }
0x2f6c   :  { %v3531_v27 = vpop.f32.mrf.mxu0 }
0x2f6d   :  { %v3566_v24 = vmax.f32 %v3552_v42, %v3564_v31  ;;  %v3556_v15 = vrot.slane %v3551_v34, 2  ;;  %v3554_v8 = vadd.f32 %v4811_v37, %v3543_v23  ;;  %v3542_v26 = vadd.f32 %v3531_v27, %v3427_v30 }
0x2f6f   :  { %3567 = vst.msk [vmem:[#allocation3 + $0x4] sm:$0x3] %vm3559_vm9, %v3566_v24  ;;  %v3558_v61 = vmax.f32 %v3551_v34, %v3556_v15  ;;  %v3576_v50 = vrot.slane %v3554_v8, 2  ;;  %v3553_v52 = vadd.f32 %v4811_v37, %v3542_v26 }
0x2f70   :  { %3568 = vst.msk [vmem:[#allocation3 + $0x2] sm:$0x30] %vm3561_vm10, %v3566_v24 }
0x2f71   :  { %3560 = vst.msk [vmem:[#allocation3] sm:$0x3] %vm3559_vm9, %v3558_v61  ;;  %v3578_v32 = vmax.f32 %v3554_v8, %v3576_v50  ;;  %v3570_v38 = vrot.slane %v3553_v52, 2 }
0x2f72   :  { %3562 = vst.msk [vmem:[#allocation3 - $0x2] sm:$0x30] %vm3561_vm10, %v3558_v61 }
0x2f73   :  { %3579 = vst.msk [vmem:[#allocation3 + $0xc] sm:$0x3] %vm3559_vm9, %v3578_v32  ;;  %v3572_v53 = vmax.f32 %v3553_v52, %v3570_v38 }
0x2f75   :  { %3573 = vst.msk [vmem:[#allocation3 + $0x8] sm:$0x3] %vm3559_vm9, %v3572_v53 }
0x2f76   :  { %3574 = vst.msk [vmem:[#allocation3 + $0x6] sm:$0x30] %vm3561_vm10, %v3572_v53 }
0x2f77   :  { %5428 = dma.done.wait [#allocation9 + $0x1], 3072 }
0x2f78   :  { %5429 = vsyncadd [#allocation9 + $0x1], 4294964224  ;;  %5065 = vmatpush3.msra.mxu1 %v8348_v60  ;;  %5084 = vmatpush3.msra.mxu0 %v8349_v12  ;;  %v8350_v29 = vld [vmem:[#allocation42_spill] sm:$0xff]  ;;  %v8352_v44 = vld [vmem:[#allocation41_spill] sm:$0xff] }
0x2f79   :  { %5066 = vmatprep.subr.mxu1 %v8350_v29  ;;  %v8351_v10 = vld [vmem:[#allocation34_spill] sm:$0xff]  ;;  %v8353_v17 = vld [vmem:[#allocation33_spill] sm:$0xff]  ;;  %v8354_v25 = vld [vmem:[#allocation40_spill] sm:$0xff] }
0x2f7a   :  { %5085 = vmatprep.subr.mxu0 %v8351_v10  ;;  %5067 = vmatpush3.msra.mxu1 %v8350_v29  ;;  %v8355_v36 = vld [vmem:[#allocation32_spill] sm:$0xff]  ;;  %v8356_v28 = vld [vmem:[#allocation39_spill] sm:$0xff]  ;;  %v8358_v55 = vld [vmem:[#allocation38_spill] sm:$0xff] }
0x2f7b   :  { %5086 = vmatpush3.msra.mxu0 %v8351_v10  ;;  %5068 = vmatprep.subr.mxu1 %v8352_v44  ;;  %v8357_v54 = vld [vmem:[#allocation31_spill] sm:$0xff]  ;;  %v8359_v56 = vld [vmem:[#allocation30_spill] sm:$0xff]  ;;  %v8360_v57 = vld [vmem:[#allocation37_spill] sm:$0xff] }
0x2f7c   :  { %5087 = vmatprep.subr.mxu0 %v8353_v17  ;;  %5069 = vmatpush3.msra.mxu1 %v8352_v44  ;;  %v8361_v58 = vld [vmem:[#allocation29_spill] sm:$0xff]  ;;  %v3593_v6 = vld [vmem:[#allocation3 + $0x2] sm:$0xff]  ;;  %v8362_v5 = vld [vmem:[#allocation36_spill] sm:$0xff] }
0x2f7d   :  { %5088 = vmatpush3.msra.mxu0 %v8353_v17  ;;  %5070 = vmatprep.subr.mxu1 %v8354_v25  ;;  %v3583_v7 = vld [vmem:[#allocation3] sm:$0xff]  ;;  %v8363_v4 = vld [vmem:[#allocation28_spill] sm:$0xff]  ;;  %v3594_v63 = vld [vmem:[#allocation3 + $0xa] sm:$0x3] }
0x2f7e   :  { %5089 = vmatprep.subr.mxu0 %v8355_v36  ;;  %5071 = vmatpush3.msra.mxu1 %v8354_v25  ;;  %v3584_v21 = vld [vmem:[#allocation3 + $0x8] sm:$0x3]  ;;  %v8365_v19 = vld [vmem:[#allocation50_spill] sm:$0xff]  ;;  %v8366_v40 = vld [vmem:[#allocation49_spill] sm:$0xff] }
0x2f7f   :  { %5090 = vmatpush3.msra.mxu0 %v8355_v36  ;;  %5072 = vmatprep.subr.mxu1 %v8356_v28  ;;  %v3763_v3 = vld [vmem:[#allocation3 + $0x4] sm:$0xff]  ;;  %v8367_v14 = vld [vmem:[#allocation48_spill] sm:$0xff]  ;;  %v8370_v13 = vld [vmem:[#allocation45_spill] sm:$0xff] }
0x2f80   :  { %5091 = vmatprep.subr.mxu0 %v8357_v54  ;;  %5073 = vmatpush3.msra.mxu1 %v8356_v28  ;;  %v8364_v9 = vld [vmem:[#allocation51_spill] sm:$0xff]  ;;  %v8369_v43 = vld [vmem:[#allocation46_spill] sm:$0xff]  ;;  %v8371_v35 = vld [vmem:[#allocation44_spill] sm:$0xff] }
0x2f81   :  { %5092 = vmatpush3.msra.mxu0 %v8357_v54  ;;  %5074 = vmatprep.subr.mxu1 %v8358_v55  ;;  %v8368_v62 = vld [vmem:[#allocation47_spill] sm:$0xff]  ;;  %v4818_v11 = vld [vmem:[%s8103_s5] ss:$0 sm:$0xff] }
0x2f82   :  { %5093 = vmatprep.subr.mxu0 %v8359_v56  ;;  %5075 = vmatpush3.msra.mxu1 %v8358_v55  ;;  %v3764_v59 = vld [vmem:[#allocation3 + $0xc] sm:$0x3] }
0x2f83   :  { %5094 = vmatpush3.msra.mxu0 %v8359_v56  ;;  %5076 = vmatprep.subr.mxu1 %v8360_v57 }
0x2f84   :  { %5095 = vmatprep.subr.mxu0 %v8361_v58  ;;  %5077 = vmatpush3.msra.mxu1 %v8360_v57 }
0x2f85   :  { %5096 = vmatpush3.msra.mxu0 %v8361_v58  ;;  %5078 = vmatprep.subr.mxu1 %v8362_v5 }
0x2f86   :  { %5097 = vmatprep.subr.mxu0 %v8363_v4  ;;  %5079 = vmatpush3.msra.mxu1 %v8362_v5 }
0x2f87   :  { %5080 = vmatprep.mubr.msk.f32.mxu1 %vm865_vm3, %v3593_v6  ;;  %5098 = vmatpush3.msra.mxu0 %v8363_v4 }
0x2f88   :  { %5099 = vmatprep.mubr.msk.f32.mxu0 %vm865_vm3, %v3583_v7  ;;  %5081 = vmatmul.mubr.msk.f32.vlgmr.msra.gmra.mxu1 %vm865_vm3, %v3594_v63 }
0x2f89   :  { %5100 = vmatmul.mubr.msk.f32.vlgmr.msra.gmra.mxu0 %vm865_vm3, %v3584_v21  ;;  %5102 = vmatprep.subr.mxu1 %v8364_v9 }
0x2f8a   :  { %5118 = vmatprep.mubr.msk.f32.mxu1 %vm865_vm3, %v3763_v3  ;;  %5103 = vmatpush3.msra.mxu1 %v8364_v9 }
0x2f8b   :  { %5104 = vmatprep.subr.mxu1 %v8365_v19 }
0x2f8c   :  { %5105 = vmatpush3.msra.mxu1 %v8365_v19 }
0x2f8d   :  { %5106 = vmatprep.subr.mxu1 %v8366_v40 }
0x2f8e   :  { %5107 = vmatpush3.msra.mxu1 %v8366_v40 }
0x2f8f   :  { %5108 = vmatprep.subr.mxu1 %v8367_v14 }
0x2f90   :  { %5109 = vmatpush3.msra.mxu1 %v8367_v14 }
0x2f91   :  { %5110 = vmatprep.subr.mxu1 %v8368_v62 }
0x2f92   :  { %5111 = vmatpush3.msra.mxu1 %v8368_v62 }
0x2f93   :  { %5112 = vmatprep.subr.mxu1 %v8369_v43 }
0x2f94   :  { %5113 = vmatpush3.msra.mxu1 %v8369_v43 }
0x2f95   :  { %5114 = vmatprep.subr.mxu1 %v8370_v13 }
0x2f96   :  { %5115 = vmatpush3.msra.mxu1 %v8370_v13 }
0x2f97   :  { %5116 = vmatprep.subr.mxu1 %v8371_v35 }
0x2f98   :  { %5117 = vmatpush3.msra.mxu1 %v8371_v35 }
0x2f99   :  { %5119 = vmatmul.mubr.msk.f32.vlgmr.msra.gmra.mxu1 %vm865_vm3, %v3764_v59 }
0x3048   :  { %v5082_v41 = vpop.f32.mrf.mxu1 }
0x3049   :  { %v5101_v51 = vpop.f32.mrf.mxu0 }
0x304a   :  { %v3675_v0 = vpop.f32.mrf.mxu1 }
0x304b   :  { %v3755_v22 = vpop.f32.mrf.mxu0 }
0x304c   :  { %v3756_v2 = vadd.f32 %v3755_v22, %v3675_v0 }
0x3059   :  { %v5120_v1 = vpop.f32.mrf.mxu1 }
0x305b   :  { %v3845_v33 = vpop.f32.mrf.mxu1 }
0x305c   :  { %v3853_v16 = vadd.f32 %v3845_v33, %v3756_v2 }
0x305e   :  { %v3861_v18 = vadd.f32 %v4818_v11, %v3853_v16 }
0x3060   :  { %v3863_v37 = vrot.slane %v3861_v18, 2 }
0x3062   :  { %v3865_v39 = vmax.f32 %v3861_v18, %v3863_v37 }
0x3064   :  { %3866 = vst.msk [vmem:[#allocation4] sm:$0x3] %vm1450_vm8, %v3865_v39 }
0x3065   :  { %3867 = vst.msk [vmem:[#allocation4 - $0x2] sm:$0x30] %vm1152_vm7, %v3865_v39 }
0x3066   :  { %5430 = dma.done.wait [#allocation9 + $0x2], 4096 }
0x3067   :  { %5431 = vsyncadd [#allocation9 + $0x2], 4294963200  ;;  %v8372_v46 = vld [vmem:[#allocation77_spill] sm:$0xff]  ;;  %4014 = vmatprep.mubr.f32.mxu0 %v8339_v45  ;;  %v8373_v47 = vld [vmem:[#allocation76_spill] sm:$0xff]  ;;  %4156 = vmatprep.mubr.f32.mxu1 %v8339_v45 }
0x3068   :  { %3974 = vmatprep.subr.mxu0 %v8372_v46  ;;  %v8374_v48 = vld [vmem:[#allocation81_spill] sm:$0xff]  ;;  %v8376_v49 = vld [vmem:[#allocation80_spill] sm:$0xff]  ;;  %v8387_v50 = vld [vmem:[#allocation79_spill] sm:$0xff] }
0x3069   :  { %3975 = vmatpush1.msra.mxu0 %v8373_v47  ;;  %4116 = vmatprep.subr.mxu1 %v8374_v48  ;;  %v8375_v42 = vld [vmem:[#allocation69_spill] sm:$0xff]  ;;  %v8377_v20 = vld [vmem:[#allocation68_spill] sm:$0xff]  ;;  %v8388_v52 = vld [vmem:[#allocation78_spill] sm:$0xff] }
0x306a   :  { %3976 = vmatprep.subr.mxu0 %v8375_v42  ;;  %4117 = vmatpush1.msra.mxu1 %v8376_v49  ;;  %v8378_v30 = vld [vmem:[#allocation73_spill] sm:$0xff]  ;;  %v8380_v34 = vld [vmem:[#allocation72_spill] sm:$0xff]  ;;  %v8389_v32 = vld [vmem:[#allocation71_spill] sm:$0xff] }
0x306b   :  { %3977 = vmatpush1.msra.mxu0 %v8377_v20  ;;  %4118 = vmatprep.subr.mxu1 %v8378_v30  ;;  %v8379_v31 = vld [vmem:[#allocation61_spill] sm:$0xff]  ;;  %v8381_v23 = vld [vmem:[#allocation60_spill] sm:$0xff]  ;;  %v8391_v53 = vld [vmem:[#allocation70_spill] sm:$0xff] }
0x306c   :  { %3978 = vmatprep.subr.mxu0 %v8379_v31  ;;  %4119 = vmatpush1.msra.mxu1 %v8380_v34  ;;  %v8382_v27 = vld [vmem:[#allocation65_spill] sm:$0xff]  ;;  %v8384_v15 = vld [vmem:[#allocation64_spill] sm:$0xff]  ;;  %v8392_v60 = vld [vmem:[#allocation63_spill] sm:$0xff] }
0x306d   :  { %3979 = vmatpush1.msra.mxu0 %v8381_v23  ;;  %4120 = vmatprep.subr.mxu1 %v8382_v27  ;;  %v8383_v24 = vld [vmem:[#allocation53_spill] sm:$0xff]  ;;  %v8385_v8 = vld [vmem:[#allocation52_spill] sm:$0xff]  ;;  %v8393_v12 = vld [vmem:[#allocation62_spill] sm:$0xff] }
0x306e   :  { %3980 = vmatprep.subr.mxu0 %v8383_v24  ;;  %4121 = vmatpush1.msra.mxu1 %v8384_v15  ;;  %v3872_v26 = vld [vmem:[#allocation4] sm:$0xf]  ;;  %v8386_v61 = vld [vmem:[#allocation57_spill] sm:$0xff]  ;;  %v8394_v29 = vld [vmem:[#allocation55_spill] sm:$0xff] }
0x306f   :  { %3981 = vmatpush1.msra.mxu0 %v8385_v8  ;;  %4122 = vmatprep.subr.mxu1 %v8386_v61  ;;  %v8390_v38 = vld [vmem:[#allocation56_spill] sm:$0xff]  ;;  %v8395_v10 = vld [vmem:[#allocation54_spill] sm:$0xff]  ;;  %v8396_v44 = vld [vmem:[#allocation83_spill] sm:$0xff] }
0x3070   :  { %4819 = vmatmul.mubr.msk.f32.vlgmr.msra.gmra.mxu0 %vm863_vm2, %v3872_v26  ;;  %4045 = vmatprep.subr.mxu0 %v8387_v50  ;;  %v8397_v17 = vld [vmem:[#allocation82_spill] sm:$0xff]  ;;  %v8398_v25 = vld [vmem:[#allocation75_spill] sm:$0xff]  ;;  %v8404_v58 = vld [vmem:[#allocation212_spill] sm:$0xff] }
0x3071   :  { %4046 = vmatpush1.msra.mxu0 %v8388_v52  ;;  %4085 = vmatprep.mubr.f32.mxu0 %v8339_v45  ;;  %v8399_v36 = vld [vmem:[#allocation74_spill] sm:$0xff]  ;;  %v8400_v28 = vld [vmem:[#allocation67_spill] sm:$0xff]  ;;  %v3925_v7 = vsub.s32 4, %v8404_v58  ;;  %v8406_v5 = vsub.s32 1, %v8404_v58  ;;  %v3929_v63 = vsub.s32 5, %v8404_v58  ;;  %v3917_v9 = vsub.s32 2, %v8404_v58 }
0x3072   :  { %4047 = vmatprep.subr.mxu0 %v8389_v32  ;;  %4123 = vmatpush1.msra.mxu1 %v8390_v38  ;;  %v8401_v54 = vld [vmem:[#allocation66_spill] sm:$0xff]  ;;  %v8402_v55 = vld [vmem:[#allocation59_spill] sm:$0xff]  ;;  %v3921_v43 = vsub.s32 3, %v8404_v58  ;;  %v3933_v18 = vsub.s32 6, %v8404_v58  ;;  %v3937_v47 = vsub.s32 7, %v8404_v58 }
0x3073   :  { %4048 = vmatpush1.msra.mxu0 %v8391_v53  ;;  %4821 = vmatmul.mubr.msk.f32.vlgmr.msra.gmra.mxu1 %vm863_vm2, %v3872_v26  ;;  %v8403_v56 = vld [vmem:[#allocation58_spill] sm:$0xff]  ;;  %v8407_v24 = vld [vmem:[#allocation115_spill] sm:$0xff] }
0x3074   :  { %4049 = vmatprep.subr.mxu0 %v8392_v60  ;;  %v3905_v57 = vld [vmem:[%s8104_s6] sm:$0xff]  ;;  %4882 = vmatprep.subr.mxu1 %v8407_v24 }
0x3075   :  { %4050 = vmatpush1.msra.mxu0 %v8393_v12  ;;  %v3914_v4 = vrot.slane %v3905_v57, %v8406_v5  ;;  %v3926_v19 = vrot.slane %v3905_v57, %v3925_v7  ;;  %v3930_v13 = vrot.slane %v3905_v57, %v3929_v63  ;;  %v3918_v41 = vrot.slane %v3905_v57, %v3917_v9  ;;  %v8408_v15 = vld [vmem:[#allocation147_spill] sm:$0xff] }
0x3076   :  { %4051 = vmatprep.subr.mxu0 %v8394_v29  ;;  %v3922_v22 = vrot.slane %v3905_v57, %v3921_v43  ;;  %v3934_v42 = vrot.slane %v3905_v57, %v3933_v18  ;;  %v3938_v49 = vrot.slane %v3905_v57, %v3937_v47 }
0x3077   :  { %4052 = vmatpush1.msra.mxu0 %v8395_v10 }
0x3078   :  { %4820 = vmatmul.mubr.msk.f32.vlgmr.msra.gmra.mxu0 %vm863_vm2, %v3872_v26  ;;  %4187 = vmatprep.subr.mxu0 %v8396_v44 }
0x3079   :  { %4188 = vmatpush1.msra.mxu0 %v8397_v17  ;;  %4227 = vmatprep.mubr.f32.mxu0 %v8339_v45  ;;  %v8405_v45 = vsub.s32 0, %v8404_v58 }
0x307a   :  { %4189 = vmatprep.subr.mxu0 %v8398_v25 }
0x307b   :  { %4190 = vmatpush1.msra.mxu0 %v8399_v36  ;;  %v3910_v6 = vrot.slane %v3905_v57, %v8405_v45 }
0x307c   :  { %4191 = vmatprep.subr.mxu0 %v8400_v28 }
0x307d   :  { %4192 = vmatpush1.msra.mxu0 %v8401_v54 }
0x307e   :  { %4193 = vmatprep.subr.mxu0 %v8402_v55 }
0x307f   :  { %4194 = vmatpush1.msra.mxu0 %v8403_v56 }
0x3080   :  { %4822 = vmatmul.mubr.msk.f32.vlgmr.msra.gmra.mxu0 %vm863_vm2, %v3872_v26  ;;  %4917 = vmatprep.subr.mxu0 %v8408_v15 }
0x3130   :  { %v4016_v21 = vpop.f32.mrf.mxu0 }
0x3131   :  { %v7920_v3 = vadd.f32 %v4016_v21, %v3910_v6 }
0x3132   :  { %v4018_v40 = vpop.f32.mrf.mxu0 }
0x3133   :  { %v4234_v14 = vmax.f32 %v7920_v3, 0.0  ;;  %v7924_v62 = vadd.f32 %v4018_v40, %v3914_v4  ;;  %v4158_v59 = vpop.f32.mrf.mxu1 }
0x3134   :  { %v7928_v51 = vadd.f32 %v4158_v59, %v3926_v19 }
0x3135   :  { %v4235_v35 = vmax.f32 %v7924_v62, 0.0  ;;  %v4160_v0 = vpop.f32.mrf.mxu1 }
0x3136   :  { %v4238_v1 = vmax.f32 %v7928_v51, 0.0  ;;  %v7931_v2 = vadd.f32 %v4160_v0, %v3930_v13 }
0x3138   :  { %v4087_v33 = vpop.f32.mrf.mxu0  ;;  %v4239_v16 = vmax.f32 %v7931_v2, 0.0 }
0x3139   :  { %v7933_v11 = vadd.f32 %v4087_v33, %v3918_v41 }
0x313a   :  { %v4089_v37 = vpop.f32.mrf.mxu0 }
0x313b   :  { %v4236_v39 = vmax.f32 %v7933_v11, 0.0  ;;  %v7938_v46 = vadd.f32 %v4089_v37, %v3922_v22 }
0x313d   :  { %v4237_v48 = vmax.f32 %v7938_v46, 0.0 }
0x3140   :  { %v4229_v20 = vpop.f32.mrf.mxu0 }
0x3141   :  { %v7942_v30 = vadd.f32 %v4229_v20, %v3934_v42 }
0x3142   :  { %v4231_v31 = vpop.f32.mrf.mxu0 }
0x3143   :  { %v4240_v34 = vmax.f32 %v7942_v30, 0.0  ;;  %v7945_v23 = vadd.f32 %v4231_v31, %v3938_v49 }
0x3145   :  { %v4241_v27 = vmax.f32 %v7945_v23, 0.0 }
0x3146   :  { %5432 = dma.done.wait [#allocation9 + $0x3], 16384 }
0x3147   :  { %5433 = vsyncadd [#allocation9 + $0x3], 4294950912  ;;  %v8409_v8 = vld [vmem:[#allocation99_spill] sm:$0xff]  ;;  %v8411_v61 = vld [vmem:[#allocation114_spill] sm:$0xff]  ;;  %4437 = vmatprep.mubr.f32.mxu1 %v4235_v35  ;;  %4507 = vmatprep.mubr.f32.mxu0 %v4237_v48  ;;  %s5440_s6 = smov 120   ;;  %s5441_s10 = smov [#allocation10]  }
0x3148   :  { %4883 = vmatpush3.msra.mxu1 %v8409_v8  ;;  %v8410_v26 = vld [vmem:[#allocation131_spill] sm:$0xff]  ;;  %v8412_v50 = vld [vmem:[#allocation146_spill] sm:$0xff]  ;;  %v8415_v38 = vld [vmem:[#allocation113_spill] sm:$0xff]  ;;  %s4676_s29 = sshll.u32 %s5441_s10, 4  ;;  %vm4668_vm11 = vcmask 58368   ;;  %s4677_s29 = int_to_ptr.vmem [resolvable:$true] %s4676_s29 }
0x3149   :  { %4918 = vmatpush3.msra.mxu0 %v8410_v26  ;;  %4884 = vmatprep.subr.mxu1 %v8411_v61  ;;  %v8413_v52 = vld [vmem:[#allocation98_spill] sm:$0xff]  ;;  %v8416_v53 = vld [vmem:[#allocation145_spill] sm:$0xff]  ;;  %v8419_v29 = vld [vmem:[#allocation112_spill] sm:$0xff]  ;;  %s5406_s30 = scalar_lea.vmem %s4677_s29, 32  ;;  %p5411_p1 = scmp.lt.s32.totalorder %s4677_s29, %s4677_s29 }
0x314a   :  { %4919 = vmatprep.subr.mxu0 %v8412_v50  ;;  %4885 = vmatpush3.msra.mxu1 %v8413_v52  ;;  %v8414_v32 = vld [vmem:[#allocation130_spill] sm:$0xff]  ;;  %v8417_v60 = vld [vmem:[#allocation97_spill] sm:$0xff]  ;;  %v8420_v10 = vld [vmem:[#allocation144_spill] sm:$0xff]  ;;  %p5407_p0 = scmp.ne.s32.totalorder %s4677_s29, %s5406_s30  ;;  %p5412_p2 = scmp.lt.s32.totalorder %s5406_s30, %s5406_s30 }
0x314b   :  { %4920 = vmatpush3.msra.mxu0 %v8414_v32  ;;  %4886 = vmatprep.subr.mxu1 %v8415_v38  ;;  %v8418_v12 = vld [vmem:[#allocation129_spill] sm:$0xff]  ;;  %v8421_v44 = vld [vmem:[#allocation96_spill] sm:$0xff]  ;;  %v8423_v25 = vld [vmem:[#allocation111_spill] sm:$0xff] }
0x314c   :  { %4921 = vmatprep.subr.mxu0 %v8416_v53  ;;  %4887 = vmatpush3.msra.mxu1 %v8417_v60  ;;  %v8422_v17 = vld [vmem:[#allocation128_spill] sm:$0xff]  ;;  %v8424_v36 = vld [vmem:[#allocation143_spill] sm:$0xff]  ;;  %v8427_v55 = vld [vmem:[#allocation110_spill] sm:$0xff]  ;;  %p5413_p3 = por %p5412_p2, %p5411_p1 }
0x314d   :  { %4922 = vmatpush3.msra.mxu0 %v8418_v12  ;;  %4888 = vmatprep.subr.mxu1 %v8419_v29  ;;  %v8425_v28 = vld [vmem:[#allocation95_spill] sm:$0xff]  ;;  %v8428_v56 = vld [vmem:[#allocation142_spill] sm:$0xff]  ;;  %v8431_v45 = vld [vmem:[#allocation109_spill] sm:$0xff] }
0x314e   :  { %4923 = vmatprep.subr.mxu0 %v8420_v10  ;;  %4889 = vmatpush3.msra.mxu1 %v8421_v44  ;;  %v8426_v54 = vld [vmem:[#allocation127_spill] sm:$0xff]  ;;  %v8429_v57 = vld [vmem:[#allocation94_spill] sm:$0xff]  ;;  %v8432_v6 = vld [vmem:[#allocation141_spill] sm:$0xff]  ;;  %p5414_p4 = pnand %p5413_p3, %p5407_p0 }
0x314f   :  { %4924 = vmatpush3.msra.mxu0 %v8422_v17  ;;  %4890 = vmatprep.subr.mxu1 %v8423_v25  ;;  %v8430_v58 = vld [vmem:[#allocation126_spill] sm:$0xff]  ;;  %v8433_v7 = vld [vmem:[#allocation93_spill] sm:$0xff]  ;;  %v8435_v4 = vld [vmem:[#allocation108_spill] sm:$0xff] }
0x3150   :  { %4925 = vmatprep.subr.mxu0 %v8424_v36  ;;  %4891 = vmatpush3.msra.mxu1 %v8425_v28  ;;  %v8434_v5 = vld [vmem:[#allocation125_spill] sm:$0xff]  ;;  %v8436_v63 = vld [vmem:[#allocation140_spill] sm:$0xff]  ;;  %v8439_v19 = vld [vmem:[#allocation107_spill] sm:$0xff] }
0x3151   :  { %4926 = vmatpush3.msra.mxu0 %v8426_v54  ;;  %4892 = vmatprep.subr.mxu1 %v8427_v55  ;;  %v8437_v21 = vld [vmem:[#allocation92_spill] sm:$0xff]  ;;  %v8440_v40 = vld [vmem:[#allocation139_spill] sm:$0xff]  ;;  %v8443_v59 = vld [vmem:[#allocation106_spill] sm:$0xff] }
0x3152   :  { %4927 = vmatprep.subr.mxu0 %v8428_v56  ;;  %4893 = vmatpush3.msra.mxu1 %v8429_v57  ;;  %v8438_v9 = vld [vmem:[#allocation124_spill] sm:$0xff]  ;;  %v8441_v43 = vld [vmem:[#allocation91_spill] sm:$0xff]  ;;  %v8444_v41 = vld [vmem:[#allocation138_spill] sm:$0xff] }
0x3153   :  { %4928 = vmatpush3.msra.mxu0 %v8430_v58  ;;  %4894 = vmatprep.subr.mxu1 %v8431_v45  ;;  %v8442_v13 = vld [vmem:[#allocation123_spill] sm:$0xff]  ;;  %v8445_v0 = vld [vmem:[#allocation90_spill] sm:$0xff]  ;;  %v8447_v33 = vld [vmem:[#allocation105_spill] sm:$0xff] }
0x3154   :  { %4929 = vmatprep.subr.mxu0 %v8432_v6  ;;  %4895 = vmatpush3.msra.mxu1 %v8433_v7  ;;  %v8446_v22 = vld [vmem:[#allocation122_spill] sm:$0xff]  ;;  %v8448_v18 = vld [vmem:[#allocation137_spill] sm:$0xff]  ;;  %v8451_v42 = vld [vmem:[#allocation104_spill] sm:$0xff] }
0x3155   :  { %4930 = vmatpush3.msra.mxu0 %v8434_v5  ;;  %4896 = vmatprep.subr.mxu1 %v8435_v4  ;;  %v8449_v37 = vld [vmem:[#allocation89_spill] sm:$0xff]  ;;  %v8452_v49 = vld [vmem:[#allocation136_spill] sm:$0xff]  ;;  %v8455_v24 = vld [vmem:[#allocation103_spill] sm:$0xff] }
0x3156   :  { %4931 = vmatprep.subr.mxu0 %v8436_v63  ;;  %4897 = vmatpush3.msra.mxu1 %v8437_v21  ;;  %v8450_v47 = vld [vmem:[#allocation121_spill] sm:$0xff]  ;;  %v8453_v20 = vld [vmem:[#allocation88_spill] sm:$0xff]  ;;  %v8456_v15 = vld [vmem:[#allocation135_spill] sm:$0xff] }
0x3157   :  { %4932 = vmatpush3.msra.mxu0 %v8438_v9  ;;  %4898 = vmatprep.subr.mxu1 %v8439_v19  ;;  %v8454_v31 = vld [vmem:[#allocation120_spill] sm:$0xff]  ;;  %v8457_v8 = vld [vmem:[#allocation87_spill] sm:$0xff]  ;;  %v8459_v61 = vld [vmem:[#allocation102_spill] sm:$0xff] }
0x3158   :  { %4933 = vmatprep.subr.mxu0 %v8440_v40  ;;  %4899 = vmatpush3.msra.mxu1 %v8441_v43  ;;  %v8458_v26 = vld [vmem:[#allocation119_spill] sm:$0xff]  ;;  %v8460_v50 = vld [vmem:[#allocation134_spill] sm:$0xff]  ;;  %v8463_v38 = vld [vmem:[#allocation101_spill] sm:$0xff] }
0x3159   :  { %4934 = vmatpush3.msra.mxu0 %v8442_v13  ;;  %4900 = vmatprep.subr.mxu1 %v8443_v59  ;;  %v8461_v52 = vld [vmem:[#allocation86_spill] sm:$0xff]  ;;  %v8464_v53 = vld [vmem:[#allocation133_spill] sm:$0xff]  ;;  %v8467_v29 = vld [vmem:[#allocation100_spill] sm:$0xff] }
0x315a   :  { %4935 = vmatprep.subr.mxu0 %v8444_v41  ;;  %4901 = vmatpush3.msra.mxu1 %v8445_v0  ;;  %v8462_v32 = vld [vmem:[#allocation118_spill] sm:$0xff]  ;;  %v8465_v60 = vld [vmem:[#allocation85_spill] sm:$0xff]  ;;  %v8468_v10 = vld [vmem:[#allocation132_spill] sm:$0xff] }
0x315b   :  { %4936 = vmatpush3.msra.mxu0 %v8446_v22  ;;  %4902 = vmatprep.subr.mxu1 %v8447_v33  ;;  %v8466_v12 = vld [vmem:[#allocation117_spill] sm:$0xff]  ;;  %v8469_v44 = vld [vmem:[#allocation84_spill] sm:$0xff]  ;;  %v8471_v25 = vld [vmem:[#allocation179_spill] sm:$0xff] }
0x315c   :  { %4937 = vmatprep.subr.mxu0 %v8448_v18  ;;  %4903 = vmatpush3.msra.mxu1 %v8449_v37  ;;  %v8470_v17 = vld [vmem:[#allocation116_spill] sm:$0xff]  ;;  %v8472_v36 = vld [vmem:[#allocation211_spill] sm:$0xff]  ;;  %v8475_v62 = vld [vmem:[#allocation178_spill] sm:$0xff] }
0x315d   :  { %4938 = vmatpush3.msra.mxu0 %v8450_v47  ;;  %4904 = vmatprep.subr.mxu1 %v8451_v42  ;;  %v8473_v28 = vld [vmem:[#allocation163_spill] sm:$0xff]  ;;  %v8476_v35 = vld [vmem:[#allocation210_spill] sm:$0xff]  ;;  %v8479_v3 = vld [vmem:[#allocation177_spill] sm:$0xff] }
0x315e   :  { %4939 = vmatprep.subr.mxu0 %v8452_v49  ;;  %4905 = vmatpush3.msra.mxu1 %v8453_v20  ;;  %v8474_v54 = vld [vmem:[#allocation195_spill] sm:$0xff]  ;;  %v8477_v46 = vld [vmem:[#allocation162_spill] sm:$0xff]  ;;  %v8481_v11 = vld [vmem:[#allocation161_spill] sm:$0xff] }
0x315f   :  { %4940 = vmatpush3.msra.mxu0 %v8454_v31  ;;  %4906 = vmatprep.subr.mxu1 %v8455_v24  ;;  %v8478_v48 = vld [vmem:[#allocation194_spill] sm:$0xff]  ;;  %v8483_v55 = vld [vmem:[#allocation176_spill] sm:$0xff]  ;;  %v8487_v45 = vld [vmem:[#allocation175_spill] sm:$0xff] }
0x3160   :  { %4941 = vmatprep.subr.mxu0 %v8456_v15  ;;  %4907 = vmatpush3.msra.mxu1 %v8457_v8  ;;  %v8484_v56 = vld [vmem:[#allocation208_spill] sm:$0xff]  ;;  %v8488_v6 = vld [vmem:[#allocation207_spill] sm:$0xff]  ;;  %v8491_v4 = vld [vmem:[#allocation174_spill] sm:$0xff] }
0x3161   :  { %4942 = vmatpush3.msra.mxu0 %v8458_v26  ;;  %4908 = vmatprep.subr.mxu1 %v8459_v61  ;;  %v8485_v57 = vld [vmem:[#allocation160_spill] sm:$0xff]  ;;  %v8489_v7 = vld [vmem:[#allocation159_spill] sm:$0xff]  ;;  %v8492_v63 = vld [vmem:[#allocation206_spill] sm:$0xff] }
0x3162   :  { %4943 = vmatprep.subr.mxu0 %v8460_v50  ;;  %4909 = vmatpush3.msra.mxu1 %v8461_v52  ;;  %v8486_v58 = vld [vmem:[#allocation192_spill] sm:$0xff]  ;;  %v8490_v5 = vld [vmem:[#allocation191_spill] sm:$0xff]  ;;  %v8493_v21 = vld [vmem:[#allocation158_spill] sm:$0xff] }
0x3163   :  { %4944 = vmatpush3.msra.mxu0 %v8462_v32  ;;  %4910 = vmatprep.subr.mxu1 %v8463_v38  ;;  %v8494_v9 = vld [vmem:[#allocation190_spill] sm:$0xff]  ;;  %v8495_v19 = vld [vmem:[#allocation173_spill] sm:$0xff]  ;;  %v8499_v59 = vld [vmem:[#allocation172_spill] sm:$0xff] }
0x3164   :  { %4945 = vmatprep.subr.mxu0 %v8464_v53  ;;  %4911 = vmatpush3.msra.mxu1 %v8465_v60  ;;  %v8496_v40 = vld [vmem:[#allocation205_spill] sm:$0xff]  ;;  %v8500_v41 = vld [vmem:[#allocation204_spill] sm:$0xff]  ;;  %v8503_v33 = vld [vmem:[#allocation171_spill] sm:$0xff] }
0x3165   :  { %4946 = vmatpush3.msra.mxu0 %v8466_v12  ;;  %4912 = vmatprep.subr.mxu1 %v8467_v29  ;;  %v8497_v43 = vld [vmem:[#allocation157_spill] sm:$0xff]  ;;  %v8501_v0 = vld [vmem:[#allocation156_spill] sm:$0xff]  ;;  %v8504_v18 = vld [vmem:[#allocation203_spill] sm:$0xff] }
0x3166   :  { %4947 = vmatprep.subr.mxu0 %v8468_v10  ;;  %4913 = vmatpush3.msra.mxu1 %v8469_v44  ;;  %v8498_v13 = vld [vmem:[#allocation189_spill] sm:$0xff]  ;;  %v8502_v22 = vld [vmem:[#allocation188_spill] sm:$0xff]  ;;  %v8505_v37 = vld [vmem:[#allocation155_spill] sm:$0xff] }
0x3167   :  { %4948 = vmatpush3.msra.mxu0 %v8470_v17  ;;  %4438 = vmatmul.mubr.f32.vlgmr.msra.gmra.mxu1 %v4234_v14  ;;  %v8480_v14 = vld [vmem:[#allocation209_spill] sm:$0xff]  ;;  %v8506_v47 = vld [vmem:[#allocation187_spill] sm:$0xff]  ;;  %v8507_v42 = vld [vmem:[#allocation170_spill] sm:$0xff] }
0x3168   :  { %4508 = vmatmul.mubr.f32.vlgmr.msra.gmra.mxu0 %v4236_v39  ;;  %4952 = vmatprep.subr.mxu1 %v8471_v25  ;;  %v8482_v39 = vld [vmem:[#allocation193_spill] sm:$0xff]  ;;  %v8508_v49 = vld [vmem:[#allocation202_spill] sm:$0xff]  ;;  %v8515_v61 = vld [vmem:[#allocation168_spill] sm:$0xff] }
0x3169   :  { %4987 = vmatprep.subr.mxu0 %v8472_v36  ;;  %4953 = vmatpush3.msra.mxu1 %v8473_v28  ;;  %v8509_v20 = vld [vmem:[#allocation154_spill] sm:$0xff]  ;;  %v8511_v24 = vld [vmem:[#allocation169_spill] sm:$0xff]  ;;  %v8516_v50 = vld [vmem:[#allocation200_spill] sm:$0xff] }
0x316a   :  { %4988 = vmatpush3.msra.mxu0 %v8474_v54  ;;  %4954 = vmatprep.subr.mxu1 %v8475_v62  ;;  %v8510_v31 = vld [vmem:[#allocation186_spill] sm:$0xff]  ;;  %v8512_v15 = vld [vmem:[#allocation201_spill] sm:$0xff]  ;;  %v8517_v52 = vld [vmem:[#allocation152_spill] sm:$0xff] }
0x316b   :  { %4989 = vmatprep.subr.mxu0 %v8476_v35  ;;  %4955 = vmatpush3.msra.mxu1 %v8477_v46  ;;  %v8513_v8 = vld [vmem:[#allocation153_spill] sm:$0xff]  ;;  %v8518_v32 = vld [vmem:[#allocation184_spill] sm:$0xff]  ;;  %v8519_v38 = vld [vmem:[#allocation167_spill] sm:$0xff] }
0x316c   :  { %4990 = vmatpush3.msra.mxu0 %v8478_v48  ;;  %4956 = vmatprep.subr.mxu1 %v8479_v3  ;;  %v8514_v26 = vld [vmem:[#allocation185_spill] sm:$0xff]  ;;  %v8520_v53 = vld [vmem:[#allocation199_spill] sm:$0xff]  ;;  %v8523_v29 = vld [vmem:[#allocation166_spill] sm:$0xff] }
0x316d   :  { %4991 = vmatprep.subr.mxu0 %v8480_v14  ;;  %4957 = vmatpush3.msra.mxu1 %v8481_v11  ;;  %v8521_v60 = vld [vmem:[#allocation151_spill] sm:$0xff]  ;;  %v8524_v10 = vld [vmem:[#allocation198_spill] sm:$0xff]  ;;  %v8527_v25 = vld [vmem:[#allocation165_spill] sm:$0xff] }
0x316e   :  { %4992 = vmatpush3.msra.mxu0 %v8482_v39  ;;  %4958 = vmatprep.subr.mxu1 %v8483_v55  ;;  %v8522_v12 = vld [vmem:[#allocation183_spill] sm:$0xff]  ;;  %v8525_v44 = vld [vmem:[#allocation150_spill] sm:$0xff]  ;;  %v8528_v36 = vld [vmem:[#allocation197_spill] sm:$0xff] }
0x316f   :  { %4993 = vmatprep.subr.mxu0 %v8484_v56  ;;  %4959 = vmatpush3.msra.mxu1 %v8485_v57  ;;  %v8526_v17 = vld [vmem:[#allocation182_spill] sm:$0xff]  ;;  %v8529_v28 = vld [vmem:[#allocation149_spill] sm:$0xff]  ;;  %v8531_v62 = vld [vmem:[#allocation164_spill] sm:$0xff] }
0x3170   :  { %4994 = vmatpush3.msra.mxu0 %v8486_v58  ;;  %4960 = vmatprep.subr.mxu1 %v8487_v45  ;;  %v8530_v54 = vld [vmem:[#allocation181_spill] sm:$0xff]  ;;  %v8532_v35 = vld [vmem:[#allocation196_spill] sm:$0xff] }
0x3171   :  { %4995 = vmatprep.subr.mxu0 %v8488_v6  ;;  %4961 = vmatpush3.msra.mxu1 %v8489_v7  ;;  %v8533_v46 = vld [vmem:[#allocation148_spill] sm:$0xff] }
0x3172   :  { %4996 = vmatpush3.msra.mxu0 %v8490_v5  ;;  %4962 = vmatprep.subr.mxu1 %v8491_v4  ;;  %v8534_v48 = vld [vmem:[#allocation180_spill] sm:$0xff] }
0x3173   :  { %4997 = vmatprep.subr.mxu0 %v8492_v63  ;;  %4963 = vmatpush3.msra.mxu1 %v8493_v21 }
0x3174   :  { %4998 = vmatpush3.msra.mxu0 %v8494_v9  ;;  %4964 = vmatprep.subr.mxu1 %v8495_v19 }
0x3175   :  { %4999 = vmatprep.subr.mxu0 %v8496_v40  ;;  %4965 = vmatpush3.msra.mxu1 %v8497_v43 }
0x3176   :  { %5000 = vmatpush3.msra.mxu0 %v8498_v13  ;;  %4966 = vmatprep.subr.mxu1 %v8499_v59 }
0x3177   :  { %5001 = vmatprep.subr.mxu0 %v8500_v41  ;;  %4967 = vmatpush3.msra.mxu1 %v8501_v0 }
0x3178   :  { %5002 = vmatpush3.msra.mxu0 %v8502_v22  ;;  %4968 = vmatprep.subr.mxu1 %v8503_v33 }
0x3179   :  { %5003 = vmatprep.subr.mxu0 %v8504_v18  ;;  %4969 = vmatpush3.msra.mxu1 %v8505_v37 }
0x317a   :  { %5004 = vmatpush3.msra.mxu0 %v8506_v47  ;;  %4970 = vmatprep.subr.mxu1 %v8507_v42 }
0x317b   :  { %5005 = vmatprep.subr.mxu0 %v8508_v49  ;;  %4971 = vmatpush3.msra.mxu1 %v8509_v20 }
0x317c   :  { %5006 = vmatpush3.msra.mxu0 %v8510_v31  ;;  %4972 = vmatprep.subr.mxu1 %v8511_v24 }
0x317d   :  { %5007 = vmatprep.subr.mxu0 %v8512_v15  ;;  %4973 = vmatpush3.msra.mxu1 %v8513_v8 }
0x317e   :  { %5008 = vmatpush3.msra.mxu0 %v8514_v26  ;;  %4974 = vmatprep.subr.mxu1 %v8515_v61 }
0x317f   :  { %5009 = vmatprep.subr.mxu0 %v8516_v50  ;;  %4975 = vmatpush3.msra.mxu1 %v8517_v52 }
0x3180   :  { %5010 = vmatpush3.msra.mxu0 %v8518_v32  ;;  %4976 = vmatprep.subr.mxu1 %v8519_v38 }
0x3181   :  { %5011 = vmatprep.subr.mxu0 %v8520_v53  ;;  %4977 = vmatpush3.msra.mxu1 %v8521_v60 }
0x3182   :  { %5012 = vmatpush3.msra.mxu0 %v8522_v12  ;;  %4978 = vmatprep.subr.mxu1 %v8523_v29 }
0x3183   :  { %5013 = vmatprep.subr.mxu0 %v8524_v10  ;;  %4979 = vmatpush3.msra.mxu1 %v8525_v44 }
0x3184   :  { %5014 = vmatpush3.msra.mxu0 %v8526_v17  ;;  %4980 = vmatprep.subr.mxu1 %v8527_v25 }
0x3185   :  { %5015 = vmatprep.subr.mxu0 %v8528_v36  ;;  %4981 = vmatpush3.msra.mxu1 %v8529_v28 }
0x3186   :  { %5016 = vmatpush3.msra.mxu0 %v8530_v54  ;;  %4982 = vmatprep.subr.mxu1 %v8531_v62 }
0x3187   :  { %5017 = vmatprep.subr.mxu0 %v8532_v35  ;;  %4983 = vmatpush3.msra.mxu1 %v8533_v46 }
0x3188   :  { %4577 = vmatprep.mubr.f32.mxu1 %v4239_v16  ;;  %5018 = vmatpush3.msra.mxu0 %v8534_v48 }
0x3189   :  { %4647 = vmatprep.mubr.f32.mxu0 %v4241_v27  ;;  %4578 = vmatmul.mubr.f32.vlgmr.msra.gmra.mxu1 %v4238_v1  ;;  %v4823_v1 = vld [vmem:[%s8105_s7] ss:$0 sm:$0xff] }
0x318a   :  { %4648 = vmatmul.mubr.f32.vlgmr.msra.gmra.mxu0 %v4240_v34 }
0x3227   :  { %v4914_v3 = vpop.f32.mrf.mxu1 }
0x3228   :  { %v4949_v14 = vpop.f32.mrf.mxu0 }
0x3229   :  { %v4915_v11 = vpop.f32.mrf.mxu1 }
0x322a   :  { %v4950_v39 = vpop.f32.mrf.mxu0  ;;  %v4916_v55 = vadd.f32 %v4915_v11, %v4914_v3 }
0x322b   :  { %v4951_v56 = vadd.f32 %v4950_v39, %v4949_v14 }
0x322d   :  { %v4510_v45 = vadd.f32 %v4951_v56, %v4916_v55 }
0x3249   :  { %v4984_v57 = vpop.f32.mrf.mxu1 }
0x324a   :  { %v5019_v2 = vpop.f32.mrf.mxu0 }
0x324b   :  { %v4985_v16 = vpop.f32.mrf.mxu1 }
0x324c   :  { %v5020_v58 = vpop.f32.mrf.mxu0  ;;  %v4986_v6 = vadd.f32 %v4985_v16, %v4984_v57 }
0x324d   :  { %v5021_v27 = vadd.f32 %v5020_v58, %v5019_v2 }
0x324e   :  { %v4580_v23 = vadd.f32 %v4986_v6, %v4510_v45 }
0x3250   :  { %v4650_v7 = vadd.f32 %v5021_v27, %v4580_v23 }
0x3252   :  { %v4663_v51 = vrot.slane %v4650_v7, 2  ;;  %v4661_v30 = vadd.f32 %v4823_v1, %v4650_v7 }
0x3254   :  { %4664 = vrot.lane.b32.xlu0 %v4663_v51, %s5440_s6 }
0x32c6   :  { %v4665_v34 = vpop.permute.xlu0 %4664 }
0x32c7   :  { %v4667_v5 = vadd.f32 %v4665_v34, %v4661_v30 }
0x32c9   :  { %4669 = vst.msk [vmem:[#allocation10] sm:$0x3] %vm4668_vm11, %v4667_v5 }
0x32ca   :  { %5417 = shalt.err (!%p5414_p4)
}
0x32cb   :  { %4679 = dma.vmem_to_hbm [thread:$0]  %s4677_s29, 32, %s8110_s12, [#allocation11]  }
0x32cc   :  { %5434 = dma.done.wait [#allocation11], 32  }
0x32cd   :  { %5435 = vsyncadd [#allocation11], 4294967264 }
0x32ce   :  { %4683 = vsyncpa [#allocation11], 1 }
0x32cf   :  { %4684 = vsyncmov [#allocation9] }
0x32d2   :  { %s4685_s7 = vpop.sfrf %4684 }
0x32d3   :  { %p4824_p5 = scmp.ne.s32.totalorder %s4685_s7, 0 }
0x32d5   :  { %4689 = shalt.err (%p4824_p5)  }
0x32d6   :  { %4691 = vsyncmov [#allocation9 + $0x1] }
0x32d9   :  { %s4692_s15 = vpop.sfrf %4691 }
0x32da   :  { %p4825_p6 = scmp.ne.s32.totalorder %s4692_s15, 0 }
0x32dc   :  { %4696 = shalt.err (%p4825_p6)  }
0x32dd   :  { %4698 = vsyncmov [#allocation9 + $0x2] }
0x32e0   :  { %s4699_s16 = vpop.sfrf %4698 }
0x32e1   :  { %p4826_p7 = scmp.ne.s32.totalorder %s4699_s16, 0 }
0x32e3   :  { %4703 = shalt.err (%p4826_p7)  }
0x32e4   :  { %4705 = vsyncmov [#allocation9 + $0x3] }
0x32e7   :  { %s4706_s8 = vpop.sfrf %4705 }
0x32e8   :  { %p4827_p8 = scmp.ne.s32.totalorder %s4706_s8, 0 }
0x32ea   :  { %4710 = shalt.err (%p4827_p8)  }

</bundles_post_ra>
